<compile_context>
chip_gen: v5e
topology: v5e:2x2
jax: 0.10.0
libtpu: 0.0.40
codegen_flags: <defaults>
</compile_context>

<pallas_src>
import functools

import jax
import jax.numpy as jnp
import numpy as np
from jax.experimental import pallas as pl
from jax.experimental.pallas import tpu as pltpu

GROUPS = 64          # 64 frequency bins, hardcoded in the module
KSIZE = 3
PAD = 1


def _make_kernel(TH, W, H, GCin, GCout, n_tiles):
    K = KSIZE
    NBUF = 2 if n_tiles > 1 else 1            # double-buffer only if >1 row tile
    last_slot = (n_tiles - 1) % NBUF          # static slot of the last row tile

    def kernel(x_hbm, w_ref, b_ref, o_ref, xwin, xstage, sem):
        n = pl.program_id(0)                  # batch index  (parallel)
        t = pl.program_id(1)                  # row-tile idx (sequential / arbitrary)
        slot = (t % NBUF) if NBUF == 2 else 0

        def start_fetch(tt, s):
            """Issue the 3 static-size DMAs filling slot `s` with tile tt's halo window."""
            # body rows [tt*TH, tt*TH+TH) -> window rows [1, TH+1), cols [1, W+1)
            pltpu.make_async_copy(
                x_hbm.at[n, pl.ds(tt * TH, TH), :, :],
                xwin.at[s, pl.ds(1, TH), pl.ds(1, W), :],
                sem.at[s, 0]).start()
            # top halo row (clamped at the image edge; zeroed later when tt == 0)
            top = jnp.maximum(tt * TH - 1, 0)
            pltpu.make_async_copy(
                x_hbm.at[n, pl.ds(top, 1), :, :],
                xwin.at[s, pl.ds(0, 1), pl.ds(1, W), :],
                sem.at[s, 1]).start()
            # bottom halo row (clamped; zeroed later when tt == n_tiles-1)
            bot = jnp.minimum((tt + 1) * TH, H - 1)
            pltpu.make_async_copy(
                x_hbm.at[n, pl.ds(bot, 1), :, :],
                xwin.at[s, pl.ds(TH + 1, 1), pl.ds(1, W), :],
                sem.at[s, 2]).start()

        def wait_fetch(s):
            # Reconstruct matching descriptors (src position is irrelevant for wait).
            pltpu.make_async_copy(
                x_hbm.at[n, pl.ds(0, TH), :, :],
                xwin.at[s, pl.ds(1, TH), pl.ds(1, W), :],
                sem.at[s, 0]).wait()
            pltpu.make_async_copy(
                x_hbm.at[n, pl.ds(0, 1), :, :],
                xwin.at[s, pl.ds(0, 1), pl.ds(1, W), :],
                sem.at[s, 1]).wait()
            pltpu.make_async_copy(
                x_hbm.at[n, pl.ds(0, 1), :, :],
                xwin.at[s, pl.ds(TH + 1, 1), pl.ds(1, W), :],
                sem.at[s, 2]).wait()

        # Prime the pipeline at the first row-tile of every image.
        @pl.when(t == 0)
        def _():
            start_fetch(0, 0)

        # Prefetch the next tile's window into the other slot (overlaps this
        # tile's staging + matmuls).
        if NBUF == 2:
            @pl.when(t + 1 < n_tiles)
            def _():
                start_fetch(t + 1, 1 - slot)

        wait_fetch(slot)

        # ---- in-kernel zero padding fix-ups ---------------------------------
        # Pad columns 0 and W+1 are never DMA targets -> zero them (both slots,
        # static indices; disjoint from any in-flight DMA region).
        zcol = jnp.zeros((TH + 2, 1, GCin), jnp.float32)
        for s in range(NBUF):
            xwin[s, :, 0:1, :] = zcol
            xwin[s, :, W + 1:W + 2, :] = zcol
        # Image-boundary halo rows were fetched from clamped row indices -> zero.
        zrow = jnp.zeros((1, W + 2, GCin), jnp.float32)

        @pl.when(t == 0)
        def _():
            xwin[0, 0:1, :, :] = zrow                      # top pad row (tile 0 uses slot 0)

        @pl.when(t == n_tiles - 1)
        def _():
            xwin[last_slot, TH + 1:TH + 2, :, :] = zrow    # bottom pad row

        # ---- stage the 3 kw-shifts once (bf16), folding kw into the K dim ----
        # xstage[r*W + c, kw*GCin + ch] = xwin[slot, r, c + kw, ch]
        for kw in range(K):
            blk = xwin[slot, :, kw:kw + W, :]              # (TH+2, W, GCin) f32
            xstage[:, kw * GCin:(kw + 1) * GCin] = (
                blk.reshape((TH + 2) * W, GCin).astype(jnp.bfloat16))

        # ---- 3 matmuls of (TH*W, 3*GCin) x (3*GCin, GCout), f32 accumulation
        #      directly into the f32 output block; bias folded into tap 0 -------
        bias = b_ref[...]                                  # (1, GCout) f32
        for kh in range(K):
            xs = xstage[kh * W:kh * W + TH * W, :]         # free row-offset slice
            part = jnp.dot(xs, w_ref[kh], preferred_element_type=jnp.float32)
            if kh == 0:
                o_ref[...] = (part + bias).reshape(TH, W, GCout)
            else:
                o_ref[...] += part.reshape(TH, W, GCout)

    return kernel


@functools.partial(jax.jit, static_argnames=("groups", "row_tile"))
def per_frequency_convolution(x, weight, bias, *, groups=GROUPS, row_tile=16):
    """Grouped 3x3 conv, stride 1, padding 1, dilation 1 (PyTorch Conv2d semantics).

    x      : (N, groups*Cin, H, W)    float32, NCHW (PyTorch layout)
    weight : (groups*Cout, Cin, 3, 3) float32, OIHW (PyTorch layout)
    bias   : (groups*Cout,)           float32
    returns: (N, groups*Cout, H, W)   float32, NCHW
    """
    N, c_in_total, H, W = x.shape
    Cin = c_in_total // groups
    Cout = weight.shape[0] // groups
    GCin = groups * Cin
    GCout = groups * Cout
    K = KSIZE

    TH = min(row_tile, H)
    assert H % TH == 0, "row_tile must divide H"
    n_tiles = H // TH

    # ---- glue: single NCHW -> NHWC transpose.  No HBM pad (fused in-kernel). ----
    xt = jnp.transpose(x, (0, 2, 3, 1))                        # (N, H, W, GCin) f32

    # Block-diagonal weights with kw folded onto the contraction axis:
    #   wstk[kh, kw*GCin + g*Cin + ci, g*Cout + co] = weight[g*Cout + co, ci, kh, kw]
    # bf16 resident block is 3*384*128*2 B = 288 KiB.
    w_r = weight.reshape(groups, Cout, Cin, K, K)              # [g, co, ci, kh, kw]
    eye = jnp.eye(groups, dtype=weight.dtype)
    wbig = jnp.einsum("goiab,gh->abgiho", w_r, eye).reshape(K, K, GCin, GCout)
    wstk = wbig.reshape(K, K * GCin, GCout).astype(jnp.bfloat16)
    b2 = bias.reshape(1, GCout).astype(jnp.float32)

    kernel = _make_kernel(TH, W, H, GCin, GCout, n_tiles)

    # Issued-to-MXU FLOPs (64x zero-inflated by the block-diagonal trick) — only a
    # scheduler hint, not an efficiency metric.
    flops = 2 * N * H * W * K * K * GCin * GCout
    bytes_accessed = (4 * xt.size * (TH + 2) // TH + 2 * wstk.size
                      + 4 * b2.size + 4 * N * H * W * GCout)

    # VMEM per step (W=512, TH=16): xwin ~9.5 MiB + xstage ~7 MiB + 2x output
    # block ~8.4 MiB + weights ~0.6 MiB  ≈ 25 MiB < 32 MiB.  For very wide images
    # (W > ~640) drop row_tile back to 8.
    out_nhwc = pl.pallas_call(
        kernel,
        out_shape=jax.ShapeDtypeStruct((N, H, W, GCout), jnp.float32),
        grid_spec=pltpu.PrefetchScalarGridSpec(
            num_scalar_prefetch=0,
            grid=(N, n_tiles),
            in_specs=[
                pl.BlockSpec(memory_space=pl.ANY),             # unpadded input stays in HBM
                pl.BlockSpec((K, K * GCin, GCout), lambda n, t: (0, 0, 0)),
                pl.BlockSpec((1, GCout), lambda n, t: (0, 0)),
            ],
            out_specs=pl.BlockSpec((None, TH, W, GCout), lambda n, t: (n, t, 0, 0)),
            scratch_shapes=[
                pltpu.VMEM((2 if n_tiles > 1 else 1, TH + 2, W + 2, GCin),
                           jnp.float32),                       # double-buffered halo window
                pltpu.VMEM(((TH + 2) * W, K * GCin), jnp.bfloat16),  # kw-shift staging
                pltpu.SemaphoreType.DMA((2 if n_tiles > 1 else 1, 3)),
            ],
        ),
        compiler_params=pltpu.CompilerParams(
            dimension_semantics=("parallel", "arbitrary"),
            vmem_limit_bytes=32 * 1024 * 1024,
        ),
        cost_estimate=pl.CostEstimate(
            flops=flops, transcendentals=0, bytes_accessed=bytes_accessed),
    )(xt, wstk, b2)

    # ---- glue: one transpose out, back to NCHW ----
    return jnp.transpose(out_nhwc, (0, 3, 1, 2))


def _reference(x, weight, bias):
    ref = jax.lax.conv_general_dilated(
        x,
        weight,
        window_strides=(1, 1),
        padding=((PAD, PAD), (PAD, PAD)),
        dimension_numbers=("NCHW", "OIHW", "NCHW"),
        feature_group_count=GROUPS,
    )
    return ref + bias[None, :, None, None]


if __name__ == "__main__":
    # PerFrequencyConvolution(in_channels=2, out_channels=2) -> Conv2d(128, 128, 3, groups=64)
    in_channels = 2
    out_channels = 2
    N, H, W = 2, 16, 16

    key = jax.random.PRNGKey(0)
    kx, kw_key, kb = jax.random.split(key, 3)
    x = jax.random.normal(kx, (N, in_channels * GROUPS, H, W), dtype=jnp.float32)
    weight = jax.random.normal(
        kw_key, (out_channels * GROUPS, in_channels, KSIZE, KSIZE), dtype=jnp.float32
    ) * 0.1
    bias = jax.random.normal(kb, (out_channels * GROUPS,), dtype=jnp.float32) * 0.1

    y = jax.block_until_ready(per_frequency_convolution(x, weight, bias))
    y_ref = jax.block_until_ready(_reference(x, weight, bias))
    # bf16 MXU inputs with f32 accumulation -> tolerance looser than pure f32.
    np.testing.assert_allclose(np.asarray(y), np.asarray(y_ref), rtol=2e-2, atol=2e-2)

    print("KERNEL_OK")
</pallas_src>

<mosaic_0001>
module attributes {stable_mosaic.version = 11 : i64} {
  func.func @kernel(%arg0: i32, %arg1: i32, %arg2: memref<2x16x16x128xf32, #tpu.memory_space<any>>, %arg3: memref<3x384x128xbf16, #tpu.memory_space<vmem>>, %arg4: memref<1x128xf32, #tpu.memory_space<vmem>>, %arg5: memref<1x16x16x128xf32, #tpu.memory_space<vmem>>, %arg6: memref<1x18x18x128xf32, #tpu.memory_space<vmem>>, %arg7: memref<288x384xbf16, #tpu.memory_space<vmem>>, %arg8: memref<1x3x!tpu.dma_semaphore, #tpu.memory_space<semaphore_mem>>) attributes {dimension_semantics = [#tpu.dimension_semantics<parallel>, #tpu.dimension_semantics<arbitrary>], iteration_bounds = array<i64: 2, 1>, scalar_prefetch = 0 : i64, scratch_operands = 3 : i64, tpu.core_type = #tpu.core_type<tc>, window_params = [{}, {pipeline_mode = #tpu.pipeline_mode<synchronous>, transform_indices = @transform_1, window_bounds = array<i64: 3, 384, 128>}, {pipeline_mode = #tpu.pipeline_mode<synchronous>, transform_indices = @transform_2, window_bounds = array<i64: 1, 128>}, {transform_indices = @transform_3, window_bounds = array<i64: 1, 16, 16, 128>}]} {
    %c0_i32 = arith.constant 0 : i32
    %0 = arith.cmpi eq, %arg1, %c0_i32 : i32
    %1 = arith.extui %0 : i1 to i32
    %c0_i32_0 = arith.constant 0 : i32
    %2 = arith.cmpi ne, %1, %c0_i32_0 : i32
    scf.if %2 {
      %c0_i32_88 = arith.constant 0 : i32
      %c0_i32_89 = arith.constant 0 : i32
      %c0_i32_90 = arith.constant 0 : i32
      %c0_i32_91 = arith.constant 0 : i32
      %c0_i32_92 = arith.constant 0 : i32
      %c0_i32_93 = arith.constant 0 : i32
      %83 = tpu.memref_slice %arg2[%arg0, %c0_i32_91, %c0_i32_92, %c0_i32_93] : memref<2x16x16x128xf32, #tpu.memory_space<any>> -> memref<1x16x16x128xf32, #tpu.memory_space<any>>
      %84 = tpu.memref_squeeze %83 : memref<1x16x16x128xf32, #tpu.memory_space<any>> -> memref<16x16x128xf32, #tpu.memory_space<any>>
      %c1_i32_94 = arith.constant 1 : i32
      %c1_i32_95 = arith.constant 1 : i32
      %c0_i32_96 = arith.constant 0 : i32
      %85 = tpu.memref_slice %arg6[%c0_i32_88, %c1_i32_94, %c1_i32_95, %c0_i32_96] : memref<1x18x18x128xf32, #tpu.memory_space<vmem>> -> memref<1x16x16x128xf32, #tpu.memory_space<vmem>>
      %86 = tpu.memref_squeeze %85 : memref<1x16x16x128xf32, #tpu.memory_space<vmem>> -> memref<16x16x128xf32, #tpu.memory_space<vmem>>
      %87 = tpu.memref_slice %arg8[%c0_i32_89, %c0_i32_90] : memref<1x3x!tpu.dma_semaphore, #tpu.memory_space<semaphore_mem>> -> memref<1x1x!tpu.dma_semaphore, #tpu.memory_space<semaphore_mem>>
      %88 = tpu.memref_squeeze %87 : memref<1x1x!tpu.dma_semaphore, #tpu.memory_space<semaphore_mem>> -> memref<!tpu.dma_semaphore, #tpu.memory_space<semaphore_mem>>
      tpu.enqueue_dma source(%84 : memref<16x16x128xf32, #tpu.memory_space<any>>) target(%86 : memref<16x16x128xf32, #tpu.memory_space<vmem>>) target_semaphore(%88 : memref<!tpu.dma_semaphore, #tpu.memory_space<semaphore_mem>>)
      %c-1_i32 = arith.constant -1 : i32
      %c0_i32_97 = arith.constant 0 : i32
      %89 = arith.maxsi %c-1_i32, %c0_i32_97 : i32
      %c0_i32_98 = arith.constant 0 : i32
      %c0_i32_99 = arith.constant 0 : i32
      %c1_i32_100 = arith.constant 1 : i32
      %c0_i32_101 = arith.constant 0 : i32
      %c0_i32_102 = arith.constant 0 : i32
      %90 = tpu.memref_slice %arg2[%arg0, %89, %c0_i32_101, %c0_i32_102] : memref<2x16x16x128xf32, #tpu.memory_space<any>> -> memref<1x1x16x128xf32, #tpu.memory_space<any>>
      %91 = tpu.memref_squeeze %90 : memref<1x1x16x128xf32, #tpu.memory_space<any>> -> memref<1x16x128xf32, #tpu.memory_space<any>>
      %c0_i32_103 = arith.constant 0 : i32
      %c1_i32_104 = arith.constant 1 : i32
      %c0_i32_105 = arith.constant 0 : i32
      %92 = tpu.memref_slice %arg6[%c0_i32_98, %c0_i32_103, %c1_i32_104, %c0_i32_105] : memref<1x18x18x128xf32, #tpu.memory_space<vmem>> -> memref<1x1x16x128xf32, #tpu.memory_space<vmem>>
      %93 = tpu.memref_squeeze %92 : memref<1x1x16x128xf32, #tpu.memory_space<vmem>> -> memref<1x16x128xf32, #tpu.memory_space<vmem>>
      %94 = tpu.memref_slice %arg8[%c0_i32_99, %c1_i32_100] : memref<1x3x!tpu.dma_semaphore, #tpu.memory_space<semaphore_mem>> -> memref<1x1x!tpu.dma_semaphore, #tpu.memory_space<semaphore_mem>>
      %95 = tpu.memref_squeeze %94 : memref<1x1x!tpu.dma_semaphore, #tpu.memory_space<semaphore_mem>> -> memref<!tpu.dma_semaphore, #tpu.memory_space<semaphore_mem>>
      tpu.enqueue_dma source(%91 : memref<1x16x128xf32, #tpu.memory_space<any>>) target(%93 : memref<1x16x128xf32, #tpu.memory_space<vmem>>) target_semaphore(%95 : memref<!tpu.dma_semaphore, #tpu.memory_space<semaphore_mem>>)
      %c16_i32 = arith.constant 16 : i32
      %c15_i32 = arith.constant 15 : i32
      %96 = arith.minsi %c16_i32, %c15_i32 : i32
      %c0_i32_106 = arith.constant 0 : i32
      %c0_i32_107 = arith.constant 0 : i32
      %c2_i32_108 = arith.constant 2 : i32
      %c0_i32_109 = arith.constant 0 : i32
      %c0_i32_110 = arith.constant 0 : i32
      %97 = tpu.memref_slice %arg2[%arg0, %96, %c0_i32_109, %c0_i32_110] : memref<2x16x16x128xf32, #tpu.memory_space<any>> -> memref<1x1x16x128xf32, #tpu.memory_space<any>>
      %98 = tpu.memref_squeeze %97 : memref<1x1x16x128xf32, #tpu.memory_space<any>> -> memref<1x16x128xf32, #tpu.memory_space<any>>
      %c17_i32_111 = arith.constant 17 : i32
      %c1_i32_112 = arith.constant 1 : i32
      %c0_i32_113 = arith.constant 0 : i32
      %99 = tpu.memref_slice %arg6[%c0_i32_106, %c17_i32_111, %c1_i32_112, %c0_i32_113] : memref<1x18x18x128xf32, #tpu.memory_space<vmem>> -> memref<1x1x16x128xf32, #tpu.memory_space<vmem>>
      %100 = tpu.memref_squeeze %99 : memref<1x1x16x128xf32, #tpu.memory_space<vmem>> -> memref<1x16x128xf32, #tpu.memory_space<vmem>>
      %101 = tpu.memref_slice %arg8[%c0_i32_107, %c2_i32_108] : memref<1x3x!tpu.dma_semaphore, #tpu.memory_space<semaphore_mem>> -> memref<1x1x!tpu.dma_semaphore, #tpu.memory_space<semaphore_mem>>
      %102 = tpu.memref_squeeze %101 : memref<1x1x!tpu.dma_semaphore, #tpu.memory_space<semaphore_mem>> -> memref<!tpu.dma_semaphore, #tpu.memory_space<semaphore_mem>>
      tpu.enqueue_dma source(%98 : memref<1x16x128xf32, #tpu.memory_space<any>>) target(%100 : memref<1x16x128xf32, #tpu.memory_space<vmem>>) target_semaphore(%102 : memref<!tpu.dma_semaphore, #tpu.memory_space<semaphore_mem>>)
    } else {
    }
    %c0_i32_1 = arith.constant 0 : i32
    %c0_i32_2 = arith.constant 0 : i32
    %c0_i32_3 = arith.constant 0 : i32
    %c0_i32_4 = arith.constant 0 : i32
    %c0_i32_5 = arith.constant 0 : i32
    %c0_i32_6 = arith.constant 0 : i32
    %3 = tpu.memref_slice %arg2[%arg0, %c0_i32_4, %c0_i32_5, %c0_i32_6] : memref<2x16x16x128xf32, #tpu.memory_space<any>> -> memref<1x16x16x128xf32, #tpu.memory_space<any>>
    %4 = tpu.memref_squeeze %3 : memref<1x16x16x128xf32, #tpu.memory_space<any>> -> memref<16x16x128xf32, #tpu.memory_space<any>>
    %c1_i32 = arith.constant 1 : i32
    %c1_i32_7 = arith.constant 1 : i32
    %c0_i32_8 = arith.constant 0 : i32
    %5 = tpu.memref_slice %arg6[%c0_i32_1, %c1_i32, %c1_i32_7, %c0_i32_8] : memref<1x18x18x128xf32, #tpu.memory_space<vmem>> -> memref<1x16x16x128xf32, #tpu.memory_space<vmem>>
    %6 = tpu.memref_squeeze %5 : memref<1x16x16x128xf32, #tpu.memory_space<vmem>> -> memref<16x16x128xf32, #tpu.memory_space<vmem>>
    %7 = tpu.memref_slice %arg8[%c0_i32_2, %c0_i32_3] : memref<1x3x!tpu.dma_semaphore, #tpu.memory_space<semaphore_mem>> -> memref<1x1x!tpu.dma_semaphore, #tpu.memory_space<semaphore_mem>>
    %8 = tpu.memref_squeeze %7 : memref<1x1x!tpu.dma_semaphore, #tpu.memory_space<semaphore_mem>> -> memref<!tpu.dma_semaphore, #tpu.memory_space<semaphore_mem>>
    tpu.wait_dma2 semaphore(%8 : memref<!tpu.dma_semaphore, #tpu.memory_space<semaphore_mem>>) src(%4 : memref<16x16x128xf32, #tpu.memory_space<any>>) dst(%6 : memref<16x16x128xf32, #tpu.memory_space<vmem>>)
    %c0_i32_9 = arith.constant 0 : i32
    %c0_i32_10 = arith.constant 0 : i32
    %c1_i32_11 = arith.constant 1 : i32
    %c0_i32_12 = arith.constant 0 : i32
    %c0_i32_13 = arith.constant 0 : i32
    %c0_i32_14 = arith.constant 0 : i32
    %9 = tpu.memref_slice %arg2[%arg0, %c0_i32_12, %c0_i32_13, %c0_i32_14] : memref<2x16x16x128xf32, #tpu.memory_space<any>> -> memref<1x1x16x128xf32, #tpu.memory_space<any>>
    %10 = tpu.memref_squeeze %9 : memref<1x1x16x128xf32, #tpu.memory_space<any>> -> memref<1x16x128xf32, #tpu.memory_space<any>>
    %c0_i32_15 = arith.constant 0 : i32
    %c1_i32_16 = arith.constant 1 : i32
    %c0_i32_17 = arith.constant 0 : i32
    %11 = tpu.memref_slice %arg6[%c0_i32_9, %c0_i32_15, %c1_i32_16, %c0_i32_17] : memref<1x18x18x128xf32, #tpu.memory_space<vmem>> -> memref<1x1x16x128xf32, #tpu.memory_space<vmem>>
    %12 = tpu.memref_squeeze %11 : memref<1x1x16x128xf32, #tpu.memory_space<vmem>> -> memref<1x16x128xf32, #tpu.memory_space<vmem>>
    %13 = tpu.memref_slice %arg8[%c0_i32_10, %c1_i32_11] : memref<1x3x!tpu.dma_semaphore, #tpu.memory_space<semaphore_mem>> -> memref<1x1x!tpu.dma_semaphore, #tpu.memory_space<semaphore_mem>>
    %14 = tpu.memref_squeeze %13 : memref<1x1x!tpu.dma_semaphore, #tpu.memory_space<semaphore_mem>> -> memref<!tpu.dma_semaphore, #tpu.memory_space<semaphore_mem>>
    tpu.wait_dma2 semaphore(%14 : memref<!tpu.dma_semaphore, #tpu.memory_space<semaphore_mem>>) src(%10 : memref<1x16x128xf32, #tpu.memory_space<any>>) dst(%12 : memref<1x16x128xf32, #tpu.memory_space<vmem>>)
    %c0_i32_18 = arith.constant 0 : i32
    %c0_i32_19 = arith.constant 0 : i32
    %c2_i32 = arith.constant 2 : i32
    %c0_i32_20 = arith.constant 0 : i32
    %c0_i32_21 = arith.constant 0 : i32
    %c0_i32_22 = arith.constant 0 : i32
    %15 = tpu.memref_slice %arg2[%arg0, %c0_i32_20, %c0_i32_21, %c0_i32_22] : memref<2x16x16x128xf32, #tpu.memory_space<any>> -> memref<1x1x16x128xf32, #tpu.memory_space<any>>
    %16 = tpu.memref_squeeze %15 : memref<1x1x16x128xf32, #tpu.memory_space<any>> -> memref<1x16x128xf32, #tpu.memory_space<any>>
    %c17_i32 = arith.constant 17 : i32
    %c1_i32_23 = arith.constant 1 : i32
    %c0_i32_24 = arith.constant 0 : i32
    %17 = tpu.memref_slice %arg6[%c0_i32_18, %c17_i32, %c1_i32_23, %c0_i32_24] : memref<1x18x18x128xf32, #tpu.memory_space<vmem>> -> memref<1x1x16x128xf32, #tpu.memory_space<vmem>>
    %18 = tpu.memref_squeeze %17 : memref<1x1x16x128xf32, #tpu.memory_space<vmem>> -> memref<1x16x128xf32, #tpu.memory_space<vmem>>
    %19 = tpu.memref_slice %arg8[%c0_i32_19, %c2_i32] : memref<1x3x!tpu.dma_semaphore, #tpu.memory_space<semaphore_mem>> -> memref<1x1x!tpu.dma_semaphore, #tpu.memory_space<semaphore_mem>>
    %20 = tpu.memref_squeeze %19 : memref<1x1x!tpu.dma_semaphore, #tpu.memory_space<semaphore_mem>> -> memref<!tpu.dma_semaphore, #tpu.memory_space<semaphore_mem>>
    tpu.wait_dma2 semaphore(%20 : memref<!tpu.dma_semaphore, #tpu.memory_space<semaphore_mem>>) src(%16 : memref<1x16x128xf32, #tpu.memory_space<any>>) dst(%18 : memref<1x16x128xf32, #tpu.memory_space<vmem>>)
    %cst = arith.constant 0.000000e+00 : f32
    %21 = vector.broadcast %cst : f32 to vector<18x1x128xf32>
    %c0 = arith.constant 0 : index
    %c0_25 = arith.constant 0 : index
    %c0_26 = arith.constant 0 : index
    %c0_27 = arith.constant 0 : index
    %22 = vector.load %arg6[%c0, %c0_25, %c0_26, %c0_27] : memref<1x18x18x128xf32, #tpu.memory_space<vmem>>, vector<1x18x1x128xf32>
    %23 = vector.shape_cast %22 : vector<1x18x1x128xf32> to vector<18x1x128xf32>
    %24 = vector.shape_cast %21 : vector<18x1x128xf32> to vector<1x18x1x128xf32>
    tpu.vector_store %arg6[%c0, %c0_25, %c0_26, %c0_27], %24 {strides = array<i32>} : memref<1x18x18x128xf32, #tpu.memory_space<vmem>>, vector<1x18x1x128xf32>,
    %c0_28 = arith.constant 0 : index
    %c0_29 = arith.constant 0 : index
    %c17 = arith.constant 17 : index
    %c0_30 = arith.constant 0 : index
    %25 = vector.load %arg6[%c0_28, %c0_29, %c17, %c0_30] : memref<1x18x18x128xf32, #tpu.memory_space<vmem>>, vector<1x18x1x128xf32>
    %26 = vector.shape_cast %25 : vector<1x18x1x128xf32> to vector<18x1x128xf32>
    %27 = vector.shape_cast %21 : vector<18x1x128xf32> to vector<1x18x1x128xf32>
    tpu.vector_store %arg6[%c0_28, %c0_29, %c17, %c0_30], %27 {strides = array<i32>} : memref<1x18x18x128xf32, #tpu.memory_space<vmem>>, vector<1x18x1x128xf32>,
    %cst_31 = arith.constant 0.000000e+00 : f32
    %28 = vector.broadcast %cst_31 : f32 to vector<1x18x128xf32>
    %c0_i32_32 = arith.constant 0 : i32
    %29 = arith.cmpi eq, %arg1, %c0_i32_32 : i32
    %30 = arith.extui %29 : i1 to i32
    %c0_i32_33 = arith.constant 0 : i32
    %31 = arith.cmpi ne, %30, %c0_i32_33 : i32
    scf.if %31 {
      %c0_88 = arith.constant 0 : index
      %c0_89 = arith.constant 0 : index
      %c0_90 = arith.constant 0 : index
      %c0_91 = arith.constant 0 : index
      %83 = vector.load %arg6[%c0_88, %c0_89, %c0_90, %c0_91] : memref<1x18x18x128xf32, #tpu.memory_space<vmem>>, vector<1x1x18x128xf32>
      %84 = vector.shape_cast %83 : vector<1x1x18x128xf32> to vector<1x18x128xf32>
      %85 = vector.shape_cast %28 : vector<1x18x128xf32> to vector<1x1x18x128xf32>
      tpu.vector_store %arg6[%c0_88, %c0_89, %c0_90, %c0_91], %85 {strides = array<i32>} : memref<1x18x18x128xf32, #tpu.memory_space<vmem>>, vector<1x1x18x128xf32>,
    } else {
    }
    %c0_i32_34 = arith.constant 0 : i32
    %32 = arith.cmpi eq, %arg1, %c0_i32_34 : i32
    %33 = arith.extui %32 : i1 to i32
    %c0_i32_35 = arith.constant 0 : i32
    %34 = arith.cmpi ne, %33, %c0_i32_35 : i32
    scf.if %34 {
      %c0_88 = arith.constant 0 : index
      %c17_89 = arith.constant 17 : index
      %c0_90 = arith.constant 0 : index
      %c0_91 = arith.constant 0 : index
      %83 = vector.load %arg6[%c0_88, %c17_89, %c0_90, %c0_91] : memref<1x18x18x128xf32, #tpu.memory_space<vmem>>, vector<1x1x18x128xf32>
      %84 = vector.shape_cast %83 : vector<1x1x18x128xf32> to vector<1x18x128xf32>
      %85 = vector.shape_cast %28 : vector<1x18x128xf32> to vector<1x1x18x128xf32>
      tpu.vector_store %arg6[%c0_88, %c17_89, %c0_90, %c0_91], %85 {strides = array<i32>} : memref<1x18x18x128xf32, #tpu.memory_space<vmem>>, vector<1x1x18x128xf32>,
    } else {
    }
    %c0_36 = arith.constant 0 : index
    %c0_37 = arith.constant 0 : index
    %c0_38 = arith.constant 0 : index
    %c0_39 = arith.constant 0 : index
    %35 = vector.load %arg6[%c0_36, %c0_37, %c0_38, %c0_39] : memref<1x18x18x128xf32, #tpu.memory_space<vmem>>, vector<1x18x16x128xf32>
    %36 = vector.shape_cast %35 : vector<1x18x16x128xf32> to vector<18x16x128xf32>
    %37 = vector.shape_cast %36 : vector<18x16x128xf32> to vector<288x128xf32>
    %38 = arith.truncf %37 : vector<288x128xf32> to vector<288x128xbf16>
    %c0_40 = arith.constant 0 : index
    %c0_41 = arith.constant 0 : index
    %39 = vector.load %arg7[%c0_40, %c0_41] : memref<288x384xbf16, #tpu.memory_space<vmem>>, vector<288x128xbf16>
    tpu.vector_store %arg7[%c0_40, %c0_41], %38 {strides = array<i32>} : memref<288x384xbf16, #tpu.memory_space<vmem>>, vector<288x128xbf16>,
    %c0_42 = arith.constant 0 : index
    %c0_43 = arith.constant 0 : index
    %c1 = arith.constant 1 : index
    %c0_44 = arith.constant 0 : index
    %40 = vector.load %arg6[%c0_42, %c0_43, %c1, %c0_44] : memref<1x18x18x128xf32, #tpu.memory_space<vmem>>, vector<1x18x16x128xf32>
    %41 = vector.shape_cast %40 : vector<1x18x16x128xf32> to vector<18x16x128xf32>
    %42 = vector.shape_cast %41 : vector<18x16x128xf32> to vector<288x128xf32>
    %43 = arith.truncf %42 : vector<288x128xf32> to vector<288x128xbf16>
    %c0_45 = arith.constant 0 : index
    %c128 = arith.constant 128 : index
    %44 = vector.load %arg7[%c0_45, %c128] : memref<288x384xbf16, #tpu.memory_space<vmem>>, vector<288x128xbf16>
    tpu.vector_store %arg7[%c0_45, %c128], %43 {strides = array<i32>} : memref<288x384xbf16, #tpu.memory_space<vmem>>, vector<288x128xbf16>,
    %c0_46 = arith.constant 0 : index
    %c0_47 = arith.constant 0 : index
    %c2 = arith.constant 2 : index
    %c0_48 = arith.constant 0 : index
    %45 = vector.load %arg6[%c0_46, %c0_47, %c2, %c0_48] : memref<1x18x18x128xf32, #tpu.memory_space<vmem>>, vector<1x18x16x128xf32>
    %46 = vector.shape_cast %45 : vector<1x18x16x128xf32> to vector<18x16x128xf32>
    %47 = vector.shape_cast %46 : vector<18x16x128xf32> to vector<288x128xf32>
    %48 = arith.truncf %47 : vector<288x128xf32> to vector<288x128xbf16>
    %c0_49 = arith.constant 0 : index
    %c256 = arith.constant 256 : index
    %49 = vector.load %arg7[%c0_49, %c256] : memref<288x384xbf16, #tpu.memory_space<vmem>>, vector<288x128xbf16>
    tpu.vector_store %arg7[%c0_49, %c256], %48 {strides = array<i32>} : memref<288x384xbf16, #tpu.memory_space<vmem>>, vector<288x128xbf16>,
    %c0_50 = arith.constant 0 : index
    %c0_51 = arith.constant 0 : index
    %50 = vector.load %arg4[%c0_50, %c0_51] : memref<1x128xf32, #tpu.memory_space<vmem>>, vector<1x128xf32>
    %c0_52 = arith.constant 0 : index
    %c0_53 = arith.constant 0 : index
    %51 = vector.load %arg7[%c0_52, %c0_53] : memref<288x384xbf16, #tpu.memory_space<vmem>>, vector<256x384xbf16>
    %c0_54 = arith.constant 0 : index
    %c0_55 = arith.constant 0 : index
    %c0_56 = arith.constant 0 : index
    %52 = vector.load %arg3[%c0_54, %c0_55, %c0_56] : memref<3x384x128xbf16, #tpu.memory_space<vmem>>, vector<1x384x128xbf16>
    %53 = vector.shape_cast %52 : vector<1x384x128xbf16> to vector<384x128xbf16>
    %cst_57 = arith.constant dense<0.000000e+00> : vector<256x128xf32>
    %54 = tpu.matmul %51, %53, %cst_57 {dimension_numbers = #tpu.dot_dimension_numbers<[1], [0], [0], [1], [0, 0, 1, 1], [], []>} : vector<256x384xbf16>, vector<384x128xbf16>, vector<256x128xf32> -> vector<256x128xf32>
    %55 = vector.broadcast %50 : vector<1x128xf32> to vector<256x128xf32>
    %56 = arith.addf %54, %55 : vector<256x128xf32>
    %57 = vector.shape_cast %56 : vector<256x128xf32> to vector<16x16x128xf32>
    %c0_58 = arith.constant 0 : index
    %c0_59 = arith.constant 0 : index
    %c0_60 = arith.constant 0 : index
    %c0_61 = arith.constant 0 : index
    %58 = vector.load %arg5[%c0_58, %c0_59, %c0_60, %c0_61] : memref<1x16x16x128xf32, #tpu.memory_space<vmem>>, vector<1x16x16x128xf32>
    %59 = vector.shape_cast %58 : vector<1x16x16x128xf32> to vector<16x16x128xf32>
    %60 = vector.shape_cast %57 : vector<16x16x128xf32> to vector<1x16x16x128xf32>
    tpu.vector_store %arg5[%c0_58, %c0_59, %c0_60, %c0_61], %60 {strides = array<i32>} : memref<1x16x16x128xf32, #tpu.memory_space<vmem>>, vector<1x16x16x128xf32>,
    %c16 = arith.constant 16 : index
    %c0_62 = arith.constant 0 : index
    %61 = vector.load %arg7[%c16, %c0_62] : memref<288x384xbf16, #tpu.memory_space<vmem>>, vector<256x384xbf16>
    %c1_63 = arith.constant 1 : index
    %c0_64 = arith.constant 0 : index
    %c0_65 = arith.constant 0 : index
    %62 = vector.load %arg3[%c1_63, %c0_64, %c0_65] : memref<3x384x128xbf16, #tpu.memory_space<vmem>>, vector<1x384x128xbf16>
    %63 = vector.shape_cast %62 : vector<1x384x128xbf16> to vector<384x128xbf16>
    %cst_66 = arith.constant dense<0.000000e+00> : vector<256x128xf32>
    %64 = tpu.matmul %61, %63, %cst_66 {dimension_numbers = #tpu.dot_dimension_numbers<[1], [0], [0], [1], [0, 0, 1, 1], [], []>} : vector<256x384xbf16>, vector<384x128xbf16>, vector<256x128xf32> -> vector<256x128xf32>
    %c0_67 = arith.constant 0 : index
    %c0_68 = arith.constant 0 : index
    %c0_69 = arith.constant 0 : index
    %c0_70 = arith.constant 0 : index
    %65 = vector.load %arg5[%c0_67, %c0_68, %c0_69, %c0_70] : memref<1x16x16x128xf32, #tpu.memory_space<vmem>>, vector<1x16x16x128xf32>
    %66 = vector.shape_cast %65 : vector<1x16x16x128xf32> to vector<16x16x128xf32>
    %67 = vector.shape_cast %64 : vector<256x128xf32> to vector<16x16x128xf32>
    %68 = arith.addf %66, %67 : vector<16x16x128xf32>
    %c0_71 = arith.constant 0 : index
    %c0_72 = arith.constant 0 : index
    %c0_73 = arith.constant 0 : index
    %c0_74 = arith.constant 0 : index
    %69 = vector.load %arg5[%c0_71, %c0_72, %c0_73, %c0_74] : memref<1x16x16x128xf32, #tpu.memory_space<vmem>>, vector<1x16x16x128xf32>
    %70 = vector.shape_cast %69 : vector<1x16x16x128xf32> to vector<16x16x128xf32>
    %71 = vector.shape_cast %68 : vector<16x16x128xf32> to vector<1x16x16x128xf32>
    tpu.vector_store %arg5[%c0_71, %c0_72, %c0_73, %c0_74], %71 {strides = array<i32>} : memref<1x16x16x128xf32, #tpu.memory_space<vmem>>, vector<1x16x16x128xf32>,
    %c32 = arith.constant 32 : index
    %c0_75 = arith.constant 0 : index
    %72 = vector.load %arg7[%c32, %c0_75] : memref<288x384xbf16, #tpu.memory_space<vmem>>, vector<256x384xbf16>
    %c2_76 = arith.constant 2 : index
    %c0_77 = arith.constant 0 : index
    %c0_78 = arith.constant 0 : index
    %73 = vector.load %arg3[%c2_76, %c0_77, %c0_78] : memref<3x384x128xbf16, #tpu.memory_space<vmem>>, vector<1x384x128xbf16>
    %74 = vector.shape_cast %73 : vector<1x384x128xbf16> to vector<384x128xbf16>
    %cst_79 = arith.constant dense<0.000000e+00> : vector<256x128xf32>
    %75 = tpu.matmul %72, %74, %cst_79 {dimension_numbers = #tpu.dot_dimension_numbers<[1], [0], [0], [1], [0, 0, 1, 1], [], []>} : vector<256x384xbf16>, vector<384x128xbf16>, vector<256x128xf32> -> vector<256x128xf32>
    %c0_80 = arith.constant 0 : index
    %c0_81 = arith.constant 0 : index
    %c0_82 = arith.constant 0 : index
    %c0_83 = arith.constant 0 : index
    %76 = vector.load %arg5[%c0_80, %c0_81, %c0_82, %c0_83] : memref<1x16x16x128xf32, #tpu.memory_space<vmem>>, vector<1x16x16x128xf32>
    %77 = vector.shape_cast %76 : vector<1x16x16x128xf32> to vector<16x16x128xf32>
    %78 = vector.shape_cast %75 : vector<256x128xf32> to vector<16x16x128xf32>
    %79 = arith.addf %77, %78 : vector<16x16x128xf32>
    %c0_84 = arith.constant 0 : index
    %c0_85 = arith.constant 0 : index
    %c0_86 = arith.constant 0 : index
    %c0_87 = arith.constant 0 : index
    %80 = vector.load %arg5[%c0_84, %c0_85, %c0_86, %c0_87] : memref<1x16x16x128xf32, #tpu.memory_space<vmem>>, vector<1x16x16x128xf32>
    %81 = vector.shape_cast %80 : vector<1x16x16x128xf32> to vector<16x16x128xf32>
    %82 = vector.shape_cast %79 : vector<16x16x128xf32> to vector<1x16x16x128xf32>
    tpu.vector_store %arg5[%c0_84, %c0_85, %c0_86, %c0_87], %82 {strides = array<i32>} : memref<1x16x16x128xf32, #tpu.memory_space<vmem>>, vector<1x16x16x128xf32>,
    return
  }
  func.func @transform_1(%arg0: i32, %arg1: i32) -> (i32, i32, i32) {
    %c0_i32 = arith.constant 0 : i32
    %c0_i32_0 = arith.constant 0 : i32
    %c0_i32_1 = arith.constant 0 : i32
    %c0_i32_2 = arith.constant 0 : i32
    return %c0_i32, %c0_i32_0, %c0_i32_1 : i32, i32, i32
  }
  func.func @transform_2(%arg0: i32, %arg1: i32) -> (i32, i32) {
    %c0_i32 = arith.constant 0 : i32
    %c0_i32_0 = arith.constant 0 : i32
    %c0_i32_1 = arith.constant 0 : i32
    return %c0_i32, %c0_i32_0 : i32, i32
  }
  func.func @transform_3(%arg0: i32, %arg1: i32) -> (i32, i32, i32, i32) {
    %c0_i32 = arith.constant 0 : i32
    %c0_i32_0 = arith.constant 0 : i32
    %c0_i32_1 = arith.constant 0 : i32
    return %arg0, %arg1, %c0_i32, %c0_i32_0 : i32, i32, i32, i32
  }
}

</mosaic_0001>

<bundles_post_ra>
// kernel: per_frequency_convolution.1
= control target key start
LH: loop header
LB: loop body
LE: loop exit
PB: predicated region body
PF: predicated region fallthrough
CT: control target
= control target key end

     0   :  { %8 = vsyncpa [#allocation6], 0  ;;  %s5459_s0 = inlined_call_operand.vmem [shape: f32[2,16,16,128], index: 0, kind: input, shape index: {}]   ;;  %s5460_s1 = inlined_call_operand.vmem [shape: bf16[3,384,128], index: 1, kind: input, shape index: {}]   ;;  %s5461_s2 = inlined_call_operand.vmem [shape: f32[1,128], index: 2, kind: input, shape index: {}]   ;;  %s5462_s3 = inlined_call_operand.hbm [shape: f32[2,16,16,128], index: 3, kind: output, shape index: {}]  }
   0x1   :  { %10 = vsyncpa [#allocation6 + $0x1], 0  ;;  %s4726_s12 = smov 0   ;;  %s4728_s13 = smov 0  }
   0x2   :  { %s4730_s14 = smov 0   ;;  %s4732_s15 = smov 0  }
   0x3   :  { %s4734_s16 = smov 0   ;;  %s4736_s17 = smov 0  }
   0x4 LB: > { %s3337_s18 = sadd.s32 4294967295, %s4700_s17   ;;  %s3338_s19 = sadd.s32 4294967294, %s4700_s17   ;;  %s4700_s17 = sphi %s4736_s17, %s16_s17   ;;  %s4696_s16 = sphi %s4734_s16, %s5469_s16   ;;  %s4692_s15 = sphi %s4732_s15, %s5468_s15   ;;  %s4688_s14 = sphi %s4730_s14, %s5467_s14   ;;  %s4684_s13 = sphi %s4728_s13, %s5466_s13   ;;  %s4680_s12 = sphi %s4726_s12, %s5465_s12  }
   0x5   : > { %s28_s20 = sadd.s32 1, %s4696_s16  ;;  %s79_s21 = sadd.s32 1, %s4688_s14 }
   0x6   : > { %p30_p0 = scmp.ge.s32.totalorder %s28_s20, 2  ;;  %p89_p1 = scmp.ne.s32.totalorder %s4688_s14, %s4684_s13 }
   0x7   : > { %p90_p2 = scmp.eq.s32.totalorder %s3337_s18, 1  ;;  %p95_p3 = scmp.ne.s32.totalorder %s4684_s13, %s4680_s12 }
   0x8   : > { %s5471_s20 = smov (%p30_p0, %s28_s20), 0  ;;  %p96_p5 = scmp.eq.s32.totalorder %s3338_s19, 1 }
   0x9   : > { %p4766_p4 = por %p90_p2, %p89_p1  ;;  %s74_s23 = ssub.s32 %s4696_s16, %s5471_s20 }
   0xa   : > { %p3340_p6 = scmp.ge.s32.totalorder %s4700_s17, 1  ;;  %p77_p7 = scmp.eq.s32.totalorder %s74_s23, 0 }
   0xb   : > { %p4773_p8 = por %p96_p5, %p95_p3  ;;  %p120_p9 = scmp.lt.s32.totalorder %s4700_s17, 3 }
   0xc   : > { %s4779_s25 = scalar_select %p77_p7, %s4688_s14, %s79_s21  }
   0xd   : > { %p121_p10 = pnand %p3340_p6, %p120_p9 }
   0xe   : > { %s134_s26 = sand.u32 (!%p121_p10), 1, %s4684_s13   ;;  %s3342_s27 = sshll.u32 (!%p121_p10), %s4692_s15, 8 }
   0xf   : > { %124 = sbr.rel (%p121_p10) target bundleno = 831 (0x33f), region = 28  ;;  %s4785_s28 = sshll.u32 (!%p121_p10), %s134_s26, 8 }
  0x10   : > { %s4792_s4 = scalar_lea.vmem (!%p121_p10), %s5459_s0, %s3342_s27  ;;  %s4827_s5 = scalar_lea.vmem (!%p121_p10), [#allocation5], %s4785_s28 }
  0x14   : > { %v155_v0 = vld [vmem:[%s4792_s4] sm:$0xff]  ;;  %v157_v1 = vld [vmem:[%s4792_s4 + $0x8] sm:$0xff]  ;;  %v159_v2 = vld [vmem:[%s4792_s4 + $0x10] sm:$0xff] }
  0x15   : > { %156 = vst [vmem:[#allocation2 + $0x19] sm:$0xff] %v155_v0  ;;  %v161_v3 = vld [vmem:[%s4792_s4 + $0x18] sm:$0xff]  ;;  %v163_v4 = vld [vmem:[%s4792_s4 + $0x20] sm:$0xff]  ;;  %v165_v5 = vld [vmem:[%s4792_s4 + $0x28] sm:$0xff] }
  0x16   : > { %158 = vst [vmem:[#allocation2 + $0x21] sm:$0xff] %v157_v1  ;;  %v167_v6 = vld [vmem:[%s4792_s4 + $0x30] sm:$0xff]  ;;  %v169_v7 = vld [vmem:[%s4792_s4 + $0x38] sm:$0xff]  ;;  %v171_v8 = vld [vmem:[%s4792_s4 + $0x40] sm:$0xff] }
  0x17   : > { %160 = vst [vmem:[#allocation2 + $0x31] sm:$0xff] %v159_v2  ;;  %v173_v9 = vld [vmem:[%s4792_s4 + $0x48] sm:$0xff]  ;;  %v175_v10 = vld [vmem:[%s4792_s4 + $0x50] sm:$0xff]  ;;  %v177_v11 = vld [vmem:[%s4792_s4 + $0x58] sm:$0xff] }
  0x18   : > { %162 = vst [vmem:[#allocation2 + $0x39] sm:$0xff] %v161_v3  ;;  %v179_v12 = vld [vmem:[%s4792_s4 + $0x60] sm:$0xff]  ;;  %v181_v13 = vld [vmem:[%s4792_s4 + $0x68] sm:$0xff]  ;;  %v183_v14 = vld [vmem:[%s4792_s4 + $0x70] sm:$0xff] }
  0x19   : > { %164 = vst [vmem:[#allocation2 + $0x49] sm:$0xff] %v163_v4  ;;  %v185_v15 = vld [vmem:[%s4792_s4 + $0x78] sm:$0xff]  ;;  %v187_v16 = vld [vmem:[%s4792_s4 + $0x80] sm:$0xff]  ;;  %v189_v17 = vld [vmem:[%s4792_s4 + $0x88] sm:$0xff] }
  0x1a   : > { %166 = vst [vmem:[#allocation2 + $0x51] sm:$0xff] %v165_v5  ;;  %v191_v18 = vld [vmem:[%s4792_s4 + $0x90] sm:$0xff]  ;;  %v193_v19 = vld [vmem:[%s4792_s4 + $0x98] sm:$0xff]  ;;  %v195_v20 = vld [vmem:[%s4792_s4 + $0xa0] sm:$0xff] }
  0x1b   : > { %168 = vst [vmem:[#allocation2 + $0x61] sm:$0xff] %v167_v6  ;;  %v197_v21 = vld [vmem:[%s4792_s4 + $0xa8] sm:$0xff]  ;;  %v199_v22 = vld [vmem:[%s4792_s4 + $0xb0] sm:$0xff]  ;;  %v201_v23 = vld [vmem:[%s4792_s4 + $0xb8] sm:$0xff] }
  0x1c   : > { %170 = vst [vmem:[#allocation2 + $0x69] sm:$0xff] %v169_v7  ;;  %v203_v24 = vld [vmem:[%s4792_s4 + $0xc0] sm:$0xff]  ;;  %v205_v25 = vld [vmem:[%s4792_s4 + $0xc8] sm:$0xff]  ;;  %v207_v26 = vld [vmem:[%s4792_s4 + $0xd0] sm:$0xff] }
  0x1d   : > { %172 = vst [vmem:[#allocation2 + $0x79] sm:$0xff] %v171_v8  ;;  %v209_v27 = vld [vmem:[%s4792_s4 + $0xd8] sm:$0xff]  ;;  %v211_v28 = vld [vmem:[%s4792_s4 + $0xe0] sm:$0xff]  ;;  %v213_v29 = vld [vmem:[%s4792_s4 + $0xe8] sm:$0xff] }
  0x1e   : > { %174 = vst [vmem:[#allocation2 + $0x81] sm:$0xff] %v173_v9  ;;  %v215_v30 = vld [vmem:[%s4792_s4 + $0xf0] sm:$0xff]  ;;  %v217_v31 = vld [vmem:[%s4792_s4 + $0xf8] sm:$0xff] }
  0x1f   : > { %176 = vst [vmem:[#allocation2 + $0x91] sm:$0xff] %v175_v10 }
  0x20   : > { %178 = vst [vmem:[#allocation2 + $0x99] sm:$0xff] %v177_v11 }
  0x21   : > { %180 = vst [vmem:[#allocation2 + $0xa9] sm:$0xff] %v179_v12 }
  0x22   : > { %182 = vst [vmem:[#allocation2 + $0xb1] sm:$0xff] %v181_v13 }
  0x23   : > { %184 = vst [vmem:[#allocation2 + $0xc1] sm:$0xff] %v183_v14 }
  0x24   : > { %186 = vst [vmem:[#allocation2 + $0xc9] sm:$0xff] %v185_v15 }
  0x25   : > { %188 = vst [vmem:[#allocation2 + $0xd9] sm:$0xff] %v187_v16 }
  0x26   : > { %190 = vst [vmem:[#allocation2 + $0xe1] sm:$0xff] %v189_v17 }
  0x27   : > { %192 = vst [vmem:[#allocation2 + $0xf1] sm:$0xff] %v191_v18 }
  0x28   : > { %194 = vst [vmem:[#allocation2 + $0xf9] sm:$0xff] %v193_v19 }
  0x29   : > { %196 = vst [vmem:[#allocation2 + $0x109] sm:$0xff] %v195_v20 }
  0x2a   : > { %198 = vst [vmem:[#allocation2 + $0x111] sm:$0xff] %v197_v21 }
  0x2b   : > { %200 = vst [vmem:[#allocation2 + $0x121] sm:$0xff] %v199_v22 }
  0x2c   : > { %202 = vst [vmem:[#allocation2 + $0x129] sm:$0xff] %v201_v23 }
  0x2d   : > { %204 = vst [vmem:[#allocation2 + $0x139] sm:$0xff] %v203_v24 }
  0x2e   : > { %206 = vst [vmem:[#allocation2 + $0x141] sm:$0xff] %v205_v25 }
  0x2f   : > { %208 = vst [vmem:[#allocation2 + $0x151] sm:$0xff] %v207_v26 }
  0x30   : > { %210 = vst [vmem:[#allocation2 + $0x159] sm:$0xff] %v209_v27 }
  0x31   : > { %212 = vst [vmem:[#allocation2 + $0x169] sm:$0xff] %v211_v28 }
  0x32   : > { %214 = vst [vmem:[#allocation2 + $0x171] sm:$0xff] %v213_v29 }
  0x33   : > { %216 = vst [vmem:[#allocation2 + $0x181] sm:$0xff] %v215_v30 }
  0x34   : > { %218 = vst [vmem:[#allocation2 + $0x189] sm:$0xff] %v217_v31 }
  0x35   : > { %224 = vsyncadd [#allocation4], 4096  ;;  %v237_v32 = vld [vmem:[%s4792_s4] sm:$0xff]  ;;  %v239_v33 = vld [vmem:[%s4792_s4 + $0x8] sm:$0xff] }
  0x36   : > { %238 = vst [vmem:[#allocation2 + $0x1] sm:$0xff] %v237_v32 }
  0x37   : > { %240 = vst [vmem:[#allocation2 + $0x9] sm:$0xff] %v239_v33 }
  0x38   : > { %246 = vsyncadd [#allocation4 + $0x1], 256  ;;  %v3344_v34 = vld [vmem:[%s4792_s4 + $0xf0] sm:$0xff]  ;;  %v3345_v35 = vld [vmem:[%s4792_s4 + $0xf8] sm:$0xff] }
  0x39   : > { %262 = vst [vmem:[#allocation2 + $0x199] sm:$0xff] %v3344_v34 }
  0x3a   : > { %264 = vst [vmem:[#allocation2 + $0x1a1] sm:$0xff] %v3345_v35 }
  0x3b   : > { %270 = vsyncadd [#allocation4 + $0x2], 256 }
  0x3c   : > { %4668 = dma.done.wait [#allocation4], 4096 }
  0x3d   : > { %4669 = vsyncadd [#allocation4], 4294963200 }
  0x3e   : > { %4670 = dma.done.wait [#allocation4 + $0x1], 256 }
  0x3f   : > { %4671 = vsyncadd [#allocation4 + $0x1], 4294967040 }
  0x40   : > { %4672 = dma.done.wait [#allocation4 + $0x2], 256 }
  0x41   : > { %4673 = vsyncadd [#allocation4 + $0x2], 4294967040  ;;  %v4702_v36 = vmov 0.0   ;;  %v4369_v37 = vld [vmem:[%s5460_s1 + $0x38] sm:$0xff]  ;;  %v4368_v38 = vld [vmem:[%s5460_s1 + $0x30] sm:$0xff]  ;;  %v4703_v20 = vmov 0.0|0.0   ;;  %s3235_s28 = scalar_lea.hbm %s5462_s3, %s3342_s27 }
  0x42   : > { %287 = vst [vmem:[#allocation2 + $0x60] sm:$0x1] %v4702_v36  ;;  %4531 = vmatpush.bf16.msra.mxu1 %v4369_v37  ;;  %4532 = vmatpush.bf16.msra.mxu2 %v4369_v37  ;;  %v338_v40 = vld [vmem:[#allocation2 + $0x68] sm:$0xff]  ;;  %v4366_v44 = vld [vmem:[%s5460_s1 + $0x20] sm:$0xff]  ;;  %v4365_v45 = vld [vmem:[%s5460_s1 + $0x18] sm:$0xff]  ;;  %s3236_s29 = sshll.u32 %s4827_s5, 4  ;;  %s3237_s29 = int_to_ptr.vmem [resolvable:$true] %s3236_s29 }
  0x43   : > { %284 = vst [vmem:[#allocation2 + $0x18] sm:$0x1] %v4702_v36  ;;  %4533 = vmatpush.bf16.msra.mxu3 %v4369_v37  ;;  %1169 = vmatpush.bf16.msra.mxu0 %v4369_v37  ;;  %v374_v42 = vpack.c.bf16 %v338_v40, %v338_v40  ;;  %v4367_v43 = vld [vmem:[%s5460_s1 + $0x28] sm:$0xff]  ;;  %v4364_v46 = vld [vmem:[%s5460_s1 + $0x10] sm:$0xff]  ;;  %v4362_v48 = vld [vmem:[%s5460_s1] sm:$0xff]  ;;  %s3238_s30 = sshll.u32 %s3235_s28, 4  ;;  %s3239_s30 = int_to_ptr.hbm [resolvable:$true] %s3238_s30 }
  0x44   : > { %285 = vst [vmem:[#allocation2 + $0x30] sm:$0x1] %v4702_v36  ;;  %v4363_v47 = vld [vmem:[%s5460_s1 + $0x8] sm:$0xff]  ;;  %v4377_v53 = vld [vmem:[%s5460_s1 + $0x78] sm:$0xff]  ;;  %v4376_v60 = vld [vmem:[%s5460_s1 + $0x70] sm:$0xff]  ;;  %s3221_s15 = scalar_lea.sflag [#allocation6], %s134_s26 }
  0x45   : > { %286 = vst [vmem:[#allocation2 + $0x48] sm:$0x1] %v4702_v36  ;;  %v346_v52 = vld [vmem:[#allocation2 + $0xc8] sm:$0xff]  ;;  %v4385_v54 = vld [vmem:[%s5460_s1 + $0xb8] sm:$0xff]  ;;  %v4384_v61 = vld [vmem:[%s5460_s1 + $0xb0] sm:$0xff]  ;;  %s4630_s4 = sshra.s32 %s3239_s30, 4  ;;  %s4631_s4 = int_to_ptr.hbm [resolvable:$true] %s4630_s4 }
  0x46   : > { %288 = vst [vmem:[#allocation2 + $0x78] sm:$0x1] %v4702_v36  ;;  %4534 = vmatpush.bf16.msra.mxu1 %v4368_v38  ;;  %4535 = vmatpush.bf16.msra.mxu2 %v4368_v38  ;;  %v4441_v56 = vld [vmem:[%s5460_s1 + $0xf8] sm:$0xff]  ;;  %v382_v59 = vpack.c.bf16 %v346_v52, %v346_v52  ;;  %v4440_v63 = vld [vmem:[%s5460_s1 + $0xf0] sm:$0xff]  ;;  %v354_v0 = vld [vmem:[#allocation2 + $0x128] sm:$0xff]  ;;  %s4632_s27 = scalar_lea.hbm %s4631_s4, 256  ;;  %p4637_p0 = scmp.lt.s32.totalorder %s4631_s4, %s5462_s3 }
  0x47   : > { %289 = vst [vmem:[#allocation2 + $0x90] sm:$0x1] %v4702_v36  ;;  %4536 = vmatpush.bf16.msra.mxu3 %v4368_v38  ;;  %1170 = vmatpush.bf16.msra.mxu0 %v4368_v38  ;;  %v4449_v58 = vld [vmem:[%s5460_s1 + $0x138] sm:$0xff]  ;;  %v4375_v3 = vld [vmem:[%s5460_s1 + $0x68] sm:$0xff]  ;;  %v390_v4 = vpack.c.bf16 %v354_v0, %v354_v0  ;;  %v4448_v7 = vld [vmem:[%s5460_s1 + $0x130] sm:$0xff]  ;;  %p4633_p11 = scmp.ne.s32.totalorder %s4631_s4, %s4632_s27  ;;  %s4636_s8 = scalar_lea.hbm %s5462_s3, 512 }
  0x48   : > { %290 = vst [vmem:[#allocation2 + $0xa8] sm:$0x1] %v4702_v36  ;;  %v4383_v5 = vld [vmem:[%s5460_s1 + $0xa8] sm:$0xff]  ;;  %v340_v8 = vld [vmem:[#allocation2 + $0x80] sm:$0xff]  ;;  %v342_v31 = vld [vmem:[#allocation2 + $0x98] sm:$0xff]  ;;  %p4638_p1 = scmp.lt.s32.totalorder %s4636_s8, %s4632_s27 }
  0x49   : > { %v337_v39 = vld [vmem:[#allocation2 + $0x60] sm:$0xff]  ;;  %291 = vst [vmem:[#allocation2 + $0xc0] sm:$0x1] %v4702_v36  ;;  %v4439_v6 = vld [vmem:[%s5460_s1 + $0xe8] sm:$0xff]  ;;  %v376_v16 = vpack.c.bf16 %v340_v8, %v340_v8  ;;  %v350_v37 = vld [vmem:[#allocation2 + $0xf8] sm:$0xff]  ;;  %v378_v40 = vpack.c.bf16 %v342_v31, %v342_v31  ;;  %p4634_p12 = pnand %p4633_p11, %p4766_p4 }
  0x4a   : > { %v373_v41 = vpack.c.bf16 %v337_v39, %v337_v39  ;;  %292 = vst [vmem:[#allocation2 + $0xd8] sm:$0x1] %v4702_v36  ;;  %4537 = vmatpush.bf16.msra.mxu1 %v4367_v43  ;;  %4538 = vmatpush.bf16.msra.mxu2 %v4367_v43  ;;  %v4447_v10 = vld [vmem:[%s5460_s1 + $0x128] sm:$0xff]  ;;  %v348_v12 = vld [vmem:[#allocation2 + $0xe0] sm:$0xff]  ;;  %v331_v25 = vld [vmem:[#allocation2 + $0x18] sm:$0xff]  ;;  %p4639_p2 = por %p4638_p1, %p4637_p0 }
  0x4b   : > { %293 = vst [vmem:[#allocation2 + $0xf0] sm:$0x1] %v4702_v36  ;;  %4539 = vmatpush.bf16.msra.mxu3 %v4367_v43  ;;  %1171 = vmatpush.bf16.msra.mxu0 %v4367_v43  ;;  %v4374_v13 = vld [vmem:[%s5460_s1 + $0x60] sm:$0xff]  ;;  %v384_v24 = vpack.c.bf16 %v348_v12, %v348_v12  ;;  %v367_v30 = vpack.c.bf16 %v331_v25, %v331_v25  ;;  %v334_v52 = vld [vmem:[#allocation2 + $0x38] sm:$0xff]  ;;  %v4436_v0 = vld [vmem:[%s5460_s1 + $0xd0] sm:$0xff]  ;;  %p4635_p13 = pneg %p4634_p12 }
  0x4c   : > { %409 = vst [vmem:[#allocation3 + $0x60] sm:$0xf] %v373_v41  ;;  %v4382_v14 = vld [vmem:[%s5460_s1 + $0xa0] sm:$0xff]  ;;  %v352_v8 = vld [vmem:[#allocation2 + $0x110] sm:$0xff]  ;;  %v4435_v31 = vld [vmem:[%s5460_s1 + $0xc8] sm:$0xff] }
  0x4d   : > { %410 = vst [vmem:[#allocation3 + $0x6c] sm:$0xf] %v374_v42  ;;  %v339_v2 = vld [vmem:[#allocation2 + $0x78] sm:$0xff]  ;;  %v4438_v18 = vld [vmem:[%s5460_s1 + $0xe0] sm:$0xff]  ;;  %v388_v12 = vpack.c.bf16 %v352_v8, %v352_v8  ;;  %p4640_p3 = pnand %p4639_p2, %p4635_p13 }
  0x4e   : > { %294 = vst [vmem:[#allocation2 + $0x108] sm:$0x1] %v4702_v36  ;;  %4540 = vmatpush.bf16.msra.mxu1 %v4366_v44  ;;  %4541 = vmatpush.bf16.msra.mxu2 %v4366_v44  ;;  %v375_v11 = vpack.c.bf16 %v339_v2, %v339_v2  ;;  %v356_v22 = vld [vmem:[#allocation2 + $0x140] sm:$0xff]  ;;  %v341_v29 = vld [vmem:[#allocation2 + $0x90] sm:$0xff] }
  0x4f   : > { %295 = vst [vmem:[#allocation2 + $0x120] sm:$0x1] %v4702_v36  ;;  %4542 = vmatpush.bf16.msra.mxu3 %v4366_v44  ;;  %1172 = vmatpush.bf16.msra.mxu0 %v4366_v44  ;;  %v332_v27 = vld [vmem:[#allocation2 + $0x20] sm:$0xff]  ;;  %v392_v28 = vpack.c.bf16 %v356_v22, %v356_v22  ;;  %v358_v44 = vld [vmem:[#allocation2 + $0x158] sm:$0xff]  ;;  %v343_v2 = vld [vmem:[#allocation2 + $0xa8] sm:$0xff] }
  0x50   : > { %296 = vst [vmem:[#allocation2 + $0x138] sm:$0x1] %v4702_v36  ;;  %v345_v51 = vld [vmem:[#allocation2 + $0xc0] sm:$0xff]  ;;  %v368_v33 = vpack.c.bf16 %v332_v27, %v332_v27  ;;  %v441_v8 = vld [vmem:[#allocation2 + $0x31] sm:$0xff] }
  0x51   : > { %297 = vst [vmem:[#allocation2 + $0x150] sm:$0x1] %v4702_v36  ;;  %v381_v57 = vpack.c.bf16 %v345_v51, %v345_v51  ;;  %v347_v9 = vld [vmem:[#allocation2 + $0xd8] sm:$0xff] }
  0x52   : > { %298 = vst [vmem:[#allocation2 + $0x168] sm:$0x1] %v4702_v36  ;;  %4543 = vmatpush.bf16.msra.mxu1 %v4365_v45  ;;  %4544 = vmatpush.bf16.msra.mxu2 %v4365_v45  ;;  %v383_v21 = vpack.c.bf16 %v347_v9, %v347_v9  ;;  %v349_v34 = vld [vmem:[#allocation2 + $0xf0] sm:$0xff] }
  0x53   : > { %299 = vst [vmem:[#allocation2 + $0x180] sm:$0x1] %v4702_v36  ;;  %4545 = vmatpush.bf16.msra.mxu3 %v4365_v45  ;;  %1173 = vmatpush.bf16.msra.mxu0 %v4365_v45  ;;  %v3396_v49 = vld [vmem:[#allocation3 + $0x60] sm:$0xf]  ;;  %v385_v43 = vpack.c.bf16 %v349_v34, %v349_v34  ;;  %v4370_v34 = vld [vmem:[%s5460_s1 + $0x40] sm:$0xff] }
  0x54   : > { %301 = vst [vmem:[#allocation2 + $0x11] sm:$0x1] %v4702_v36  ;;  %v4327_v50 = vld [vmem:[#allocation3 + $0x68] sm:$0xf0] }
  0x55   : > { %302 = vst [vmem:[#allocation2 + $0x29] sm:$0x1] %v4702_v36  ;;  %v3397_v55 = vor.u32 %v4327_v50, %v3396_v49  ;;  %v333_v49 = vld [vmem:[#allocation2 + $0x30] sm:$0xff] }
  0x56   : > { %303 = vst [vmem:[#allocation2 + $0x41] sm:$0x1] %v4702_v36  ;;  %4546 = vmatpush.bf16.msra.mxu1 %v4364_v46  ;;  %4547 = vmatpush.bf16.msra.mxu2 %v4364_v46  ;;  %v353_v62 = vld [vmem:[#allocation2 + $0x120] sm:$0xff] }
  0x57   : > { %304 = vst [vmem:[#allocation2 + $0x59] sm:$0x1] %v4702_v36  ;;  %4548 = vmatpush.bf16.msra.mxu3 %v4364_v46  ;;  %1174 = vmatpush.bf16.msra.mxu0 %v4364_v46  ;;  %v389_v1 = vpack.c.bf16 %v353_v62, %v353_v62  ;;  %v355_v17 = vld [vmem:[#allocation2 + $0x138] sm:$0xff]  ;;  %v370_v62 = vpack.c.bf16 %v334_v52, %v334_v52 }
  0x58   : > { %305 = vst [vmem:[#allocation2 + $0x71] sm:$0x1] %v4702_v36  ;;  %v391_v26 = vpack.c.bf16 %v355_v17, %v355_v17  ;;  %v357_v41 = vld [vmem:[#allocation2 + $0x150] sm:$0xff] }
  0x59   : > { %306 = vst [vmem:[#allocation2 + $0x89] sm:$0x1] %v4702_v36  ;;  %v393_v51 = vpack.c.bf16 %v357_v41, %v357_v41  ;;  %v336_v17 = vld [vmem:[#allocation2 + $0x50] sm:$0xff] }
  0x5a   : > { %307 = vst [vmem:[#allocation2 + $0xa1] sm:$0x1] %v4702_v36  ;;  %4549 = vmatpush.bf16.msra.mxu1 %v4363_v47  ;;  %4550 = vmatpush.bf16.msra.mxu2 %v4363_v47 }
  0x5b   : > { %308 = vst [vmem:[#allocation2 + $0xb9] sm:$0x1] %v4702_v36  ;;  %4551 = vmatpush.bf16.msra.mxu3 %v4363_v47  ;;  %1175 = vmatpush.bf16.msra.mxu0 %v4363_v47  ;;  %v386_v47 = vpack.c.bf16 %v350_v37, %v350_v37  ;;  %v4443_v37 = vld [vmem:[%s5460_s1 + $0x108] sm:$0xff] }
  0x5c   : > { %309 = vst [vmem:[#allocation2 + $0xd1] sm:$0x1] %v4702_v36 }
  0x5d   : > { %310 = vst [vmem:[#allocation2 + $0xe9] sm:$0x1] %v4702_v36 }
  0x5e   : > { %311 = vst [vmem:[#allocation2 + $0x101] sm:$0x1] %v4702_v36  ;;  %4552 = vmatpush.bf16.msra.mxu1 %v4362_v48  ;;  %4553 = vmatpush.bf16.msra.mxu2 %v4362_v48 }
  0x5f   : > { %312 = vst [vmem:[#allocation2 + $0x119] sm:$0x1] %v4702_v36  ;;  %4554 = vmatpush.bf16.msra.mxu3 %v4362_v48  ;;  %1176 = vmatpush.bf16.msra.mxu0 %v4362_v48  ;;  %v4373_v48 = vld [vmem:[%s5460_s1 + $0x58] sm:$0xff] }
  0x60   : > { %313 = vst [vmem:[#allocation2 + $0x131] sm:$0x1] %v4702_v36 }
  0x61   : > { %314 = vst [vmem:[#allocation2 + $0x149] sm:$0x1] %v4702_v36  ;;  %1197 = vmatmul.bf16.vlgmr.msra.gmra.mxu1 %v3397_v55  ;;  %v394_v55 = vpack.c.bf16 %v358_v44, %v358_v44 }
  0x62   : > { %315 = vst [vmem:[#allocation2 + $0x161] sm:$0x1] %v4702_v36  ;;  %1258 = vmatpush.bf16.msrb.mxu1 %v4377_v53  ;;  %1347 = vmatpush.bf16.msrb.mxu2 %v4385_v54 }
  0x63   : > { %316 = vst [vmem:[#allocation2 + $0x179] sm:$0x1] %v4702_v36  ;;  %1981 = vmatpush.bf16.msrb.mxu3 %v4441_v56  ;;  %2070 = vmatpush.bf16.msrb.mxu0 %v4449_v58  ;;  %v4381_v56 = vld [vmem:[%s5460_s1 + $0x98] sm:$0xff] }
  0x64   : > { %317 = vst [vmem:[#allocation2 + $0x191] sm:$0x1] %v4702_v36 }
  0x65   : > { %318 = vst [vmem:[#allocation2 + $0x1a9] sm:$0x1] %v4702_v36 }
  0x66   : > { %323 = vst [vmem:[#allocation2 + $0x8] sm:$0xff] %v4702_v36  ;;  %1259 = vmatpush.bf16.msrb.mxu1 %v4376_v60  ;;  %1348 = vmatpush.bf16.msrb.mxu2 %v4384_v61  ;;  %v4446_v60 = vld [vmem:[%s5460_s1 + $0x120] sm:$0xff]  ;;  %v4372_v61 = vld [vmem:[%s5460_s1 + $0x50] sm:$0xff] }
  0x67   : > { %327 = vst [vmem:[#allocation2 + $0x1a0] sm:$0xff] %v4702_v36  ;;  %1982 = vmatpush.bf16.msrb.mxu3 %v4440_v63  ;;  %2071 = vmatpush.bf16.msrb.mxu0 %v4448_v7  ;;  %v4380_v63 = vld [vmem:[%s5460_s1 + $0x90] sm:$0xff] }
  0x68   : > { %417 = vst [vmem:[#allocation3 + $0xc0] sm:$0xf] %v381_v57  ;;  %v4437_v57 = vld [vmem:[%s5460_s1 + $0xd8] sm:$0xff] }
  0x69   : > { %418 = vst [vmem:[#allocation3 + $0xcc] sm:$0xf] %v382_v59  ;;  %v369_v59 = vpack.c.bf16 %v333_v49, %v333_v49  ;;  %v440_v49 = vld [vmem:[#allocation2 + $0x21] sm:$0xff] }
  0x6a   : > { %322 = vst [vmem:[#allocation2] sm:$0xff] %v4702_v36  ;;  %1260 = vmatpush.bf16.msrb.mxu1 %v4375_v3  ;;  %1349 = vmatpush.bf16.msrb.mxu2 %v4383_v5  ;;  %v379_v5 = vpack.c.bf16 %v343_v2, %v343_v2  ;;  %v4529_v2 = vld [vmem:[%s5460_s1 + $0x238] sm:$0xff] }
  0x6b   : > { %324 = vst [vmem:[#allocation2 + $0x10] sm:$0x3] %v4702_v36  ;;  %1983 = vmatpush.bf16.msrb.mxu3 %v4439_v6  ;;  %2072 = vmatpush.bf16.msrb.mxu0 %v4447_v10  ;;  %v351_v6 = vld [vmem:[#allocation2 + $0x108] sm:$0xff] }
  0x6c   : > { %326 = vst [vmem:[#allocation2 + $0x198] sm:$0xff] %v4702_v36  ;;  %v387_v9 = vpack.c.bf16 %v351_v6, %v351_v6  ;;  %v359_v10 = vld [vmem:[#allocation2 + $0x168] sm:$0xff] }
  0x6d   : > { %328 = vst [vmem:[#allocation2 + $0x1a8] sm:$0x3] %v4702_v36  ;;  %v377_v36 = vpack.c.bf16 %v341_v29, %v341_v29 }
  0x6e   : > { %425 = vst [vmem:[#allocation3 + $0x120] sm:$0xf] %v389_v1  ;;  %1261 = vmatpush.bf16.msrb.mxu1 %v4374_v13  ;;  %1350 = vmatpush.bf16.msrb.mxu2 %v4382_v14  ;;  %v4445_v1 = vld [vmem:[%s5460_s1 + $0x118] sm:$0xff]  ;;  %v360_v13 = vld [vmem:[#allocation2 + $0x170] sm:$0xff]  ;;  %v335_v14 = vld [vmem:[#allocation2 + $0x48] sm:$0xff] }
  0x6f   : > { %v3444_v15 = vld [vmem:[#allocation3 + $0xc0] sm:$0xf]  ;;  %426 = vst [vmem:[#allocation3 + $0x12c] sm:$0xf] %v390_v4  ;;  %1984 = vmatpush.bf16.msrb.mxu3 %v4438_v18  ;;  %2073 = vmatpush.bf16.msrb.mxu0 %v4446_v60  ;;  %v396_v18 = vpack.c.bf16 %v360_v13, %v360_v13 }
  0x70   : > { %v4339_v19 = vld [vmem:[#allocation3 + $0xc8] sm:$0xf0]  ;;  %401 = vst [vmem:[#allocation3] sm:$0xf] %v4703_v20  ;;  %v344_v4 = vld [vmem:[#allocation2 + $0xb0] sm:$0xff] }
  0x71   : > { %v3445_v23 = vor.u32 %v4339_v19, %v3444_v15  ;;  %402 = vst [vmem:[#allocation3 + $0xc] sm:$0xf] %v4703_v20  ;;  %v380_v7 = vpack.c.bf16 %v344_v4, %v344_v4  ;;  %v548_v4 = vld [vmem:[#allocation2 + $0x22] sm:$0xff] }
  0x72   : > { %411 = vst [vmem:[#allocation3 + $0x78] sm:$0xf] %v375_v11  ;;  %1262 = vmatpush.bf16.msrb.mxu1 %v4373_v48  ;;  %1351 = vmatpush.bf16.msrb.mxu2 %v4381_v56  ;;  %v546_v44 = vld [vmem:[#allocation2 + $0xa] sm:$0xff]  ;;  %v439_v48 = vld [vmem:[#allocation2 + $0x19] sm:$0xff] }
  0x73   : > { %1217 = vmatmul.bf16.vlgmr.msra.gmra.mxu2 %v3445_v23  ;;  %412 = vst [vmem:[#allocation3 + $0x84] sm:$0xf] %v376_v16  ;;  %1985 = vmatpush.bf16.msrb.mxu3 %v4437_v57  ;;  %v395_v16 = vpack.c.bf16 %v359_v10, %v359_v10  ;;  %v372_v23 = vpack.c.bf16 %v336_v17, %v336_v17 }
  0x74   : > { %419 = vst [vmem:[#allocation3 + $0xd8] sm:$0xf] %v383_v21  ;;  %2074 = vmatpush.bf16.msrb.mxu0 %v4445_v1  ;;  %v371_v21 = vpack.c.bf16 %v335_v14, %v335_v14  ;;  %v475_v52 = vpack.c.bf16 %v439_v48, %v439_v48  ;;  %v477_v10 = vpack.c.bf16 %v441_v8, %v441_v8  ;;  %v552_v48 = vld [vmem:[#allocation2 + $0x52] sm:$0xff] }
  0x75   : > { %v3492_v32 = vld [vmem:[#allocation3 + $0x120] sm:$0xf]  ;;  %420 = vst [vmem:[#allocation3 + $0xe4] sm:$0xf] %v384_v24 }
  0x76   : > { %v4351_v35 = vld [vmem:[#allocation3 + $0x128] sm:$0xf0]  ;;  %427 = vst [vmem:[#allocation3 + $0x138] sm:$0xf] %v391_v26  ;;  %1263 = vmatpush.bf16.msrb.mxu1 %v4372_v61  ;;  %1352 = vmatpush.bf16.msrb.mxu2 %v4380_v63 }
  0x77   : > { %v3493_v38 = vor.u32 %v4351_v35, %v3492_v32  ;;  %v3348_v39 = vld [vmem:[#allocation3] sm:$0xf]  ;;  %428 = vst [vmem:[#allocation3 + $0x144] sm:$0xf] %v392_v28  ;;  %1986 = vmatpush.bf16.msrb.mxu3 %v4436_v0  ;;  %v4371_v28 = vld [vmem:[%s5460_s1 + $0x48] sm:$0xff]  ;;  %v4378_v35 = vld [vmem:[%s5460_s1 + $0x80] sm:$0xff] }
  0x78   : > { %v4315_v42 = vld [vmem:[#allocation3 + $0x8] sm:$0xf0]  ;;  %403 = vst [vmem:[#allocation3 + $0x18] sm:$0xf] %v367_v30  ;;  %v4379_v30 = vld [vmem:[%s5460_s1 + $0x88] sm:$0xff] }
  0x79   : > { %1237 = vmatmul.bf16.vlgmr.msra.gmra.mxu3 %v3493_v38  ;;  %v3349_v45 = vor.u32 %v4315_v42, %v3348_v39  ;;  %v3408_v46 = vld [vmem:[#allocation3 + $0x78] sm:$0xf]  ;;  %404 = vst [vmem:[#allocation3 + $0x24] sm:$0xf] %v368_v33  ;;  %v4444_v33 = vld [vmem:[%s5460_s1 + $0x110] sm:$0xff]  ;;  %v4457_v61 = vld [vmem:[%s5460_s1 + $0x178] sm:$0xff] }
  0x7a   : > { %v4330_v50 = vld [vmem:[#allocation3 + $0x80] sm:$0xf0]  ;;  %413 = vst [vmem:[#allocation3 + $0x90] sm:$0xf] %v377_v36  ;;  %1264 = vmatpush.bf16.msrb.mxu1 %v4371_v28  ;;  %1353 = vmatpush.bf16.msrb.mxu2 %v4379_v30  ;;  %v4434_v36 = vld [vmem:[%s5460_s1 + $0xc0] sm:$0xff]  ;;  %v4521_v63 = vld [vmem:[%s5460_s1 + $0x1f8] sm:$0xff] }
  0x7b   : > { %1177 = vmatmul.bf16.vlgmr.msra.gmra.mxu0 %v3349_v45  ;;  %v3409_v53 = vor.u32 %v4330_v50, %v3408_v46  ;;  %v3456_v54 = vld [vmem:[#allocation3 + $0xd8] sm:$0xf]  ;;  %414 = vst [vmem:[#allocation3 + $0x9c] sm:$0xf] %v378_v40  ;;  %1987 = vmatpush.bf16.msrb.mxu3 %v4435_v31  ;;  %v444_v28 = vld [vmem:[#allocation2 + $0x51] sm:$0xff] }
  0x7c   : > { %v4342_v58 = vld [vmem:[#allocation3 + $0xe0] sm:$0xf0]  ;;  %421 = vst [vmem:[#allocation3 + $0xf0] sm:$0xf] %v385_v43  ;;  %2075 = vmatpush.bf16.msrb.mxu0 %v4444_v33  ;;  %v437_v39 = vld [vmem:[#allocation2 + $0x1] sm:$0xff]  ;;  %v438_v40 = vld [vmem:[#allocation2 + $0x9] sm:$0xff]  ;;  %v480_v31 = vpack.c.bf16 %v444_v28, %v444_v28 }
  0x7d   : > { %1202 = vmatmul.bf16.gmra.mxu1 %v3409_v53  ;;  %422 = vst [vmem:[#allocation3 + $0xfc] sm:$0xf] %v386_v47  ;;  %v3457_v3 = vor.u32 %v4342_v58, %v3456_v54  ;;  %v3504_v11 = vld [vmem:[#allocation3 + $0x138] sm:$0xf]  ;;  %v473_v41 = vpack.c.bf16 %v437_v39, %v437_v39  ;;  %v474_v42 = vpack.c.bf16 %v438_v40, %v438_v40  ;;  %v449_v28 = vld [vmem:[#allocation2 + $0x91] sm:$0xff] }
  0x7e   : > { %429 = vst [vmem:[#allocation3 + $0x150] sm:$0xf] %v393_v51  ;;  %v4354_v15 = vld [vmem:[#allocation3 + $0x140] sm:$0xf0]  ;;  %1265 = vmatpush.bf16.msrb.mxu1 %v4370_v34  ;;  %v545_v43 = vld [vmem:[#allocation2 + $0x2] sm:$0xff]  ;;  %1354 = vmatpush.bf16.msrb.mxu2 %v4378_v35  ;;  %v582_v47 = vpack.c.bf16 %v546_v44, %v546_v44  ;;  %v476_v53 = vpack.c.bf16 %v440_v49, %v440_v49 }
  0x7f   : > { %430 = vst [vmem:[#allocation3 + $0x15c] sm:$0xf] %v394_v55  ;;  %v3360_v19 = vld [vmem:[#allocation3 + $0x18] sm:$0xf]  ;;  %v3505_v22 = vor.u32 %v4354_v15, %v3504_v11  ;;  %v581_v46 = vpack.c.bf16 %v545_v43, %v545_v43  ;;  %1988 = vmatpush.bf16.msrb.mxu3 %v4434_v36  ;;  %v4442_v51 = vld [vmem:[%s5460_s1 + $0x100] sm:$0xff]  ;;  %v4520_v43 = vld [vmem:[%s5460_s1 + $0x1f0] sm:$0xff] }
  0x80   : > { %405 = vst [vmem:[#allocation3 + $0x30] sm:$0xf] %v369_v59  ;;  %v4318_v20 = vld [vmem:[#allocation3 + $0x20] sm:$0xf0]  ;;  %2076 = vmatpush.bf16.msrb.mxu0 %v4443_v37 }
  0x81   : > { %406 = vst [vmem:[#allocation3 + $0x3c] sm:$0xf] %v370_v62  ;;  %v3420_v24 = vld [vmem:[#allocation3 + $0x90] sm:$0xf]  ;;  %v3361_v26 = vor.u32 %v4318_v20, %v3360_v19  ;;  %v4513_v62 = vld [vmem:[%s5460_s1 + $0x1b8] sm:$0xff]  ;;  %v4528_v44 = vld [vmem:[%s5460_s1 + $0x230] sm:$0xff] }
  0x82   : > { %415 = vst [vmem:[#allocation3 + $0xa8] sm:$0xf] %v379_v5  ;;  %v4333_v25 = vld [vmem:[#allocation3 + $0x98] sm:$0xf0]  ;;  %2159 = vmatpush.bf16.msra.mxu1 %v4457_v61  ;;  %2857 = vmatpush.bf16.msra.mxu2 %v4513_v62  ;;  %v4387_v33 = vld [vmem:[#allocation3 + $0x20] sm:$0xf0] }
  0x83   : > { %1222 = vmatmul.bf16.gmra.mxu2 %v3457_v3  ;;  %416 = vst [vmem:[#allocation3 + $0xb4] sm:$0xf] %v380_v7  ;;  %v3421_v27 = vor.u32 %v4333_v25, %v3420_v24  ;;  %v3468_v29 = vld [vmem:[#allocation3 + $0xf0] sm:$0xf]  ;;  %2946 = vmatpush.bf16.msra.mxu3 %v4521_v63  ;;  %v584_v7 = vpack.c.bf16 %v548_v4, %v548_v4  ;;  %v554_v4 = vld [vmem:[#allocation2 + $0x6a] sm:$0xff] }
  0x84   : > { %423 = vst [vmem:[#allocation3 + $0x108] sm:$0xf] %v387_v9  ;;  %v4345_v32 = vld [vmem:[#allocation3 + $0xf8] sm:$0xf0]  ;;  %2077 = vmatpush.bf16.msrb.mxu0 %v4442_v51  ;;  %v547_v3 = vld [vmem:[#allocation2 + $0x1a] sm:$0xff]  ;;  %v590_v8 = vpack.c.bf16 %v554_v4, %v554_v4 }
  0x85   : > { %424 = vst [vmem:[#allocation3 + $0x114] sm:$0xf] %v388_v12  ;;  %v3469_v38 = vor.u32 %v4345_v32, %v3468_v29  ;;  %v3516_v45 = vld [vmem:[#allocation3 + $0x150] sm:$0xf]  ;;  %v583_v5 = vpack.c.bf16 %v547_v3, %v547_v3  ;;  %v3684_v32 = vld [vmem:[#allocation3 + $0x18] sm:$0xf] }
  0x86   : > { %431 = vst [vmem:[#allocation3 + $0x168] sm:$0xf] %v395_v16  ;;  %v4357_v50 = vld [vmem:[#allocation3 + $0x158] sm:$0xf0]  ;;  %v442_v9 = vld [vmem:[#allocation2 + $0x39] sm:$0xff]  ;;  %v3685_v36 = vor.u32 %v4387_v33, %v3684_v32  ;;  %v445_v51 = vld [vmem:[#allocation2 + $0x61] sm:$0xff]  ;;  %v485_v33 = vpack.c.bf16 %v449_v28, %v449_v28 }
  0x87   : > { %432 = vst [vmem:[#allocation3 + $0x174] sm:$0xf] %v396_v18  ;;  %v3372_v54 = vld [vmem:[#allocation3 + $0x30] sm:$0xf]  ;;  %v3517_v56 = vor.u32 %v4357_v50, %v3516_v45  ;;  %v478_v11 = vpack.c.bf16 %v442_v9, %v442_v9  ;;  %2947 = vmatpush.bf16.msra.mxu3 %v4520_v43  ;;  %v588_v50 = vpack.c.bf16 %v552_v48, %v552_v48  ;;  %v557_v48 = vld [vmem:[#allocation2 + $0x92] sm:$0xff] }
  0x88   : > { %407 = vst [vmem:[#allocation3 + $0x48] sm:$0xf] %v371_v21  ;;  %v4321_v55 = vld [vmem:[#allocation3 + $0x38] sm:$0xf0]  ;;  %3035 = vmatpush.bf16.msra.mxu0 %v4529_v2  ;;  %v550_v24 = vld [vmem:[#allocation2 + $0x3a] sm:$0xff]  ;;  %v553_v3 = vld [vmem:[#allocation2 + $0x62] sm:$0xff] }
  0x89   : > { %1242 = vmatmul.bf16.gmra.mxu3 %v3505_v22  ;;  %408 = vst [vmem:[#allocation3 + $0x54] sm:$0xf] %v372_v23  ;;  %v3432_v57 = vld [vmem:[#allocation3 + $0xa8] sm:$0xf]  ;;  %v3373_v59 = vor.u32 %v4321_v55, %v3372_v54  ;;  %v481_v54 = vpack.c.bf16 %v445_v51, %v445_v51  ;;  %v448_v9 = vld [vmem:[#allocation2 + $0x81] sm:$0xff] }
  0x8a   : > { %509 = vst [vmem:[#allocation3 + $0x4] sm:$0xf] %v473_v41  ;;  %v4336_v58 = vld [vmem:[#allocation3 + $0xb0] sm:$0xf0]  ;;  %v549_v23 = vld [vmem:[#allocation2 + $0x32] sm:$0xff] }
  0x8b   : > { %1182 = vmatmul.bf16.gmra.mxu0 %v3361_v26  ;;  %510 = vst [vmem:[#allocation3 + $0x10] sm:$0xf] %v474_v42  ;;  %v3433_v60 = vor.u32 %v4336_v58, %v3432_v57  ;;  %v3480_v0 = vld [vmem:[#allocation3 + $0x108] sm:$0xf]  ;;  %v585_v25 = vpack.c.bf16 %v549_v23, %v549_v23  ;;  %v586_v26 = vpack.c.bf16 %v550_v24, %v550_v24  ;;  %v4456_v41 = vld [vmem:[%s5460_s1 + $0x170] sm:$0xff]  ;;  %v4519_v23 = vld [vmem:[%s5460_s1 + $0x1e8] sm:$0xff] }
  0x8c   : > { %617 = vst [vmem:[#allocation3 + $0x8] sm:$0xf] %v581_v46  ;;  %v4348_v1 = vld [vmem:[#allocation3 + $0x110] sm:$0xf0]  ;;  %2160 = vmatpush.bf16.msra.mxu1 %v4456_v41  ;;  %v4512_v42 = vld [vmem:[%s5460_s1 + $0x1b0] sm:$0xff]  ;;  %3036 = vmatpush.bf16.msra.mxu0 %v4528_v44  ;;  %v450_v32 = vld [vmem:[#allocation2 + $0x99] sm:$0xff] }
  0x8d   : > { %1207 = vmatmul.bf16.gmra.mxu1 %v3421_v27  ;;  %618 = vst [vmem:[#allocation3 + $0x14] sm:$0xf] %v582_v47  ;;  %v3481_v6 = vor.u32 %v4348_v1, %v3480_v0  ;;  %v3528_v12 = vld [vmem:[#allocation3 + $0x168] sm:$0xf]  ;;  %v443_v27 = vld [vmem:[#allocation2 + $0x49] sm:$0xff]  ;;  %2858 = vmatpush.bf16.msra.mxu2 %v4512_v42 }
  0x8e   : > { %511 = vst [vmem:[#allocation3 + $0x1c] sm:$0xf] %v475_v52  ;;  %v4360_v13 = vld [vmem:[#allocation3 + $0x170] sm:$0xf0]  ;;  %v479_v30 = vpack.c.bf16 %v443_v27, %v443_v27  ;;  %v551_v47 = vld [vmem:[#allocation2 + $0x4a] sm:$0xff]  ;;  %2948 = vmatpush.bf16.msra.mxu3 %v4519_v23 }
  0x8f   : > { %512 = vst [vmem:[#allocation3 + $0x28] sm:$0xf] %v476_v53  ;;  %v3384_v14 = vld [vmem:[#allocation3 + $0x48] sm:$0xf]  ;;  %v3529_v16 = vor.u32 %v4360_v13, %v3528_v12  ;;  %v587_v49 = vpack.c.bf16 %v551_v47, %v551_v47  ;;  %v446_v52 = vld [vmem:[#allocation2 + $0x69] sm:$0xff]  ;;  %v4526_v23 = vld [vmem:[%s5460_s1 + $0x220] sm:$0xff] }
  0x90   : > { %619 = vst [vmem:[#allocation3 + $0x20] sm:$0xf] %v583_v5  ;;  %v4324_v15 = vld [vmem:[#allocation3 + $0x50] sm:$0xf0]  ;;  %v482_v55 = vpack.c.bf16 %v446_v52, %v446_v52  ;;  %v4390_v57 = vld [vmem:[#allocation3 + $0x38] sm:$0xf0]  ;;  %v593_v52 = vpack.c.bf16 %v557_v48, %v557_v48 }
  0x91   : > { %620 = vst [vmem:[#allocation3 + $0x2c] sm:$0xf] %v584_v7  ;;  %v4314_v17 = vld [vmem:[#allocation3 + $0x4] sm:$0xf]  ;;  %v3385_v19 = vor.u32 %v4324_v15, %v3384_v14  ;;  %v447_v5 = vld [vmem:[#allocation2 + $0x79] sm:$0xff]  ;;  %v589_v7 = vpack.c.bf16 %v553_v3, %v553_v3  ;;  %v556_v27 = vld [vmem:[#allocation2 + $0x82] sm:$0xff] }
  0x92   : > { %513 = vst [vmem:[#allocation3 + $0x34] sm:$0xf] %v477_v10  ;;  %v3350_v18 = vld [vmem:[#allocation3 + $0xc] sm:$0xf0]  ;;  %v483_v10 = vpack.c.bf16 %v447_v5, %v447_v5  ;;  %v3708_v12 = vld [vmem:[#allocation3 + $0x48] sm:$0xf] }
  0x93   : > { %1227 = vmatmul.bf16.gmra.mxu2 %v3469_v38  ;;  %514 = vst [vmem:[#allocation3 + $0x40] sm:$0xf] %v478_v11  ;;  %v3353_v20 = vor.u32 %v4314_v17, %v3350_v18  ;;  %v3356_v21 = vld [vmem:[#allocation3 + $0x8] sm:$0xf]  ;;  %v484_v11 = vpack.c.bf16 %v448_v9, %v448_v9  ;;  %v4393_v13 = vld [vmem:[#allocation3 + $0x50] sm:$0xf0] }
  0x94   : > { %v4316_v22 = vld [vmem:[#allocation3 + $0x10] sm:$0xf0]  ;;  %621 = vst [vmem:[#allocation3 + $0x38] sm:$0xf] %v585_v25 }
  0x95   : > { %v3357_v29 = vor.u32 %v4316_v22, %v3356_v21  ;;  %622 = vst [vmem:[#allocation3 + $0x44] sm:$0xf] %v586_v26  ;;  %v4386_v34 = vld [vmem:[#allocation3 + $0x1c] sm:$0xf]  ;;  %v555_v26 = vld [vmem:[#allocation2 + $0x7a] sm:$0xff] }
  0x96   : > { %515 = vst [vmem:[#allocation3 + $0x4c] sm:$0xf] %v479_v30  ;;  %v3686_v35 = vld [vmem:[#allocation3 + $0x24] sm:$0xf0]  ;;  %v4317_v37 = vld [vmem:[#allocation3 + $0x1c] sm:$0xf]  ;;  %v591_v30 = vpack.c.bf16 %v555_v26, %v555_v26 }
  0x97   : > { %516 = vst [vmem:[#allocation3 + $0x58] sm:$0xf] %v480_v31  ;;  %v3362_v38 = vld [vmem:[#allocation3 + $0x24] sm:$0xf0]  ;;  %v3689_v39 = vor.u32 %v4386_v34, %v3686_v35  ;;  %v3368_v45 = vld [vmem:[#allocation3 + $0x20] sm:$0xf]  ;;  %v592_v31 = vpack.c.bf16 %v556_v27, %v556_v27  ;;  %v486_v34 = vpack.c.bf16 %v450_v32, %v450_v32 }
  0x98   : > { %v3365_v40 = vor.u32 %v4317_v37, %v3362_v38  ;;  %v4319_v46 = vld [vmem:[#allocation3 + $0x28] sm:$0xf0]  ;;  %623 = vst [vmem:[#allocation3 + $0x50] sm:$0xf] %v587_v49  ;;  %v4455_v21 = vld [vmem:[%s5460_s1 + $0x168] sm:$0xff] }
  0x99   : > { %1247 = vmatmul.bf16.gmra.mxu3 %v3517_v56  ;;  %v3369_v53 = vor.u32 %v4319_v46, %v3368_v45  ;;  %624 = vst [vmem:[#allocation3 + $0x5c] sm:$0xf] %v588_v50  ;;  %v3696_v56 = vld [vmem:[#allocation3 + $0x30] sm:$0xf]  ;;  %v4389_v58 = vld [vmem:[#allocation3 + $0x34] sm:$0xf]  ;;  %2161 = vmatpush.bf16.msra.mxu1 %v4455_v21 }
  0x9a   : > { %517 = vst [vmem:[#allocation3 + $0x64] sm:$0xf] %v481_v54  ;;  %v4320_v61 = vld [vmem:[#allocation3 + $0x34] sm:$0xf]  ;;  %v3374_v62 = vld [vmem:[#allocation3 + $0x3c] sm:$0xf0] }
  0x9b   : > { %1187 = vmatmul.bf16.gmra.mxu0 %v3373_v59  ;;  %518 = vst [vmem:[#allocation3 + $0x70] sm:$0xf] %v482_v55  ;;  %v3698_v59 = vld [vmem:[#allocation3 + $0x3c] sm:$0xf0]  ;;  %v3377_v0 = vor.u32 %v4320_v61, %v3374_v62  ;;  %v3380_v1 = vld [vmem:[#allocation3 + $0x38] sm:$0xf] }
  0x9c   : > { %v3701_v63 = vor.u32 %v4389_v58, %v3698_v59  ;;  %v4322_v2 = vld [vmem:[#allocation3 + $0x40] sm:$0xf0]  ;;  %625 = vst [vmem:[#allocation3 + $0x68] sm:$0xf] %v589_v7  ;;  %v4511_v22 = vld [vmem:[%s5460_s1 + $0x1a8] sm:$0xff]  ;;  %v558_v49 = vld [vmem:[#allocation2 + $0x9a] sm:$0xff] }
  0x9d   : > { %1212 = vmatmul.bf16.gmra.mxu1 %v3433_v60  ;;  %v3697_v60 = vor.u32 %v4390_v57, %v3696_v56  ;;  %626 = vst [vmem:[#allocation3 + $0x74] sm:$0xf] %v590_v8  ;;  %v4392_v14 = vld [vmem:[#allocation3 + $0x4c] sm:$0xf]  ;;  %2859 = vmatpush.bf16.msra.mxu2 %v4511_v22  ;;  %v4527_v35 = vld [vmem:[%s5460_s1 + $0x228] sm:$0xff]  ;;  %v452_v54 = vld [vmem:[#allocation2 + $0xb1] sm:$0xff] }
  0x9e   : > { %519 = vst [vmem:[#allocation3 + $0x7c] sm:$0xf] %v483_v10  ;;  %v3710_v15 = vld [vmem:[#allocation3 + $0x54] sm:$0xf0]  ;;  %v4323_v17 = vld [vmem:[#allocation3 + $0x4c] sm:$0xf]  ;;  %3037 = vmatpush.bf16.msra.mxu0 %v4527_v35  ;;  %v488_v57 = vpack.c.bf16 %v452_v54, %v452_v54 }
  0x9f   : > { %520 = vst [vmem:[#allocation3 + $0x88] sm:$0xf] %v484_v11  ;;  %v3386_v18 = vld [vmem:[#allocation3 + $0x54] sm:$0xf0]  ;;  %v3392_v24 = vld [vmem:[#allocation3 + $0x50] sm:$0xf] }
  0xa0   : > { %v4325_v25 = vld [vmem:[#allocation3 + $0x58] sm:$0xf0]  ;;  %627 = vst [vmem:[#allocation3 + $0x80] sm:$0xf] %v591_v30  ;;  %v4396_v37 = vld [vmem:[#allocation3 + $0x68] sm:$0xf0] }
  0xa1   : > { %628 = vst [vmem:[#allocation3 + $0x8c] sm:$0xf] %v592_v31  ;;  %v4395_v38 = vld [vmem:[#allocation3 + $0x64] sm:$0xf]  ;;  %v451_v50 = vld [vmem:[#allocation2 + $0xa9] sm:$0xff]  ;;  %v4510_v7 = vld [vmem:[%s5460_s1 + $0x1a0] sm:$0xff] }
  0xa2   : > { %521 = vst [vmem:[#allocation3 + $0x94] sm:$0xf] %v485_v33  ;;  %v4326_v42 = vld [vmem:[#allocation3 + $0x64] sm:$0xf]  ;;  %v3398_v43 = vld [vmem:[#allocation3 + $0x6c] sm:$0xf0]  ;;  %v487_v55 = vpack.c.bf16 %v451_v50, %v451_v50  ;;  %2860 = vmatpush.bf16.msra.mxu2 %v4510_v7  ;;  %3038 = vmatpush.bf16.msra.mxu0 %v4526_v23 }
  0xa3   : > { %1232 = vmatmul.bf16.gmra.mxu2 %v3481_v6  ;;  %v3381_v6 = vor.u32 %v4322_v2, %v3380_v1  ;;  %522 = vst [vmem:[#allocation3 + $0xa0] sm:$0xf] %v486_v34  ;;  %v3401_v45 = vor.u32 %v4326_v42, %v3398_v43  ;;  %v3404_v46 = vld [vmem:[#allocation3 + $0x68] sm:$0xf]  ;;  %v3732_v58 = vld [vmem:[#allocation3 + $0x78] sm:$0xf] }
  0xa4   : > { %v4328_v47 = vld [vmem:[#allocation3 + $0x70] sm:$0xf0]  ;;  %629 = vst [vmem:[#allocation3 + $0x98] sm:$0xf] %v593_v52  ;;  %v4399_v59 = vld [vmem:[#allocation3 + $0x80] sm:$0xf0] }
  0xa5   : > { %v3405_v51 = vor.u32 %v4328_v47, %v3404_v46  ;;  %523 = vst [vmem:[#allocation3 + $0xac] sm:$0xf] %v487_v55  ;;  %v3733_v62 = vor.u32 %v4399_v59, %v3732_v58  ;;  %v4518_v8 = vld [vmem:[%s5460_s1 + $0x1e0] sm:$0xff]  ;;  %v4453_v7 = vld [vmem:[%s5460_s1 + $0x158] sm:$0xff] }
  0xa6   : > { %v3734_v61 = vld [vmem:[#allocation3 + $0x84] sm:$0xf0]  ;;  %524 = vst [vmem:[#allocation3 + $0xb8] sm:$0xf] %v488_v57  ;;  %2949 = vmatpush.bf16.msra.mxu3 %v4518_v8  ;;  %v561_v43 = vld [vmem:[#allocation2 + $0xc2] sm:$0xff] }
  0xa7   : > { %v3410_v1 = vld [vmem:[#allocation3 + $0x84] sm:$0xf0]  ;;  %v3416_v10 = vld [vmem:[#allocation3 + $0x80] sm:$0xf]  ;;  %v597_v47 = vpack.c.bf16 %v561_v43, %v561_v43  ;;  %v4405_v54 = vld [vmem:[#allocation3 + $0xb0] sm:$0xf0] }
  0xa8   : > { %v4331_v11 = vld [vmem:[#allocation3 + $0x88] sm:$0xf0] }
  0xa9   : > { %1252 = vmatmul.bf16.gmra.mxu3 %v3529_v16  ;;  %v3709_v16 = vor.u32 %v4393_v13, %v3708_v12  ;;  %v559_v13 = vld [vmem:[#allocation2 + $0xaa] sm:$0xff]  ;;  %v4401_v28 = vld [vmem:[#allocation3 + $0x94] sm:$0xf]  ;;  %633 = vst [vmem:[#allocation3 + $0xc8] sm:$0xf] %v597_v47  ;;  %v4509_v8 = vld [vmem:[%s5460_s1 + $0x198] sm:$0xff] }
  0xaa   : > { %v4332_v32 = vld [vmem:[#allocation3 + $0x94] sm:$0xf]  ;;  %v3422_v33 = vld [vmem:[#allocation3 + $0x9c] sm:$0xf0]  ;;  %2861 = vmatpush.bf16.msra.mxu2 %v4509_v8  ;;  %v458_v23 = vld [vmem:[#allocation2 + $0xf9] sm:$0xff] }
  0xab   : > { %1192 = vmatmul.bf16.gmra.mxu0 %v3385_v19  ;;  %v3713_v19 = vor.u32 %v4392_v14, %v3710_v15  ;;  %v560_v14 = vld [vmem:[#allocation2 + $0xb2] sm:$0xff]  ;;  %v453_v15 = vld [vmem:[#allocation2 + $0xc1] sm:$0xff] }
  0xac   : > { %v4404_v58 = vld [vmem:[#allocation3 + $0xac] sm:$0xf] }
  0xad   : > { %1266 = vmatmul.bf16.vlgmr.msrb.gmra.mxu1 %v3353_v20  ;;  %v3389_v20 = vor.u32 %v4323_v17, %v3386_v18  ;;  %v595_v17 = vpack.c.bf16 %v559_v13, %v559_v13  ;;  %v596_v18 = vpack.c.bf16 %v560_v14, %v560_v14  ;;  %v3758_v59 = vld [vmem:[#allocation3 + $0xb4] sm:$0xf0] }
  0xaf   : > { %631 = vst [vmem:[#allocation3 + $0xb0] sm:$0xf] %v595_v17  ;;  %v564_v17 = vld [vmem:[#allocation2 + $0xe2] sm:$0xff] }
  0xb0   : > { %632 = vst [vmem:[#allocation3 + $0xbc] sm:$0xf] %v596_v18  ;;  %v457_v18 = vld [vmem:[#allocation2 + $0xf1] sm:$0xff] }
  0xb3   : > { %1355 = vmatmul.bf16.vlgmr.msrb.gmra.mxu2 %v3357_v29  ;;  %v3393_v29 = vor.u32 %v4325_v25, %v3392_v24  ;;  %v3744_v24 = vld [vmem:[#allocation3 + $0x90] sm:$0xf]  ;;  %v4402_v25 = vld [vmem:[#allocation3 + $0x98] sm:$0xf0] }
  0xb4   : > { %v3745_v30 = vor.u32 %v4402_v25, %v3744_v24  ;;  %v493_v24 = vpack.c.bf16 %v457_v18, %v457_v18 }
  0xb6   : > { %v3440_v13 = vld [vmem:[#allocation3 + $0xb0] sm:$0xf]  ;;  %529 = vst [vmem:[#allocation3 + $0xf4] sm:$0xf] %v493_v24 }
  0xb7   : > { %v4337_v14 = vld [vmem:[#allocation3 + $0xb8] sm:$0xf0] }
  0xb9   : > { %1989 = vmatmul.bf16.vlgmr.msrb.gmra.mxu3 %v3685_v36  ;;  %v3720_v36 = vld [vmem:[#allocation3 + $0x60] sm:$0xf] }
  0xbb   : > { %2078 = vmatmul.bf16.vlgmr.msrb.gmra.mxu0 %v3689_v39  ;;  %v3722_v39 = vld [vmem:[#allocation3 + $0x6c] sm:$0xf0] }
  0xbc   : > { %v3725_v44 = vor.u32 %v4395_v38, %v3722_v39  ;;  %v3428_v39 = vld [vmem:[#allocation3 + $0x98] sm:$0xf] }
  0xbd   : > { %1271 = vmatmul.bf16.gmra.mxu1 %v3365_v40  ;;  %v3721_v40 = vor.u32 %v4396_v37, %v3720_v36  ;;  %v3425_v36 = vor.u32 %v4332_v32, %v3422_v33  ;;  %v4408_v32 = vld [vmem:[#allocation3 + $0xc8] sm:$0xf0] }
  0xc3   : > { %1360 = vmatmul.bf16.gmra.mxu2 %v3369_v53  ;;  %v594_v53 = vpack.c.bf16 %v558_v49, %v558_v49  ;;  %v456_v49 = vld [vmem:[#allocation2 + $0xe1] sm:$0xff] }
  0xc4   : > { %v492_v52 = vpack.c.bf16 %v456_v49, %v456_v49 }
  0xc5   : > { %630 = vst [vmem:[#allocation3 + $0xa4] sm:$0xf] %v594_v53  ;;  %v3756_v53 = vld [vmem:[#allocation3 + $0xa8] sm:$0xf] }
  0xc6   : > { %528 = vst [vmem:[#allocation3 + $0xe8] sm:$0xf] %v492_v52  ;;  %v3452_v52 = vld [vmem:[#allocation3 + $0xc8] sm:$0xf] }
  0xc9   : > { %1994 = vmatmul.bf16.gmra.mxu3 %v3697_v60  ;;  %v4398_v60 = vld [vmem:[#allocation3 + $0x7c] sm:$0xf] }
  0xca   : > { %v3737_v2 = vor.u32 %v4398_v60, %v3734_v61  ;;  %v3757_v60 = vor.u32 %v4405_v54, %v3756_v53 }
  0xcb   : > { %2083 = vmatmul.bf16.gmra.mxu0 %v3701_v63 }
  0xcd   : > { %1276 = vmatmul.bf16.gmra.mxu1 %v3377_v0  ;;  %v4329_v0 = vld [vmem:[#allocation3 + $0x7c] sm:$0xf] }
  0xce   : > { %v3413_v4 = vor.u32 %v4329_v0, %v3410_v1  ;;  %v3434_v0 = vld [vmem:[#allocation3 + $0xb4] sm:$0xf0]  ;;  %v3761_v1 = vor.u32 %v4404_v58, %v3758_v59  ;;  %v565_v58 = vld [vmem:[#allocation2 + $0xf2] sm:$0xff]  ;;  %v566_v59 = vld [vmem:[#allocation2 + $0xfa] sm:$0xff] }
  0xd3   : > { %1365 = vmatmul.bf16.gmra.mxu2 %v3381_v6  ;;  %v4454_v6 = vld [vmem:[%s5460_s1 + $0x160] sm:$0xff] }
  0xd4   : > { %2162 = vmatpush.bf16.msra.mxu1 %v4454_v6 }
  0xd8   : > { %2163 = vmatpush.bf16.msra.mxu1 %v4453_v7 }
  0xd9   : > { %1999 = vmatmul.bf16.gmra.mxu3 %v3709_v16  ;;  %v3417_v16 = vor.u32 %v4331_v11, %v3416_v10  ;;  %v4517_v10 = vld [vmem:[%s5460_s1 + $0x1d8] sm:$0xff] }
  0xda   : > { %2950 = vmatpush.bf16.msra.mxu3 %v4517_v10 }
  0xdb   : > { %2088 = vmatmul.bf16.gmra.mxu0 %v3713_v19  ;;  %v454_v19 = vld [vmem:[#allocation2 + $0xc9] sm:$0xff] }
  0xdc   : > { %v490_v22 = vpack.c.bf16 %v454_v19, %v454_v19  ;;  %v3441_v19 = vor.u32 %v4337_v14, %v3440_v13  ;;  %v5118_v13 = vld [vmem:[%s5461_s2] ss:$0 sm:$0xff]  ;;  %v3780_v14 = vld [vmem:[#allocation3 + $0xd8] sm:$0xf] }
  0xdd   : > { %1281 = vmatmul.bf16.gmra.mxu1 %v3389_v20  ;;  %v489_v20 = vpack.c.bf16 %v453_v15, %v453_v15 }
  0xde   : > { %v5029_v41 = vpop.f32.mrf.mxu1  ;;  %526 = vst [vmem:[#allocation3 + $0xd0] sm:$0xf] %v490_v22  ;;  %v600_v22 = vpack.c.bf16 %v564_v17, %v564_v17 }
  0xdf   : > { %525 = vst [vmem:[#allocation3 + $0xc4] sm:$0xf] %v489_v20 }
  0xe0   : > { %636 = vst [vmem:[#allocation3 + $0xec] sm:$0xf] %v600_v22  ;;  %v3782_v22 = vld [vmem:[#allocation3 + $0xe4] sm:$0xf0] }
  0xe3   : > { %1370 = vmatmul.bf16.gmra.mxu2 %v3393_v29  ;;  %v3746_v29 = vld [vmem:[#allocation3 + $0x9c] sm:$0xf0] }
  0xe4   : > { %v3749_v34 = vor.u32 %v4401_v28, %v3746_v29  ;;  %v4525_v28 = vld [vmem:[%s5460_s1 + $0x218] sm:$0xff]  ;;  %v494_v29 = vpack.c.bf16 %v458_v23, %v458_v23 }
  0xe5   : > { %3039 = vmatpush.bf16.msra.mxu0 %v4525_v28 }
  0xe6   : > { %v5031_v56 = vpop.f32.mrf.mxu1  ;;  %530 = vst [vmem:[#allocation3 + $0x100] sm:$0xf] %v494_v29 }
  0xe9   : > { %2004 = vmatmul.bf16.gmra.mxu3 %v3721_v40  ;;  %v4334_v40 = vld [vmem:[#allocation3 + $0xa0] sm:$0xf0] }
  0xea   : > { %v3429_v46 = vor.u32 %v4334_v40, %v3428_v39  ;;  %v3770_v39 = vld [vmem:[#allocation3 + $0xcc] sm:$0xf0] }
  0xeb   : > { %2093 = vmatmul.bf16.gmra.mxu0 %v3725_v44  ;;  %v562_v44 = vld [vmem:[#allocation2 + $0xca] sm:$0xff] }
  0xec   : > { %v598_v48 = vpack.c.bf16 %v562_v44, %v562_v44  ;;  %v4338_v44 = vld [vmem:[#allocation3 + $0xc4] sm:$0xf] }
  0xed   : > { %1286 = vmatmul.bf16.gmra.mxu1 %v3401_v45  ;;  %v455_v45 = vld [vmem:[#allocation2 + $0xd9] sm:$0xff] }
  0xee   : > { %v491_v50 = vpack.c.bf16 %v455_v45, %v455_v45  ;;  %634 = vst [vmem:[#allocation3 + $0xd4] sm:$0xf] %v598_v48  ;;  %v3446_v45 = vld [vmem:[#allocation3 + $0xcc] sm:$0xf0] }
  0xef   : > { %v3449_v48 = vor.u32 %v4338_v44, %v3446_v45  ;;  %v4452_v44 = vld [vmem:[%s5460_s1 + $0x150] sm:$0xff] }
  0xf0   : > { %527 = vst [vmem:[#allocation3 + $0xdc] sm:$0xf] %v491_v50  ;;  %2164 = vmatpush.bf16.msra.mxu1 %v4452_v44 }
  0xf3   : > { %1375 = vmatmul.bf16.gmra.mxu2 %v3405_v51 }
  0xf5   : > { %v4340_v53 = vld [vmem:[#allocation3 + $0xd0] sm:$0xf0] }
  0xf6   : > { %v5033_v63 = vpop.f32.mrf.mxu2 }
  0xf7   : > { %v4341_v29 = vld [vmem:[#allocation3 + $0xdc] sm:$0xf] }
  0xf8   : > { %v5035_v3 = vpop.f32.mrf.mxu0 }
  0xf9   : > { %2009 = vmatmul.bf16.gmra.mxu3 %v3733_v62  ;;  %v4335_v62 = vld [vmem:[#allocation3 + $0xac] sm:$0xf]  ;;  %v1179_v18 = vadd.f32 %v5118_v13, %v5035_v3 }
  0xfa   : > { %v5037_v5 = vpop.f32.mrf.mxu1 }
  0xfb   : > { %2098 = vmatmul.bf16.gmra.mxu0 %v3737_v2 }
  0xfc   : > { %v5048_v9 = vpop.f32.mrf.mxu3 }
  0xfd   : > { %1291 = vmatmul.bf16.gmra.mxu1 %v3413_v4  ;;  %v3437_v4 = vor.u32 %v4335_v62, %v3434_v0  ;;  %v3453_v62 = vor.u32 %v4340_v53, %v3452_v52  ;;  %v601_v0 = vpack.c.bf16 %v565_v58, %v565_v58  ;;  %v4343_v53 = vld [vmem:[#allocation3 + $0xe8] sm:$0xf0] }
  0xfe   : > { %v5050_v12 = vpop.f32.mrf.mxu2 }
  0xff   : > { %637 = vst [vmem:[#allocation3 + $0xf8] sm:$0xf] %v601_v0  ;;  %v461_v0 = vld [vmem:[#allocation2 + $0x121] sm:$0xff] }
 0x100   : > { %v5052_v21 = vpop.f32.mrf.mxu0 }
 0x101   : > { %v1181_v45 = vadd.f32 %v5118_v13, %v5052_v21 }
 0x102   : > { %v5057_v26 = vpop.f32.mrf.mxu1 }
 0x103   : > { %1380 = vmatmul.bf16.gmra.mxu2 %v3417_v16  ;;  %v563_v16 = vld [vmem:[#allocation2 + $0xda] sm:$0xff] }
 0x104   : > { %v5059_v27 = vpop.f32.mrf.mxu3  ;;  %v599_v20 = vpack.c.bf16 %v563_v16, %v563_v16  ;;  %v4411_v16 = vld [vmem:[#allocation3 + $0xe0] sm:$0xf0] }
 0x105   : > { %v3781_v24 = vor.u32 %v4411_v16, %v3780_v14  ;;  %v462_v14 = vld [vmem:[#allocation2 + $0x129] sm:$0xff] }
 0x106   : > { %v5061_v31 = vpop.f32.mrf.mxu2  ;;  %635 = vst [vmem:[#allocation3 + $0xe0] sm:$0xf] %v599_v20  ;;  %v4410_v20 = vld [vmem:[#allocation3 + $0xdc] sm:$0xf] }
 0x108   : > { %v5063_v35 = vpop.f32.mrf.mxu0 }
 0x109   : > { %2014 = vmatmul.bf16.gmra.mxu3 %v3745_v30  ;;  %v3768_v30 = vld [vmem:[#allocation3 + $0xc0] sm:$0xf] }
 0x10a   : > { %v5065_v37 = vpop.f32.mrf.mxu1  ;;  %v3769_v40 = vor.u32 %v4408_v32, %v3768_v30  ;;  %v3458_v30 = vld [vmem:[#allocation3 + $0xe4] sm:$0xf0]  ;;  %v3785_v32 = vor.u32 %v4410_v20, %v3782_v22  ;;  %v497_v20 = vpack.c.bf16 %v461_v0, %v461_v0  ;;  %v3792_v22 = vld [vmem:[#allocation3 + $0xf0] sm:$0xf] }
 0x10b   : > { %2103 = vmatmul.bf16.gmra.mxu0 %v3749_v34 }
 0x10c   : > { %v5067_v38 = vpop.f32.mrf.mxu3  ;;  %533 = vst [vmem:[#allocation3 + $0x124] sm:$0xf] %v497_v20 }
 0x10d   : > { %1296 = vmatmul.bf16.gmra.mxu1 %v3425_v36  ;;  %v4407_v36 = vld [vmem:[#allocation3 + $0xc4] sm:$0xf]  ;;  %v3464_v52 = vld [vmem:[#allocation3 + $0xe0] sm:$0xf] }
 0x10e   : > { %v5069_v42 = vpop.f32.mrf.mxu2 }
 0x110   : > { %v5071_v51 = vpop.f32.mrf.mxu0 }
 0x112   : > { %v5073_v55 = vpop.f32.mrf.mxu1 }
 0x113   : > { %1385 = vmatmul.bf16.gmra.mxu2 %v3429_v46  ;;  %v3773_v46 = vor.u32 %v4407_v36, %v3770_v39 }
 0x114   : > { %v5075_v57 = vpop.f32.mrf.mxu3 }
 0x116   : > { %v5077_v61 = vpop.f32.mrf.mxu2 }
 0x118   : > { %v5079_v2 = vpop.f32.mrf.mxu0 }
 0x119   : > { %2019 = vmatmul.bf16.gmra.mxu3 %v3757_v60  ;;  %v459_v60 = vld [vmem:[#allocation2 + $0x109] sm:$0xff] }
 0x11a   : > { %v5081_v6 = vpop.f32.mrf.mxu1  ;;  %v495_v7 = vpack.c.bf16 %v459_v60, %v459_v60  ;;  %v567_v60 = vld [vmem:[#allocation2 + $0x10a] sm:$0xff] }
 0x11b   : > { %2108 = vmatmul.bf16.gmra.mxu0 %v3761_v1  ;;  %v602_v1 = vpack.c.bf16 %v566_v59, %v566_v59 }
 0x11c   : > { %v5092_v11 = vpop.f32.mrf.mxu3  ;;  %531 = vst [vmem:[#allocation3 + $0x10c] sm:$0xf] %v495_v7  ;;  %v603_v7 = vpack.c.bf16 %v567_v60, %v567_v60  ;;  %v3476_v60 = vld [vmem:[#allocation3 + $0xf8] sm:$0xf] }
 0x11d   : > { %1301 = vmatmul.bf16.gmra.mxu1 %v3437_v4  ;;  %v460_v4 = vld [vmem:[#allocation2 + $0x111] sm:$0xff]  ;;  %638 = vst [vmem:[#allocation3 + $0x104] sm:$0xf] %v602_v1 }
 0x11e   : > { %v5094_v15 = vpop.f32.mrf.mxu2  ;;  %v496_v10 = vpack.c.bf16 %v460_v4, %v460_v4  ;;  %v3465_v4 = vor.u32 %v4343_v53, %v3464_v52  ;;  %639 = vst [vmem:[#allocation3 + $0x110] sm:$0xf] %v603_v7  ;;  %v570_v7 = vld [vmem:[#allocation2 + $0x12a] sm:$0xff] }
 0x11f   : > { %v606_v20 = vpack.c.bf16 %v570_v7, %v570_v7 }
 0x120   : > { %v5096_v25 = vpop.f32.mrf.mxu0  ;;  %532 = vst [vmem:[#allocation3 + $0x118] sm:$0xf] %v496_v10 }
 0x121   : > { %642 = vst [vmem:[#allocation3 + $0x134] sm:$0xf] %v606_v20  ;;  %v572_v20 = vld [vmem:[#allocation2 + $0x142] sm:$0xff] }
 0x122   : > { %v5101_v33 = vpop.f32.mrf.mxu1 }
 0x123   : > { %1390 = vmatmul.bf16.gmra.mxu2 %v3441_v19 }
 0x124   : > { %v5103_v34 = vpop.f32.mrf.mxu3 }
 0x125   : > { %v3488_v7 = vld [vmem:[#allocation3 + $0x110] sm:$0xf] }
 0x126   : > { %v5105_v43 = vpop.f32.mrf.mxu2 }
 0x128   : > { %v5107_v47 = vpop.f32.mrf.mxu0 }
 0x129   : > { %2024 = vmatmul.bf16.gmra.mxu3 %v3769_v40  ;;  %v3461_v40 = vor.u32 %v4341_v29, %v3458_v30  ;;  %v4413_v30 = vld [vmem:[#allocation3 + $0xf4] sm:$0xf] }
 0x12a   : > { %v1267_v49 = vpop.f32.mrf.mxu1 }
 0x12b   : > { %2113 = vmatmul.bf16.gmra.mxu0 %v3773_v46  ;;  %v1268_v23 = vadd.f32 %v1267_v49, %v1179_v18  ;;  %v4508_v46 = vld [vmem:[%s5460_s1 + $0x190] sm:$0xff] }
 0x12c   : > { %v5109_v50 = vpop.f32.mrf.mxu3  ;;  %2862 = vmatpush.bf16.msra.mxu2 %v4508_v46  ;;  %v4524_v18 = vld [vmem:[%s5460_s1 + $0x210] sm:$0xff] }
 0x12d   : > { %1306 = vmatmul.bf16.gmra.mxu1 %v3449_v48  ;;  %v4516_v48 = vld [vmem:[%s5460_s1 + $0x1d0] sm:$0xff]  ;;  %3040 = vmatpush.bf16.msra.mxu0 %v4524_v18 }
 0x12e   : > { %v5111_v54 = vpop.f32.mrf.mxu2  ;;  %2951 = vmatpush.bf16.msra.mxu3 %v4516_v48  ;;  %v3470_v46 = vld [vmem:[#allocation3 + $0xfc] sm:$0xf0] }
 0x130   : > { %v5113_v8 = vpop.f32.mrf.mxu0 }
 0x132   : > { %v1269_v17 = vpop.f32.mrf.mxu1 }
 0x133   : > { %1395 = vmatmul.bf16.gmra.mxu2 %v3453_v62  ;;  %v1270_v59 = vadd.f32 %v1269_v17, %v1181_v45  ;;  %v568_v62 = vld [vmem:[#allocation2 + $0x112] sm:$0xff]  ;;  %v498_v17 = vpack.c.bf16 %v462_v14, %v462_v14  ;;  %v4344_v45 = vld [vmem:[#allocation3 + $0xf4] sm:$0xf] }
 0x134   : > { %v5122_v19 = vpop.f32.mrf.mxu3  ;;  %v604_v10 = vpack.c.bf16 %v568_v62, %v568_v62 }
 0x135   : > { %534 = vst [vmem:[#allocation3 + $0x130] sm:$0xf] %v498_v17  ;;  %v464_v17 = vld [vmem:[#allocation2 + $0x141] sm:$0xff] }
 0x136   : > { %v1356_v28 = vpop.f32.mrf.mxu2  ;;  %640 = vst [vmem:[#allocation3 + $0x11c] sm:$0xf] %v604_v10  ;;  %v463_v10 = vld [vmem:[#allocation2 + $0x139] sm:$0xff] }
 0x137   : > { %v1357_v36 = vadd.f32 %v1356_v28, %v1268_v23  ;;  %v4414_v23 = vld [vmem:[#allocation3 + $0xf8] sm:$0xf0]  ;;  %v1184_v28 = vadd.f32 %v5118_v13, %v5063_v35  ;;  %v3473_v35 = vor.u32 %v4344_v45, %v3470_v46 }
 0x138   : > { %v2079_v39 = vpop.f32.mrf.mxu0 }
 0x139   : > { %2029 = vmatmul.bf16.gmra.mxu3 %v3781_v24  ;;  %1436 = vst [vmem:[%s4827_s5] sm:$0xff] %v1357_v36 }
 0x13a   : > { %v1272_v3 = vpop.f32.mrf.mxu1 }
 0x13b   : > { %2118 = vmatmul.bf16.gmra.mxu0 %v3785_v32  ;;  %v3794_v32 = vld [vmem:[#allocation3 + $0xfc] sm:$0xf0] }
 0x13c   : > { %v1990_v49 = vpop.f32.mrf.mxu3  ;;  %v3797_v48 = vor.u32 %v4413_v30, %v3794_v32 }
 0x13d   : > { %v5136_v58 = vadd.f32 %v2079_v39, %v1990_v49  ;;  %1311 = vmatmul.bf16.gmra.mxu1 %v3461_v40  ;;  %v1273_v39 = vadd.f32 %v1272_v3, %v1184_v28  ;;  %v3793_v40 = vor.u32 %v4414_v23, %v3792_v22  ;;  %v4346_v3 = vld [vmem:[#allocation3 + $0x100] sm:$0xf0]  ;;  %v500_v23 = vpack.c.bf16 %v464_v17, %v464_v17  ;;  %v3804_v28 = vld [vmem:[#allocation3 + $0x108] sm:$0xf] }
 0x13e   : > { %v1358_v21 = vpop.f32.mrf.mxu2  ;;  %v465_v17 = vld [vmem:[#allocation2 + $0x151] sm:$0xff] }
 0x13f   : > { %v1359_v1 = vadd.f32 %v1358_v21, %v1270_v59  ;;  %v1186_v59 = vadd.f32 %v5118_v13, %v5071_v51  ;;  %v499_v51 = vpack.c.bf16 %v463_v10, %v463_v10  ;;  %536 = vst [vmem:[#allocation3 + $0x148] sm:$0xf] %v500_v23  ;;  %v4349_v10 = vld [vmem:[#allocation3 + $0x118] sm:$0xf0] }
 0x140   : > { %v2081_v16 = vpop.f32.mrf.mxu0 }
 0x141   : > { %1437 = vst [vmem:[%s4827_s5 + $0x8] sm:$0xff] %v1359_v1 }
 0x142   : > { %v1274_v24 = vpop.f32.mrf.mxu1  ;;  %535 = vst [vmem:[#allocation3 + $0x13c] sm:$0xf] %v499_v51  ;;  %v3489_v51 = vor.u32 %v4349_v10, %v3488_v7 }
 0x143   : > { %1400 = vmatmul.bf16.gmra.mxu2 %v3465_v4  ;;  %v1275_v0 = vadd.f32 %v1274_v24, %v1186_v59  ;;  %v569_v4 = vld [vmem:[#allocation2 + $0x122] sm:$0xff]  ;;  %v1189_v24 = vadd.f32 %v5118_v13, %v5079_v2 }
 0x144   : > { %v1992_v29 = vpop.f32.mrf.mxu3  ;;  %v605_v18 = vpack.c.bf16 %v569_v4, %v569_v4 }
 0x145   : > { %v5144_v36 = vadd.f32 %v2081_v16, %v1992_v29  ;;  %v3477_v16 = vor.u32 %v4346_v3, %v3476_v60  ;;  %v4417_v29 = vld [vmem:[#allocation3 + $0x110] sm:$0xf0]  ;;  %v4451_v60 = vld [vmem:[%s5460_s1 + $0x148] sm:$0xff] }
 0x146   : > { %v1361_v44 = vpop.f32.mrf.mxu2  ;;  %641 = vst [vmem:[#allocation3 + $0x128] sm:$0xf] %v605_v18  ;;  %v3805_v46 = vor.u32 %v4417_v29, %v3804_v28  ;;  %2165 = vmatpush.bf16.msra.mxu1 %v4451_v60  ;;  %v571_v18 = vld [vmem:[#allocation2 + $0x13a] sm:$0xff]  ;;  %v608_v28 = vpack.c.bf16 %v572_v20, %v572_v20 }
 0x147   : > { %v1362_v49 = vadd.f32 %v1361_v44, %v1273_v39  ;;  %v4416_v39 = vld [vmem:[#allocation3 + $0x10c] sm:$0xf]  ;;  %v607_v23 = vpack.c.bf16 %v571_v18, %v571_v18 }
 0x148   : > { %v2084_v52 = vpop.f32.mrf.mxu0  ;;  %v466_v29 = vld [vmem:[#allocation2 + $0x159] sm:$0xff]  ;;  %644 = vst [vmem:[#allocation3 + $0x14c] sm:$0xf] %v608_v28  ;;  %v467_v28 = vld [vmem:[#allocation2 + $0x169] sm:$0xff] }
 0x149   : > { %2034 = vmatmul.bf16.gmra.mxu3 %v3793_v40  ;;  %1438 = vst [vmem:[%s4827_s5 + $0x10] sm:$0xff] %v1362_v49  ;;  %v3806_v40 = vld [vmem:[#allocation3 + $0x114] sm:$0xf0]  ;;  %v4347_v49 = vld [vmem:[#allocation3 + $0x10c] sm:$0xf] }
 0x14a   : > { %v1277_v53 = vpop.f32.mrf.mxu1  ;;  %643 = vst [vmem:[#allocation3 + $0x140] sm:$0xf] %v607_v23  ;;  %v574_v23 = vld [vmem:[#allocation2 + $0x15a] sm:$0xff] }
 0x14b   : > { %2123 = vmatmul.bf16.gmra.mxu0 %v3797_v48  ;;  %v1278_v45 = vadd.f32 %v1277_v53, %v1189_v24  ;;  %v4507_v53 = vld [vmem:[%s5460_s1 + $0x188] sm:$0xff] }
 0x14c   : > { %v1995_v21 = vpop.f32.mrf.mxu3  ;;  %2863 = vmatpush.bf16.msra.mxu2 %v4507_v53  ;;  %v3494_v53 = vld [vmem:[#allocation3 + $0x12c] sm:$0xf0] }
 0x14d   : > { %v5149_v62 = vadd.f32 %v2084_v52, %v1995_v21  ;;  %1316 = vmatmul.bf16.gmra.mxu1 %v3473_v35  ;;  %v3482_v52 = vld [vmem:[#allocation3 + $0x114] sm:$0xf0]  ;;  %v3809_v35 = vor.u32 %v4416_v39, %v3806_v40  ;;  %v501_v39 = vpack.c.bf16 %v465_v17, %v465_v17  ;;  %v3816_v40 = vld [vmem:[#allocation3 + $0x120] sm:$0xf]  ;;  %v3500_v18 = vld [vmem:[#allocation3 + $0x128] sm:$0xf] }
 0x14e   : > { %v1363_v1 = vpop.f32.mrf.mxu2  ;;  %v3485_v2 = vor.u32 %v4347_v49, %v3482_v52  ;;  %v4419_v52 = vld [vmem:[#allocation3 + $0x124] sm:$0xf] }
 0x14f   : > { %v1364_v14 = vadd.f32 %v1363_v1, %v1275_v0  ;;  %v1191_v0 = vadd.f32 %v5118_v13, %v5096_v25  ;;  %v4515_v1 = vld [vmem:[%s5460_s1 + $0x1c8] sm:$0xff]  ;;  %537 = vst [vmem:[#allocation3 + $0x154] sm:$0xf] %v501_v39  ;;  %v610_v39 = vpack.c.bf16 %v574_v23, %v574_v23 }
 0x150   : > { %v2086_v22 = vpop.f32.mrf.mxu0  ;;  %2952 = vmatpush.bf16.msra.mxu3 %v4515_v1 }
 0x151   : > { %1439 = vst [vmem:[%s4827_s5 + $0x18] sm:$0xff] %v1364_v14  ;;  %v3512_v23 = vld [vmem:[#allocation3 + $0x140] sm:$0xf] }
 0x152   : > { %v1279_v30 = vpop.f32.mrf.mxu1  ;;  %646 = vst [vmem:[#allocation3 + $0x164] sm:$0xf] %v610_v39  ;;  %v576_v39 = vld [vmem:[#allocation2 + $0x172] sm:$0xff] }
 0x153   : > { %1405 = vmatmul.bf16.gmra.mxu2 %v3477_v16  ;;  %v1280_v16 = vadd.f32 %v1279_v30, %v1191_v0  ;;  %v502_v30 = vpack.c.bf16 %v466_v29, %v466_v29  ;;  %v4350_v0 = vld [vmem:[#allocation3 + $0x124] sm:$0xf] }
 0x154   : > { %v1997_v32 = vpop.f32.mrf.mxu3 }
 0x155   : > { %v5154_v44 = vadd.f32 %v2086_v22, %v1997_v32  ;;  %v4523_v32 = vld [vmem:[%s5460_s1 + $0x208] sm:$0xff]  ;;  %538 = vst [vmem:[#allocation3 + $0x160] sm:$0xf] %v502_v30  ;;  %v468_v30 = vld [vmem:[#allocation2 + $0x171] sm:$0xff] }
 0x156   : > { %v1366_v48 = vpop.f32.mrf.mxu2  ;;  %3041 = vmatpush.bf16.msra.mxu0 %v4523_v32 }
 0x157   : > { %v1367_v59 = vadd.f32 %v1366_v48, %v1278_v45  ;;  %v4420_v45 = vld [vmem:[#allocation3 + $0x128] sm:$0xf0]  ;;  %v1194_v48 = vadd.f32 %v5118_v13, %v5107_v47  ;;  %v3497_v47 = vor.u32 %v4350_v0, %v3494_v53 }
 0x158   : > { %v2089_v21 = vpop.f32.mrf.mxu0 }
 0x159   : > { %2039 = vmatmul.bf16.gmra.mxu3 %v3805_v46  ;;  %1440 = vst [vmem:[%s4827_s5 + $0x20] sm:$0xff] %v1367_v59 }
 0x15a   : > { %v1282_v3 = vpop.f32.mrf.mxu1 }
 0x15b   : > { %2128 = vmatmul.bf16.gmra.mxu0 %v3809_v35  ;;  %v3818_v35 = vld [vmem:[#allocation3 + $0x12c] sm:$0xf0] }
 0x15c   : > { %v2000_v4 = vpop.f32.mrf.mxu3  ;;  %v3821_v1 = vor.u32 %v4419_v52, %v3818_v35 }
 0x15d   : > { %v5168_v14 = vadd.f32 %v2089_v21, %v2000_v4  ;;  %1321 = vmatmul.bf16.gmra.mxu1 %v3485_v2  ;;  %v1283_v21 = vadd.f32 %v1282_v3, %v1194_v48  ;;  %v3817_v2 = vor.u32 %v4420_v45, %v3816_v40  ;;  %v4352_v3 = vld [vmem:[#allocation3 + $0x130] sm:$0xf0]  ;;  %v504_v45 = vpack.c.bf16 %v468_v30, %v468_v30  ;;  %v3828_v48 = vld [vmem:[#allocation3 + $0x138] sm:$0xf] }
 0x15e   : > { %v1368_v25 = vpop.f32.mrf.mxu2  ;;  %v361_v30 = vld [vmem:[#allocation2 + $0x180] sm:$0xff] }
 0x15f   : > { %v1369_v22 = vadd.f32 %v1368_v25, %v1280_v16  ;;  %v1196_v16 = vadd.f32 %v5118_v13, %v5113_v8  ;;  %v503_v8 = vpack.c.bf16 %v467_v28, %v467_v28  ;;  %540 = vst [vmem:[#allocation3 + $0x178] sm:$0xf] %v504_v45  ;;  %v4355_v28 = vld [vmem:[#allocation3 + $0x148] sm:$0xf0] }
 0x160   : > { %v2091_v24 = vpop.f32.mrf.mxu0 }
 0x161   : > { %1441 = vst [vmem:[%s4827_s5 + $0x28] sm:$0xff] %v1369_v22 }
 0x162   : > { %v1284_v46 = vpop.f32.mrf.mxu1  ;;  %539 = vst [vmem:[#allocation3 + $0x16c] sm:$0xf] %v503_v8  ;;  %v3513_v8 = vor.u32 %v4355_v28, %v3512_v23  ;;  %v4356_v23 = vld [vmem:[#allocation3 + $0x154] sm:$0xf]  ;;  %v3518_v28 = vld [vmem:[#allocation3 + $0x15c] sm:$0xf0] }
 0x163   : > { %1410 = vmatmul.bf16.gmra.mxu2 %v3489_v51  ;;  %v1285_v17 = vadd.f32 %v1284_v46, %v1196_v16  ;;  %v573_v51 = vld [vmem:[#allocation2 + $0x152] sm:$0xff]  ;;  %v1199_v46 = vadd.f32 %v5118_v13, %v5029_v41 }
 0x164   : > { %v2002_v49 = vpop.f32.mrf.mxu3  ;;  %v609_v32 = vpack.c.bf16 %v573_v51, %v573_v51 }
 0x165   : > { %v5176_v59 = vadd.f32 %v2091_v24, %v2002_v49  ;;  %v3501_v24 = vor.u32 %v4352_v3, %v3500_v18  ;;  %v4423_v49 = vld [vmem:[#allocation3 + $0x140] sm:$0xf0]  ;;  %v4450_v18 = vld [vmem:[%s5460_s1 + $0x140] sm:$0xff] }
 0x166   : > { %v1371_v60 = vpop.f32.mrf.mxu2  ;;  %645 = vst [vmem:[#allocation3 + $0x158] sm:$0xf] %v609_v32  ;;  %v3829_v53 = vor.u32 %v4423_v49, %v3828_v48  ;;  %2166 = vmatpush.bf16.msra.mxu1 %v4450_v18  ;;  %v575_v32 = vld [vmem:[#allocation2 + $0x16a] sm:$0xff]  ;;  %v612_v48 = vpack.c.bf16 %v576_v39, %v576_v39 }
 0x167   : > { %v1372_v4 = vadd.f32 %v1371_v60, %v1283_v21  ;;  %v4422_v21 = vld [vmem:[#allocation3 + $0x13c] sm:$0xf]  ;;  %v611_v45 = vpack.c.bf16 %v575_v32, %v575_v32  ;;  %v3842_v18 = vld [vmem:[#allocation3 + $0x15c] sm:$0xf0]  ;;  %v3521_v32 = vor.u32 %v4356_v23, %v3518_v28 }
 0x168   : > { %v2094_v7 = vpop.f32.mrf.mxu0  ;;  %v362_v49 = vld [vmem:[#allocation2 + $0x188] sm:$0xff]  ;;  %648 = vst [vmem:[#allocation3 + $0x17c] sm:$0xf] %v612_v48 }
 0x169   : > { %2044 = vmatmul.bf16.gmra.mxu3 %v3817_v2  ;;  %1442 = vst [vmem:[%s4827_s5 + $0x30] sm:$0xff] %v1372_v4  ;;  %v3830_v2 = vld [vmem:[#allocation3 + $0x144] sm:$0xf0]  ;;  %v4353_v4 = vld [vmem:[#allocation3 + $0x13c] sm:$0xf] }
 0x16a   : > { %v1287_v10 = vpop.f32.mrf.mxu1  ;;  %647 = vst [vmem:[#allocation3 + $0x170] sm:$0xf] %v611_v45 }
 0x16b   : > { %2133 = vmatmul.bf16.gmra.mxu0 %v3821_v1  ;;  %v1288_v0 = vadd.f32 %v1287_v10, %v1199_v46  ;;  %v4506_v10 = vld [vmem:[%s5460_s1 + $0x180] sm:$0xff] }
 0x16c   : > { %v2005_v25 = vpop.f32.mrf.mxu3  ;;  %2864 = vmatpush.bf16.msra.mxu2 %v4506_v10  ;;  %v469_v46 = vld [vmem:[#allocation2 + $0x181] sm:$0xff] }
 0x16d   : > { %v5181_v20 = vadd.f32 %v2094_v7, %v2005_v25  ;;  %1326 = vmatmul.bf16.gmra.mxu1 %v3497_v47  ;;  %v3506_v7 = vld [vmem:[#allocation3 + $0x144] sm:$0xf0]  ;;  %v3833_v47 = vor.u32 %v4422_v21, %v3830_v2  ;;  %v4522_v21 = vld [vmem:[%s5460_s1 + $0x200] sm:$0xff]  ;;  %v470_v2 = vld [vmem:[#allocation2 + $0x189] sm:$0xff] }
 0x16e   : > { %v1373_v22 = vpop.f32.mrf.mxu2  ;;  %v3509_v41 = vor.u32 %v4353_v4, %v3506_v7  ;;  %3042 = vmatpush.bf16.msra.mxu0 %v4522_v21  ;;  %v505_v7 = vpack.c.bf16 %v469_v46, %v469_v46 }
 0x16f   : > { %v1374_v29 = vadd.f32 %v1373_v22, %v1285_v17  ;;  %v1201_v17 = vadd.f32 %v5118_v13, %v5031_v56  ;;  %v4514_v22 = vld [vmem:[%s5460_s1 + $0x1c0] sm:$0xff] }
 0x170   : > { %v2096_v40 = vpop.f32.mrf.mxu0  ;;  %2953 = vmatpush.bf16.msra.mxu3 %v4514_v22  ;;  %541 = vst [vmem:[#allocation3 + $0x184] sm:$0xf] %v505_v7  ;;  %v3854_v7 = vld [vmem:[#allocation3 + $0x174] sm:$0xf0] }
 0x171   : > { %1443 = vst [vmem:[%s4827_s5 + $0x38] sm:$0xff] %v1374_v29 }
 0x172   : > { %v1289_v52 = vpop.f32.mrf.mxu1 }
 0x173   : > { %1415 = vmatmul.bf16.gmra.mxu2 %v3501_v24  ;;  %v1290_v24 = vadd.f32 %v1289_v52, %v1201_v17  ;;  %v397_v52 = vpack.c.bf16 %v361_v30, %v361_v30  ;;  %v1206_v30 = vadd.f32 %v5118_v13, %v5057_v26  ;;  %v1209_v26 = vadd.f32 %v5118_v13, %v5065_v37 }
 0x174   : > { %v2007_v35 = vpop.f32.mrf.mxu3  ;;  %v1211_v37 = vadd.f32 %v5118_v13, %v5073_v55  ;;  %v1214_v55 = vadd.f32 %v5118_v13, %v5081_v6  ;;  %v1216_v6 = vadd.f32 %v5118_v13, %v5101_v33  ;;  %v1219_v33 = vadd.f32 %v5118_v13, %v5033_v63 }
 0x175   : > { %v5186_v60 = vadd.f32 %v2096_v40, %v2007_v35  ;;  %433 = vst [vmem:[#allocation3 + $0x180] sm:$0xf] %v397_v52  ;;  %v3852_v52 = vld [vmem:[#allocation3 + $0x168] sm:$0xf]  ;;  %v1221_v63 = vadd.f32 %v5118_v13, %v5050_v12  ;;  %v1224_v12 = vadd.f32 %v5118_v13, %v5061_v31  ;;  %v1226_v31 = vadd.f32 %v5118_v13, %v5069_v42 }
 0x176   : > { %v1376_v1 = vpop.f32.mrf.mxu2  ;;  %v1229_v42 = vadd.f32 %v5118_v13, %v5077_v61  ;;  %v1231_v61 = vadd.f32 %v5118_v13, %v5094_v15  ;;  %v1234_v15 = vadd.f32 %v5118_v13, %v5105_v43  ;;  %v1236_v43 = vadd.f32 %v5118_v13, %v5111_v54 }
 0x177   : > { %v1377_v16 = vadd.f32 %v1376_v1, %v1288_v0  ;;  %v398_v0 = vpack.c.bf16 %v362_v49, %v362_v49  ;;  %v4426_v1 = vld [vmem:[#allocation3 + $0x158] sm:$0xf0]  ;;  %v1239_v54 = vadd.f32 %v5118_v13, %v5048_v9  ;;  %v5284_v9 = vld [vmem:[%s5461_s2] ss:$0 sm:$0xff] }
 0x178   : > { %v2099_v25 = vpop.f32.mrf.mxu0 }
 0x179   : > { %2049 = vmatmul.bf16.gmra.mxu3 %v3829_v53  ;;  %1444 = vst [vmem:[%s4827_s5 + $0x40] sm:$0xff] %v1377_v16  ;;  %v3840_v53 = vld [vmem:[#allocation3 + $0x150] sm:$0xf]  ;;  %v506_v16 = vpack.c.bf16 %v470_v2, %v470_v2  ;;  %v4429_v2 = vld [vmem:[#allocation3 + $0x170] sm:$0xf0] }
 0x17a   : > { %v1292_v3 = vpop.f32.mrf.mxu1  ;;  %v3841_v22 = vor.u32 %v4426_v1, %v3840_v53  ;;  %434 = vst [vmem:[#allocation3 + $0x18c] sm:$0xf] %v398_v0  ;;  %v4428_v1 = vld [vmem:[#allocation3 + $0x16c] sm:$0xf] }
 0x17b   : > { %2138 = vmatmul.bf16.gmra.mxu0 %v3833_v47  ;;  %v1204_v47 = vadd.f32 %v5118_v13, %v5037_v5  ;;  %542 = vst [vmem:[#allocation3 + $0x190] sm:$0xf] %v506_v16  ;;  %v3853_v16 = vor.u32 %v4429_v2, %v3852_v52  ;;  %v1241_v13 = vadd.f32 %v5284_v9, %v5059_v27 }
 0x17c   : > { %v2010_v51 = vpop.f32.mrf.mxu3  ;;  %v1244_v27 = vadd.f32 %v5284_v9, %v5067_v38  ;;  %v1246_v38 = vadd.f32 %v5284_v9, %v5075_v57  ;;  %v1249_v57 = vadd.f32 %v5284_v9, %v5092_v11  ;;  %v1251_v11 = vadd.f32 %v5284_v9, %v5103_v34 }
 0x17d   : > { %v5200_v29 = vadd.f32 %v2099_v25, %v2010_v51  ;;  %1331 = vmatmul.bf16.gmra.mxu1 %v3509_v41  ;;  %v4425_v41 = vld [vmem:[#allocation3 + $0x154] sm:$0xf]  ;;  %v1293_v10 = vadd.f32 %v1292_v3, %v1204_v47  ;;  %v1254_v34 = vadd.f32 %v5284_v9, %v5109_v50  ;;  %v1256_v50 = vadd.f32 %v5284_v9, %v5122_v19  ;;  %v4484_v19 = vld [vmem:[#allocation3 + $0x100] sm:$0xf0] }
 0x17e   : > { %v1378_v56 = vpop.f32.mrf.mxu2 }
 0x17f   : > { %v1379_v40 = vadd.f32 %v1378_v56, %v1290_v24  ;;  %v3845_v24 = vor.u32 %v4425_v41, %v3842_v18  ;;  %v4359_v41 = vld [vmem:[#allocation3 + $0x16c] sm:$0xf]  ;;  %v3530_v18 = vld [vmem:[#allocation3 + $0x174] sm:$0xf0] }
 0x180   : > { %v2101_v35 = vpop.f32.mrf.mxu0  ;;  %v3533_v23 = vor.u32 %v4359_v41, %v3530_v18 }
 0x181   : > { %1445 = vst [vmem:[%s4827_s5 + $0x48] sm:$0xff] %v1379_v40  ;;  %v3524_v40 = vld [vmem:[#allocation3 + $0x158] sm:$0xf] }
 0x182   : > { %v1294_v4 = vpop.f32.mrf.mxu1  ;;  %v3866_v52 = vld [vmem:[#allocation3 + $0x18c] sm:$0xf0] }
 0x183   : > { %1420 = vmatmul.bf16.gmra.mxu2 %v3513_v8  ;;  %v4358_v8 = vld [vmem:[#allocation3 + $0x160] sm:$0xf0]  ;;  %v1295_v48 = vadd.f32 %v1294_v4, %v1206_v30 }
 0x184   : > { %v2012_v25 = vpop.f32.mrf.mxu3 }
 0x185   : > { %v5208_v17 = vadd.f32 %v2101_v35, %v2012_v25  ;;  %v3525_v35 = vor.u32 %v4358_v8, %v3524_v40 }
 0x186   : > { %v1381_v51 = vpop.f32.mrf.mxu2 }
 0x187   : > { %v1382_v56 = vadd.f32 %v1381_v51, %v1293_v10  ;;  %v3857_v10 = vor.u32 %v4428_v1, %v3854_v7  ;;  %v3692_v1 = vld [vmem:[#allocation3 + $0x20] sm:$0xf]  ;;  %v4388_v7 = vld [vmem:[#allocation3 + $0x28] sm:$0xf0] }
 0x188   : > { %v2104_v5 = vpop.f32.mrf.mxu0  ;;  %v3693_v41 = vor.u32 %v4388_v7, %v3692_v1 }
 0x189   : > { %2054 = vmatmul.bf16.gmra.mxu3 %v3841_v22  ;;  %1446 = vst [vmem:[%s4827_s5 + $0x50] sm:$0xff] %v1382_v56  ;;  %v3536_v56 = vld [vmem:[#allocation3 + $0x170] sm:$0xf] }
 0x18a   : > { %v1297_v39 = vpop.f32.mrf.mxu1 }
 0x18b   : > { %2143 = vmatmul.bf16.gmra.mxu0 %v3845_v24  ;;  %v1298_v4 = vadd.f32 %v1297_v39, %v1209_v26 }
 0x18c   : > { %v2015_v3 = vpop.f32.mrf.mxu3 }
 0x18d   : > { %v5213_v45 = vadd.f32 %v2104_v5, %v2015_v3  ;;  %1336 = vmatmul.bf16.gmra.mxu1 %v3521_v32  ;;  %v4361_v5 = vld [vmem:[#allocation3 + $0x178] sm:$0xf0] }
 0x18e   : > { %v1383_v49 = vpop.f32.mrf.mxu2  ;;  %v3537_v40 = vor.u32 %v4361_v5, %v3536_v56 }
 0x18f   : > { %v1384_v46 = vadd.f32 %v1383_v49, %v1295_v48  ;;  %v3864_v48 = vld [vmem:[#allocation3 + $0x180] sm:$0xf]  ;;  %v4432_v49 = vld [vmem:[#allocation3 + $0x188] sm:$0xf0] }
 0x190   : > { %v2106_v21 = vpop.f32.mrf.mxu0  ;;  %v3865_v26 = vor.u32 %v4432_v49, %v3864_v48  ;;  %v4460_v48 = vld [vmem:[#allocation3 + $0x40] sm:$0xf0] }
 0x191   : > { %1447 = vst [vmem:[%s4827_s5 + $0x58] sm:$0xff] %v1384_v46 }
 0x192   : > { %v1299_v0 = vpop.f32.mrf.mxu1 }
 0x193   : > { %1425 = vmatmul.bf16.gmra.mxu2 %v3525_v35  ;;  %v1300_v39 = vadd.f32 %v1299_v0, %v1211_v37 }
 0x194   : > { %v2017_v53 = vpop.f32.mrf.mxu3 }
 0x195   : > { %v5218_v47 = vadd.f32 %v2106_v21, %v2017_v53  ;;  %v4431_v21 = vld [vmem:[#allocation3 + $0x184] sm:$0xf] }
 0x196   : > { %v1386_v25 = vpop.f32.mrf.mxu2 }
 0x197   : > { %v1387_v22 = vadd.f32 %v1386_v25, %v1298_v4  ;;  %v3869_v4 = vor.u32 %v4431_v21, %v3866_v52  ;;  %v3704_v21 = vld [vmem:[#allocation3 + $0x38] sm:$0xf]  ;;  %v4391_v52 = vld [vmem:[#allocation3 + $0x40] sm:$0xf0] }
 0x198   : > { %v2109_v51 = vpop.f32.mrf.mxu0  ;;  %v3705_v1 = vor.u32 %v4391_v52, %v3704_v21 }
 0x199   : > { %2059 = vmatmul.bf16.gmra.mxu3 %v3853_v16  ;;  %1448 = vst [vmem:[%s4827_s5 + $0x60] sm:$0xff] %v1387_v22  ;;  %v4020_v22 = vld [vmem:[#allocation3 + $0x30] sm:$0xf] }
 0x19a   : > { %v1302_v28 = vpop.f32.mrf.mxu1 }
 0x19b   : > { %2148 = vmatmul.bf16.gmra.mxu0 %v3857_v10  ;;  %v1303_v0 = vadd.f32 %v1302_v28, %v1214_v55 }
 0x19c   : > { %v2020_v24 = vpop.f32.mrf.mxu3 }
 0x19d   : > { %v5223_v32 = vadd.f32 %v2109_v51, %v2020_v24  ;;  %1341 = vmatmul.bf16.gmra.mxu1 %v3533_v23  ;;  %v4459_v51 = vld [vmem:[#allocation3 + $0x38] sm:$0xf0] }
 0x19e   : > { %v1388_v30 = vpop.f32.mrf.mxu2  ;;  %v4021_v56 = vor.u32 %v4459_v51, %v4020_v22 }
 0x19f   : > { %v1389_v3 = vadd.f32 %v1388_v30, %v1300_v39  ;;  %v4458_v39 = vld [vmem:[#allocation3 + $0x34] sm:$0xf]  ;;  %v4022_v30 = vld [vmem:[#allocation3 + $0x3c] sm:$0xf0] }
 0x1a0   : > { %v2111_v8 = vpop.f32.mrf.mxu0  ;;  %v4025_v55 = vor.u32 %v4458_v39, %v4022_v30  ;;  %v4463_v39 = vld [vmem:[#allocation3 + $0x58] sm:$0xf0] }
 0x1a1   : > { %1449 = vst [vmem:[%s4827_s5 + $0x68] sm:$0xff] %v1389_v3 }
 0x1a2   : > { %v1304_v46 = vpop.f32.mrf.mxu1 }
 0x1a3   : > { %1430 = vmatmul.bf16.gmra.mxu2 %v3537_v40  ;;  %v1305_v28 = vadd.f32 %v1304_v46, %v1216_v6 }
 0x1a4   : > { %v2022_v35 = vpop.f32.mrf.mxu3 }
 0x1a5   : > { %v5228_v2 = vadd.f32 %v2111_v8, %v2022_v35  ;;  %v4028_v8 = vld [vmem:[#allocation3 + $0x38] sm:$0xf] }
 0x1a6   : > { %v1391_v53 = vpop.f32.mrf.mxu2 }
 0x1a7   : > { %v1392_v16 = vadd.f32 %v1391_v53, %v1303_v0  ;;  %v4029_v0 = vor.u32 %v4460_v48, %v4028_v8  ;;  %v3716_v8 = vld [vmem:[#allocation3 + $0x50] sm:$0xf]  ;;  %v4394_v48 = vld [vmem:[#allocation3 + $0x58] sm:$0xf0] }
 0x1a8   : > { %v2114_v25 = vpop.f32.mrf.mxu0  ;;  %v3717_v21 = vor.u32 %v4394_v48, %v3716_v8 }
 0x1a9   : > { %2064 = vmatmul.bf16.gmra.mxu3 %v3865_v26  ;;  %1450 = vst [vmem:[%s4827_s5 + $0x70] sm:$0xff] %v1392_v16  ;;  %v4032_v16 = vld [vmem:[#allocation3 + $0x48] sm:$0xf] }
 0x1aa   : > { %v1307_v18 = vpop.f32.mrf.mxu1 }
 0x1ab   : > { %2153 = vmatmul.bf16.gmra.mxu0 %v3869_v4  ;;  %v1308_v46 = vadd.f32 %v1307_v18, %v1219_v33 }
 0x1ac   : > { %v2025_v10 = vpop.f32.mrf.mxu3 }
 0x1ad   : > { %v5233_v23 = vadd.f32 %v2114_v25, %v2025_v10  ;;  %2167 = vmatmul.bf16.vlgmr.msra.gmra.mxu1 %v3693_v41  ;;  %v4462_v25 = vld [vmem:[#allocation3 + $0x50] sm:$0xf0] }
 0x1ae   : > { %v1393_v37 = vpop.f32.mrf.mxu2  ;;  %v4033_v22 = vor.u32 %v4462_v25, %v4032_v16 }
 0x1af   : > { %v1394_v24 = vadd.f32 %v1393_v37, %v1305_v28  ;;  %v4461_v28 = vld [vmem:[#allocation3 + $0x4c] sm:$0xf]  ;;  %v4034_v37 = vld [vmem:[#allocation3 + $0x54] sm:$0xf0] }
 0x1b0   : > { %v2116_v5 = vpop.f32.mrf.mxu0  ;;  %v4037_v33 = vor.u32 %v4461_v28, %v4034_v37  ;;  %v4466_v28 = vld [vmem:[#allocation3 + $0x70] sm:$0xf0] }
 0x1b1   : > { %1451 = vst [vmem:[%s4827_s5 + $0x78] sm:$0xff] %v1394_v24 }
 0x1b2   : > { %v1309_v3 = vpop.f32.mrf.mxu1 }
 0x1b3   : > { %2865 = vmatmul.bf16.vlgmr.msra.gmra.mxu2 %v4021_v56  ;;  %v1310_v18 = vadd.f32 %v1309_v3, %v1221_v63 }
 0x1b4   : > { %v2027_v40 = vpop.f32.mrf.mxu3 }
 0x1b5   : > { %v5238_v49 = vadd.f32 %v2116_v5, %v2027_v40  ;;  %v4040_v5 = vld [vmem:[#allocation3 + $0x50] sm:$0xf] }
 0x1b6   : > { %v1396_v35 = vpop.f32.mrf.mxu2 }
 0x1b7   : > { %v1397_v26 = vadd.f32 %v1396_v35, %v1308_v46  ;;  %v4041_v46 = vor.u32 %v4463_v39, %v4040_v5  ;;  %v3728_v5 = vld [vmem:[#allocation3 + $0x68] sm:$0xf]  ;;  %v4397_v39 = vld [vmem:[#allocation3 + $0x70] sm:$0xf0] }
 0x1b8   : > { %v2119_v53 = vpop.f32.mrf.mxu0  ;;  %v3729_v8 = vor.u32 %v4397_v39, %v3728_v5 }
 0x1b9   : > { %2954 = vmatmul.bf16.vlgmr.msra.gmra.mxu3 %v4025_v55  ;;  %1452 = vst [vmem:[%s4827_s5 + $0x80] sm:$0xff] %v1397_v26  ;;  %v4044_v26 = vld [vmem:[#allocation3 + $0x60] sm:$0xf] }
 0x1ba   : > { %v1312_v7 = vpop.f32.mrf.mxu1 }
 0x1bb   : > { %3043 = vmatmul.bf16.vlgmr.msra.gmra.mxu0 %v4029_v0  ;;  %v1313_v3 = vadd.f32 %v1312_v7, %v1224_v12 }
 0x1bc   : > { %v2030_v4 = vpop.f32.mrf.mxu3 }
 0x1bd   : > { %v5243_v41 = vadd.f32 %v2119_v53, %v2030_v4  ;;  %2172 = vmatmul.bf16.gmra.mxu1 %v3705_v1  ;;  %v4465_v53 = vld [vmem:[#allocation3 + $0x68] sm:$0xf0] }
 0x1be   : > { %v1398_v6 = vpop.f32.mrf.mxu2  ;;  %v4045_v16 = vor.u32 %v4465_v53, %v4044_v26 }
 0x1bf   : > { %v1399_v10 = vadd.f32 %v1398_v6, %v1310_v18  ;;  %v4464_v18 = vld [vmem:[#allocation3 + $0x64] sm:$0xf]  ;;  %v4046_v6 = vld [vmem:[#allocation3 + $0x6c] sm:$0xf0] }
 0x1c0   : > { %v2121_v51 = vpop.f32.mrf.mxu0  ;;  %v4049_v12 = vor.u32 %v4464_v18, %v4046_v6  ;;  %v4469_v18 = vld [vmem:[#allocation3 + $0x88] sm:$0xf0] }
 0x1c1   : > { %1453 = vst [vmem:[%s4827_s5 + $0x88] sm:$0xff] %v1399_v10 }
 0x1c2   : > { %v1314_v24 = vpop.f32.mrf.mxu1 }
 0x1c3   : > { %2870 = vmatmul.bf16.gmra.mxu2 %v4033_v22  ;;  %v1315_v7 = vadd.f32 %v1314_v24, %v1226_v31 }
 0x1c4   : > { %v2032_v56 = vpop.f32.mrf.mxu3 }
 0x1c5   : > { %v5248_v30 = vadd.f32 %v2121_v51, %v2032_v56  ;;  %v4052_v51 = vld [vmem:[#allocation3 + $0x68] sm:$0xf] }
 0x1c6   : > { %v1401_v40 = vpop.f32.mrf.mxu2 }
 0x1c7   : > { %v1402_v55 = vadd.f32 %v1401_v40, %v1313_v3  ;;  %v4053_v3 = vor.u32 %v4466_v28, %v4052_v51  ;;  %v3740_v51 = vld [vmem:[#allocation3 + $0x80] sm:$0xf]  ;;  %v4400_v28 = vld [vmem:[#allocation3 + $0x88] sm:$0xf0] }
 0x1c8   : > { %v2124_v35 = vpop.f32.mrf.mxu0  ;;  %v3741_v5 = vor.u32 %v4400_v28, %v3740_v51 }
 0x1c9   : > { %2959 = vmatmul.bf16.gmra.mxu3 %v4037_v33  ;;  %1454 = vst [vmem:[%s4827_s5 + $0x90] sm:$0xff] %v1402_v55  ;;  %v4056_v55 = vld [vmem:[#allocation3 + $0x78] sm:$0xf] }
 0x1ca   : > { %v1317_v52 = vpop.f32.mrf.mxu1 }
 0x1cb   : > { %3048 = vmatmul.bf16.gmra.mxu0 %v4041_v46  ;;  %v1318_v24 = vadd.f32 %v1317_v52, %v1229_v42 }
 0x1cc   : > { %v2035_v0 = vpop.f32.mrf.mxu3 }
 0x1cd   : > { %v5253_v1 = vadd.f32 %v2124_v35, %v2035_v0  ;;  %2177 = vmatmul.bf16.gmra.mxu1 %v3717_v21  ;;  %v4468_v35 = vld [vmem:[#allocation3 + $0x80] sm:$0xf0] }
 0x1ce   : > { %v1403_v63 = vpop.f32.mrf.mxu2  ;;  %v4057_v26 = vor.u32 %v4468_v35, %v4056_v55 }
 0x1cf   : > { %v1404_v4 = vadd.f32 %v1403_v63, %v1315_v7  ;;  %v4467_v7 = vld [vmem:[#allocation3 + $0x7c] sm:$0xf]  ;;  %v4058_v63 = vld [vmem:[#allocation3 + $0x84] sm:$0xf0] }
 0x1d0   : > { %v2126_v25 = vpop.f32.mrf.mxu0  ;;  %v4061_v42 = vor.u32 %v4467_v7, %v4058_v63  ;;  %v4472_v7 = vld [vmem:[#allocation3 + $0xa0] sm:$0xf0] }
 0x1d1   : > { %1455 = vst [vmem:[%s4827_s5 + $0x98] sm:$0xff] %v1404_v4 }
 0x1d2   : > { %v1319_v10 = vpop.f32.mrf.mxu1 }
 0x1d3   : > { %2875 = vmatmul.bf16.gmra.mxu2 %v4045_v16  ;;  %v1320_v52 = vadd.f32 %v1319_v10, %v1231_v61 }
 0x1d4   : > { %v2037_v22 = vpop.f32.mrf.mxu3 }
 0x1d5   : > { %v5258_v37 = vadd.f32 %v2126_v25, %v2037_v22  ;;  %v4064_v25 = vld [vmem:[#allocation3 + $0x80] sm:$0xf] }
 0x1d6   : > { %v1406_v56 = vpop.f32.mrf.mxu2 }
 0x1d7   : > { %v1407_v33 = vadd.f32 %v1406_v56, %v1318_v24  ;;  %v4065_v24 = vor.u32 %v4469_v18, %v4064_v25  ;;  %v3752_v25 = vld [vmem:[#allocation3 + $0x98] sm:$0xf]  ;;  %v4403_v18 = vld [vmem:[#allocation3 + $0xa0] sm:$0xf0] }
 0x1d8   : > { %v2129_v40 = vpop.f32.mrf.mxu0  ;;  %v3753_v51 = vor.u32 %v4403_v18, %v3752_v25 }
 0x1d9   : > { %2964 = vmatmul.bf16.gmra.mxu3 %v4049_v12  ;;  %1456 = vst [vmem:[%s4827_s5 + $0xa0] sm:$0xff] %v1407_v33  ;;  %v4068_v33 = vld [vmem:[#allocation3 + $0x90] sm:$0xf] }
 0x1da   : > { %v1322_v48 = vpop.f32.mrf.mxu1 }
 0x1db   : > { %3053 = vmatmul.bf16.gmra.mxu0 %v4053_v3  ;;  %v1323_v10 = vadd.f32 %v1322_v48, %v1234_v15 }
 0x1dc   : > { %v2040_v46 = vpop.f32.mrf.mxu3 }
 0x1dd   : > { %v5263_v21 = vadd.f32 %v2129_v40, %v2040_v46  ;;  %2182 = vmatmul.bf16.gmra.mxu1 %v3729_v8  ;;  %v4471_v40 = vld [vmem:[#allocation3 + $0x98] sm:$0xf0] }
 0x1de   : > { %v1408_v31 = vpop.f32.mrf.mxu2  ;;  %v4069_v55 = vor.u32 %v4471_v40, %v4068_v33 }
 0x1df   : > { %v1409_v0 = vadd.f32 %v1408_v31, %v1320_v52  ;;  %v4470_v52 = vld [vmem:[#allocation3 + $0x94] sm:$0xf]  ;;  %v4070_v31 = vld [vmem:[#allocation3 + $0x9c] sm:$0xf0] }
 0x1e0   : > { %v2131_v53 = vpop.f32.mrf.mxu0  ;;  %v4073_v15 = vor.u32 %v4470_v52, %v4070_v31  ;;  %v4475_v52 = vld [vmem:[#allocation3 + $0xb8] sm:$0xf0] }
 0x1e1   : > { %1457 = vst [vmem:[%s4827_s5 + $0xa8] sm:$0xff] %v1409_v0 }
 0x1e2   : > { %v1324_v4 = vpop.f32.mrf.mxu1 }
 0x1e3   : > { %2880 = vmatmul.bf16.gmra.mxu2 %v4057_v26  ;;  %v1325_v48 = vadd.f32 %v1324_v4, %v1236_v43 }
 0x1e4   : > { %v2042_v16 = vpop.f32.mrf.mxu3 }
 0x1e5   : > { %v5268_v6 = vadd.f32 %v2131_v53, %v2042_v16  ;;  %v4076_v53 = vld [vmem:[#allocation3 + $0x98] sm:$0xf] }
 0x1e6   : > { %v1411_v22 = vpop.f32.mrf.mxu2 }
 0x1e7   : > { %v1412_v12 = vadd.f32 %v1411_v22, %v1323_v10  ;;  %v4077_v10 = vor.u32 %v4472_v7, %v4076_v53  ;;  %v3764_v53 = vld [vmem:[#allocation3 + $0xb0] sm:$0xf]  ;;  %v4406_v7 = vld [vmem:[#allocation3 + $0xb8] sm:$0xf0] }
 0x1e8   : > { %v2134_v56 = vpop.f32.mrf.mxu0  ;;  %v3765_v25 = vor.u32 %v4406_v7, %v3764_v53 }
 0x1e9   : > { %2969 = vmatmul.bf16.gmra.mxu3 %v4061_v42  ;;  %1458 = vst [vmem:[%s4827_s5 + $0xb0] sm:$0xff] %v1412_v12  ;;  %v4080_v12 = vld [vmem:[#allocation3 + $0xa8] sm:$0xf] }
 0x1ea   : > { %v1327_v39 = vpop.f32.mrf.mxu1 }
 0x1eb   : > { %3058 = vmatmul.bf16.gmra.mxu0 %v4065_v24  ;;  %v1328_v4 = vadd.f32 %v1327_v39, %v1239_v54 }
 0x1ec   : > { %v2045_v3 = vpop.f32.mrf.mxu3 }
 0x1ed   : > { %v5273_v8 = vadd.f32 %v2134_v56, %v2045_v3  ;;  %2187 = vmatmul.bf16.gmra.mxu1 %v3741_v5  ;;  %v4474_v56 = vld [vmem:[#allocation3 + $0xb0] sm:$0xf0] }
 0x1ee   : > { %v1413_v61 = vpop.f32.mrf.mxu2  ;;  %v4081_v33 = vor.u32 %v4474_v56, %v4080_v12 }
 0x1ef   : > { %v1414_v46 = vadd.f32 %v1413_v61, %v1325_v48  ;;  %v4473_v48 = vld [vmem:[#allocation3 + $0xac] sm:$0xf]  ;;  %v4082_v61 = vld [vmem:[#allocation3 + $0xb4] sm:$0xf0] }
 0x1f0   : > { %v2136_v35 = vpop.f32.mrf.mxu0  ;;  %v4085_v54 = vor.u32 %v4473_v48, %v4082_v61  ;;  %v4478_v48 = vld [vmem:[#allocation3 + $0xd0] sm:$0xf0] }
 0x1f1   : > { %1459 = vst [vmem:[%s4827_s5 + $0xb8] sm:$0xff] %v1414_v46 }
 0x1f2   : > { %v1329_v0 = vpop.f32.mrf.mxu1 }
 0x1f3   : > { %2885 = vmatmul.bf16.gmra.mxu2 %v4069_v55  ;;  %v1330_v39 = vadd.f32 %v1329_v0, %v1241_v13 }
 0x1f4   : > { %v2047_v26 = vpop.f32.mrf.mxu3 }
 0x1f5   : > { %v5278_v63 = vadd.f32 %v2136_v35, %v2047_v26  ;;  %v4088_v35 = vld [vmem:[#allocation3 + $0xb0] sm:$0xf] }
 0x1f6   : > { %v1416_v16 = vpop.f32.mrf.mxu2 }
 0x1f7   : > { %v1417_v42 = vadd.f32 %v1416_v16, %v1328_v4  ;;  %v4089_v4 = vor.u32 %v4475_v52, %v4088_v35  ;;  %v3776_v35 = vld [vmem:[#allocation3 + $0xc8] sm:$0xf]  ;;  %v4409_v52 = vld [vmem:[#allocation3 + $0xd0] sm:$0xf0] }
 0x1f8   : > { %v2139_v22 = vpop.f32.mrf.mxu0  ;;  %v3777_v53 = vor.u32 %v4409_v52, %v3776_v35 }
 0x1f9   : > { %2974 = vmatmul.bf16.gmra.mxu3 %v4073_v15  ;;  %1460 = vst [vmem:[%s4827_s5 + $0xc0] sm:$0xff] %v1417_v42  ;;  %v4092_v42 = vld [vmem:[#allocation3 + $0xc0] sm:$0xf] }
 0x1fa   : > { %v1332_v28 = vpop.f32.mrf.mxu1 }
 0x1fb   : > { %3063 = vmatmul.bf16.gmra.mxu0 %v4077_v10  ;;  %v1333_v0 = vadd.f32 %v1332_v28, %v1244_v27 }
 0x1fc   : > { %v2050_v24 = vpop.f32.mrf.mxu3 }
 0x1fd   : > { %v5288_v5 = vadd.f32 %v2139_v22, %v2050_v24  ;;  %2192 = vmatmul.bf16.gmra.mxu1 %v3753_v51  ;;  %v4477_v22 = vld [vmem:[#allocation3 + $0xc8] sm:$0xf0] }
 0x1fe   : > { %v1418_v43 = vpop.f32.mrf.mxu2  ;;  %v4093_v12 = vor.u32 %v4477_v22, %v4092_v42 }
 0x1ff   : > { %v1419_v3 = vadd.f32 %v1418_v43, %v1330_v39  ;;  %v4476_v39 = vld [vmem:[#allocation3 + $0xc4] sm:$0xf]  ;;  %v4094_v43 = vld [vmem:[#allocation3 + $0xcc] sm:$0xf0] }
 0x200   : > { %v2141_v40 = vpop.f32.mrf.mxu0  ;;  %v4097_v27 = vor.u32 %v4476_v39, %v4094_v43  ;;  %v4481_v39 = vld [vmem:[#allocation3 + $0xe8] sm:$0xf0] }
 0x201   : > { %1461 = vst [vmem:[%s4827_s5 + $0xc8] sm:$0xff] %v1419_v3 }
 0x202   : > { %v1334_v46 = vpop.f32.mrf.mxu1 }
 0x203   : > { %2890 = vmatmul.bf16.gmra.mxu2 %v4081_v33  ;;  %v1335_v28 = vadd.f32 %v1334_v46, %v1246_v38 }
 0x204   : > { %v2052_v55 = vpop.f32.mrf.mxu3 }
 0x205   : > { %v5293_v31 = vadd.f32 %v2141_v40, %v2052_v55  ;;  %v4100_v40 = vld [vmem:[#allocation3 + $0xc8] sm:$0xf] }
 0x206   : > { %v1421_v26 = vpop.f32.mrf.mxu2 }
 0x207   : > { %v1422_v15 = vadd.f32 %v1421_v26, %v1333_v0  ;;  %v4101_v0 = vor.u32 %v4478_v48, %v4100_v40  ;;  %v3788_v40 = vld [vmem:[#allocation3 + $0xe0] sm:$0xf]  ;;  %v4412_v48 = vld [vmem:[#allocation3 + $0xe8] sm:$0xf0] }
 0x208   : > { %v2144_v16 = vpop.f32.mrf.mxu0  ;;  %v3789_v35 = vor.u32 %v4412_v48, %v3788_v40  ;;  %v4128_v40 = vld [vmem:[#allocation3 + $0x108] sm:$0xf]  ;;  %v4486_v48 = vld [vmem:[#allocation3 + $0x110] sm:$0xf0] }
 0x209   : > { %2979 = vmatmul.bf16.gmra.mxu3 %v4085_v54  ;;  %1462 = vst [vmem:[%s4827_s5 + $0xd0] sm:$0xff] %v1422_v15  ;;  %v4104_v15 = vld [vmem:[#allocation3 + $0xd8] sm:$0xf] }
 0x20a   : > { %v1337_v18 = vpop.f32.mrf.mxu1 }
 0x20b   : > { %3068 = vmatmul.bf16.gmra.mxu0 %v4089_v4  ;;  %v1338_v46 = vadd.f32 %v1337_v18, %v1249_v57 }
 0x20c   : > { %v2055_v10 = vpop.f32.mrf.mxu3 }
 0x20d   : > { %v5298_v51 = vadd.f32 %v2144_v16, %v2055_v10  ;;  %2197 = vmatmul.bf16.gmra.mxu1 %v3765_v25  ;;  %v4480_v16 = vld [vmem:[#allocation3 + $0xe0] sm:$0xf0] }
 0x20e   : > { %v1423_v13 = vpop.f32.mrf.mxu2  ;;  %v4105_v42 = vor.u32 %v4480_v16, %v4104_v15 }
 0x20f   : > { %v1424_v24 = vadd.f32 %v1423_v13, %v1335_v28  ;;  %v4479_v28 = vld [vmem:[#allocation3 + $0xdc] sm:$0xf]  ;;  %v4106_v13 = vld [vmem:[#allocation3 + $0xe4] sm:$0xf0] }
 0x210   : > { %v2146_v56 = vpop.f32.mrf.mxu0  ;;  %v4109_v57 = vor.u32 %v4479_v28, %v4106_v13 }
 0x211   : > { %1463 = vst [vmem:[%s4827_s5 + $0xd8] sm:$0xff] %v1424_v24 }
 0x212   : > { %v1339_v3 = vpop.f32.mrf.mxu1 }
 0x213   : > { %2895 = vmatmul.bf16.gmra.mxu2 %v4093_v12  ;;  %v1340_v18 = vadd.f32 %v1339_v3, %v1251_v11 }
 0x214   : > { %v2057_v33 = vpop.f32.mrf.mxu3 }
 0x215   : > { %v5303_v61 = vadd.f32 %v2146_v56, %v2057_v33  ;;  %v4112_v56 = vld [vmem:[#allocation3 + $0xe0] sm:$0xf] }
 0x216   : > { %v1426_v55 = vpop.f32.mrf.mxu2 }
 0x217   : > { %v1427_v54 = vadd.f32 %v1426_v55, %v1338_v46  ;;  %v4113_v46 = vor.u32 %v4481_v39, %v4112_v56 }
 0x218   : > { %v2149_v26 = vpop.f32.mrf.mxu0 }
 0x219   : > { %2984 = vmatmul.bf16.gmra.mxu3 %v4097_v27  ;;  %1464 = vst [vmem:[%s4827_s5 + $0xe0] sm:$0xff] %v1427_v54  ;;  %v4116_v54 = vld [vmem:[#allocation3 + $0xf0] sm:$0xf] }
 0x21a   : > { %v1342_v7 = vpop.f32.mrf.mxu1 }
 0x21b   : > { %3073 = vmatmul.bf16.gmra.mxu0 %v4101_v0  ;;  %v1343_v3 = vadd.f32 %v1342_v7, %v1254_v34  ;;  %v3800_v34 = vld [vmem:[#allocation3 + $0xf8] sm:$0xf] }
 0x21c   : > { %v2060_v4 = vpop.f32.mrf.mxu3 }
 0x21d   : > { %v5308_v25 = vadd.f32 %v2149_v26, %v2060_v4  ;;  %2202 = vmatmul.bf16.gmra.mxu1 %v3777_v53  ;;  %v4483_v26 = vld [vmem:[#allocation3 + $0xf8] sm:$0xf0] }
 0x21e   : > { %v1428_v38 = vpop.f32.mrf.mxu2  ;;  %v4117_v15 = vor.u32 %v4483_v26, %v4116_v54 }
 0x21f   : > { %v1429_v10 = vadd.f32 %v1428_v38, %v1340_v18  ;;  %v4482_v18 = vld [vmem:[#allocation3 + $0xf4] sm:$0xf]  ;;  %v4118_v38 = vld [vmem:[#allocation3 + $0xfc] sm:$0xf0] }
 0x220   : > { %v2151_v22 = vpop.f32.mrf.mxu0  ;;  %v4121_v28 = vor.u32 %v4482_v18, %v4118_v38 }
 0x221   : > { %1465 = vst [vmem:[%s4827_s5 + $0xe8] sm:$0xff] %v1429_v10 }
 0x222   : > { %v1344_v24 = vpop.f32.mrf.mxu1 }
 0x223   : > { %2900 = vmatmul.bf16.gmra.mxu2 %v4105_v42  ;;  %v1345_v7 = vadd.f32 %v1344_v24, %v1256_v50  ;;  %v4415_v24 = vld [vmem:[#allocation3 + $0x100] sm:$0xf0] }
 0x224   : > { %v2062_v12 = vpop.f32.mrf.mxu3  ;;  %v3801_v39 = vor.u32 %v4415_v24, %v3800_v34 }
 0x225   : > { %v5313_v43 = vadd.f32 %v2151_v22, %v2062_v12  ;;  %v4124_v22 = vld [vmem:[#allocation3 + $0xf8] sm:$0xf] }
 0x226   : > { %v1431_v33 = vpop.f32.mrf.mxu2  ;;  %v4125_v12 = vor.u32 %v4484_v19, %v4124_v22  ;;  %v3812_v19 = vld [vmem:[#allocation3 + $0x110] sm:$0xf] }
 0x227   : > { %v1432_v27 = vadd.f32 %v1431_v33, %v1343_v3 }
 0x228   : > { %v2154_v55 = vpop.f32.mrf.mxu0 }
 0x229   : > { %2989 = vmatmul.bf16.gmra.mxu3 %v4109_v57  ;;  %1466 = vst [vmem:[%s4827_s5 + $0xf0] sm:$0xff] %v1432_v27  ;;  %v2248_v27 = vld [vmem:[%s4827_s5] sm:$0xff] }
 0x22a   : > { %v2168_v52 = vpop.f32.mrf.mxu1 }
 0x22b   : > { %3078 = vmatmul.bf16.gmra.mxu0 %v4113_v46  ;;  %v2169_v57 = vadd.f32 %v2168_v52, %v5136_v58 }
 0x22c   : > { %v2065_v0 = vpop.f32.mrf.mxu3 }
 0x22d   : > { %v5318_v53 = vadd.f32 %v2154_v55, %v2065_v0  ;;  %2207 = vmatmul.bf16.gmra.mxu1 %v3789_v35  ;;  %v2280_v35 = vadd.f32 %v2248_v27, %v2169_v57  ;;  %v4129_v0 = vor.u32 %v4486_v48, %v4128_v40  ;;  %v4489_v40 = vld [vmem:[#allocation3 + $0x128] sm:$0xf0] }
 0x22e   : > { %v1433_v11 = vpop.f32.mrf.mxu2 }
 0x22f   : > { %v1434_v4 = vadd.f32 %v1433_v11, %v1345_v7  ;;  %v4485_v7 = vld [vmem:[#allocation3 + $0x10c] sm:$0xf]  ;;  %v4130_v11 = vld [vmem:[#allocation3 + $0x114] sm:$0xf0] }
 0x230   : > { %v2156_v16 = vpop.f32.mrf.mxu0  ;;  %v4133_v38 = vor.u32 %v4485_v7, %v4130_v11  ;;  %v4142_v7 = vld [vmem:[#allocation3 + $0x12c] sm:$0xf0] }
 0x231   : > { %1467 = vst [vmem:[%s4827_s5 + $0xf8] sm:$0xff] %v1434_v4 }
 0x232   : > { %v2170_v10 = vpop.f32.mrf.mxu1 }
 0x233   : > { %2905 = vmatmul.bf16.gmra.mxu2 %v4117_v15  ;;  %v2171_v58 = vadd.f32 %v2170_v10, %v5144_v36  ;;  %v4136_v15 = vld [vmem:[#allocation3 + $0x110] sm:$0xf] }
 0x234   : > { %v2067_v42 = vpop.f32.mrf.mxu3 }
 0x235   : > { %v5321_v9 = vadd.f32 %v2156_v16, %v2067_v42  ;;  %v4487_v16 = vld [vmem:[#allocation3 + $0x118] sm:$0xf0] }
 0x236   : > { %v2866_v13 = vpop.f32.mrf.mxu2  ;;  %v2249_v42 = vld [vmem:[%s4827_s5 + $0x8] sm:$0xff]  ;;  %v4137_v24 = vor.u32 %v4487_v16, %v4136_v15 }
 0x238   : > { %v3044_v56 = vpop.f32.mrf.mxu0 }
 0x239   : > { %2994 = vmatmul.bf16.gmra.mxu3 %v4121_v28  ;;  %v4418_v28 = vld [vmem:[#allocation3 + $0x118] sm:$0xf0] }
 0x23a   : > { %v2173_v3 = vpop.f32.mrf.mxu1 }
 0x23b   : > { %3083 = vmatmul.bf16.gmra.mxu0 %v4125_v12  ;;  %v2174_v10 = vadd.f32 %v2173_v3, %v5149_v62 }
 0x23c   : > { %v2955_v33 = vpop.f32.mrf.mxu3 }
 0x23d   : > { %v2956_v46 = vadd.f32 %v2955_v33, %v2866_v13  ;;  %2212 = vmatmul.bf16.gmra.mxu1 %v3801_v39  ;;  %v2281_v13 = vadd.f32 %v2249_v42, %v2171_v58  ;;  %v3813_v39 = vor.u32 %v4418_v28, %v3812_v19  ;;  %v4140_v33 = vld [vmem:[#allocation3 + $0x120] sm:$0xf]  ;;  %v4148_v58 = vld [vmem:[#allocation3 + $0x128] sm:$0xf] }
 0x23e   : > { %v2868_v55 = vpop.f32.mrf.mxu2  ;;  %v3824_v42 = vld [vmem:[#allocation3 + $0x128] sm:$0xf] }
 0x23f   : > { %v3045_v50 = vadd.f32 %v3044_v56, %v2956_v46  ;;  %v2250_v46 = vld [vmem:[%s4827_s5 + $0x10] sm:$0xff] }
 0x240   : > { %v3046_v54 = vpop.f32.mrf.mxu0 }
 0x241   : > { %v3156_v26 = vadd.f32 %v3045_v50, %v2280_v35  ;;  %v4141_v50 = vor.u32 %v4489_v40, %v4140_v33  ;;  %v2252_v33 = vld [vmem:[%s4827_s5 + $0x20] sm:$0xff] }
 0x242   : > { %v2175_v4 = vpop.f32.mrf.mxu1 }
 0x243   : > { %3188 = vst [vmem:[%s4827_s5] sm:$0xff] %v3156_v26  ;;  %2910 = vmatmul.bf16.gmra.mxu2 %v4129_v0  ;;  %v4488_v26 = vld [vmem:[#allocation3 + $0x124] sm:$0xf]  ;;  %v2176_v62 = vadd.f32 %v2175_v4, %v5154_v44 }
 0x244   : > { %v2957_v52 = vpop.f32.mrf.mxu3  ;;  %v4145_v16 = vor.u32 %v4488_v26, %v4142_v7  ;;  %v4160_v26 = vld [vmem:[#allocation3 + $0x140] sm:$0xf]  ;;  %v4493_v7 = vld [vmem:[#allocation3 + $0x148] sm:$0xf0] }
 0x245   : > { %v2958_v18 = vadd.f32 %v2957_v52, %v2868_v55  ;;  %v2282_v55 = vadd.f32 %v2250_v46, %v2174_v10  ;;  %v4490_v52 = vld [vmem:[#allocation3 + $0x130] sm:$0xf0]  ;;  %v4492_v10 = vld [vmem:[#allocation3 + $0x140] sm:$0xf0] }
 0x246   : > { %v2871_v22 = vpop.f32.mrf.mxu2 }
 0x247   : > { %v3047_v34 = vadd.f32 %v3046_v54, %v2958_v18  ;;  %v2251_v18 = vld [vmem:[%s4827_s5 + $0x18] sm:$0xff] }
 0x248   : > { %v3049_v12 = vpop.f32.mrf.mxu0  ;;  %v2283_v19 = vadd.f32 %v2251_v18, %v2176_v62 }
 0x249   : > { %v3157_v56 = vadd.f32 %v3047_v34, %v2281_v13  ;;  %2999 = vmatmul.bf16.gmra.mxu3 %v4133_v38  ;;  %v4149_v13 = vor.u32 %v4490_v52, %v4148_v58  ;;  %v2253_v58 = vld [vmem:[%s4827_s5 + $0x28] sm:$0xff] }
 0x24a   : > { %v2178_v36 = vpop.f32.mrf.mxu1 }
 0x24b   : > { %3189 = vst [vmem:[%s4827_s5 + $0x8] sm:$0xff] %v3157_v56  ;;  %3088 = vmatmul.bf16.gmra.mxu0 %v4137_v24  ;;  %v2179_v4 = vadd.f32 %v2178_v36, %v5168_v14 }
 0x24c   : > { %v2960_v57 = vpop.f32.mrf.mxu3 }
 0x24d   : > { %v2961_v48 = vadd.f32 %v2960_v57, %v2871_v22  ;;  %2217 = vmatmul.bf16.gmra.mxu1 %v3813_v39  ;;  %v4421_v22 = vld [vmem:[#allocation3 + $0x130] sm:$0xf0]  ;;  %v4152_v39 = vld [vmem:[#allocation3 + $0x138] sm:$0xf] }
 0x24e   : > { %v2873_v27 = vpop.f32.mrf.mxu2 }
 0x24f   : > { %v3050_v35 = vadd.f32 %v3049_v12, %v2961_v48  ;;  %v3825_v12 = vor.u32 %v4421_v22, %v3824_v42  ;;  %v2284_v48 = vadd.f32 %v2252_v33, %v2179_v4  ;;  %v4161_v42 = vor.u32 %v4493_v7, %v4160_v26  ;;  %v2254_v4 = vld [vmem:[%s4827_s5 + $0x30] sm:$0xff] }
 0x250   : > { %v3051_v0 = vpop.f32.mrf.mxu0 }
 0x251   : > { %v3158_v54 = vadd.f32 %v3050_v35, %v2282_v55 }
 0x252   : > { %v2180_v11 = vpop.f32.mrf.mxu1 }
 0x253   : > { %3190 = vst [vmem:[%s4827_s5 + $0x10] sm:$0xff] %v3158_v54  ;;  %2915 = vmatmul.bf16.gmra.mxu2 %v4141_v50  ;;  %v4491_v50 = vld [vmem:[#allocation3 + $0x13c] sm:$0xf]  ;;  %v2181_v14 = vadd.f32 %v2180_v11, %v5176_v59 }
 0x254   : > { %v2962_v3 = vpop.f32.mrf.mxu3 }
 0x255   : > { %v2963_v15 = vadd.f32 %v2962_v3, %v2873_v27  ;;  %v4153_v27 = vor.u32 %v4492_v10, %v4152_v39  ;;  %v2285_v18 = vadd.f32 %v2253_v58, %v2181_v14  ;;  %v577_v10 = vld [vmem:[#allocation2 + $0x182] sm:$0xff] }
 0x256   : > { %v2876_v38 = vpop.f32.mrf.mxu2  ;;  %v4172_v14 = vld [vmem:[#allocation3 + $0x158] sm:$0xf] }
 0x257   : > { %v3052_v28 = vadd.f32 %v3051_v0, %v2963_v15  ;;  %v4154_v0 = vld [vmem:[#allocation3 + $0x144] sm:$0xf0]  ;;  %v3836_v15 = vld [vmem:[#allocation3 + $0x140] sm:$0xf]  ;;  %v3848_v58 = vld [vmem:[#allocation3 + $0x158] sm:$0xf] }
 0x258   : > { %v3054_v34 = vpop.f32.mrf.mxu0  ;;  %v4157_v3 = vor.u32 %v4491_v50, %v4154_v0 }
 0x259   : > { %v3159_v24 = vadd.f32 %v3052_v28, %v2283_v19  ;;  %3004 = vmatmul.bf16.gmra.mxu3 %v4145_v16  ;;  %v4424_v16 = vld [vmem:[#allocation3 + $0x148] sm:$0xf0] }
 0x25a   : > { %v2183_v44 = vpop.f32.mrf.mxu1  ;;  %v3837_v28 = vor.u32 %v4424_v16, %v3836_v15 }
 0x25b   : > { %3191 = vst [vmem:[%s4827_s5 + $0x18] sm:$0xff] %v3159_v24  ;;  %3093 = vmatmul.bf16.gmra.mxu0 %v4149_v13  ;;  %v2184_v11 = vadd.f32 %v2183_v44, %v5181_v20  ;;  %v4164_v13 = vld [vmem:[#allocation3 + $0x150] sm:$0xf]  ;;  %v4494_v20 = vld [vmem:[#allocation3 + $0x154] sm:$0xf] }
 0x25c   : > { %v2965_v56 = vpop.f32.mrf.mxu3  ;;  %v4166_v44 = vld [vmem:[#allocation3 + $0x15c] sm:$0xf0] }
 0x25d   : > { %v2966_v57 = vadd.f32 %v2965_v56, %v2876_v38  ;;  %2222 = vmatmul.bf16.gmra.mxu1 %v3825_v12  ;;  %v2286_v33 = vadd.f32 %v2254_v4, %v2184_v11  ;;  %v4169_v7 = vor.u32 %v4494_v20, %v4166_v44  ;;  %v4498_v11 = vld [vmem:[#allocation3 + $0x170] sm:$0xf0]  ;;  %v4178_v20 = vld [vmem:[#allocation3 + $0x174] sm:$0xf0] }
 0x25e   : > { %v2878_v40 = vpop.f32.mrf.mxu2  ;;  %v472_v4 = vld [vmem:[#allocation2 + $0x1a1] sm:$0xff] }
 0x25f   : > { %v3055_v46 = vadd.f32 %v3054_v34, %v2966_v57  ;;  %v4495_v34 = vld [vmem:[#allocation3 + $0x158] sm:$0xf0] }
 0x260   : > { %v3056_v55 = vpop.f32.mrf.mxu0  ;;  %v4165_v39 = vor.u32 %v4495_v34, %v4164_v13  ;;  %v578_v57 = vld [vmem:[#allocation2 + $0x18a] sm:$0xff]  ;;  %v2256_v34 = vld [vmem:[%s4827_s5 + $0x40] sm:$0xff] }
 0x261   : > { %v3160_v35 = vadd.f32 %v3055_v46, %v2284_v48  ;;  %v613_v48 = vpack.c.bf16 %v577_v10, %v577_v10  ;;  %v614_v46 = vpack.c.bf16 %v578_v57, %v578_v57  ;;  %v4615_v57 = vld [vmem:[#allocation2 + $0x8] sm:$0xff] }
 0x262   : > { %v2185_v54 = vpop.f32.mrf.mxu1 }
 0x263   : > { %3192 = vst [vmem:[%s4827_s5 + $0x20] sm:$0xff] %v3160_v35  ;;  %2920 = vmatmul.bf16.gmra.mxu2 %v4153_v27  ;;  %v2186_v50 = vadd.f32 %v2185_v54, %v5186_v60 }
 0x264   : > { %v2967_v36 = vpop.f32.mrf.mxu3  ;;  %649 = vst [vmem:[#allocation3 + $0x188] sm:$0xf] %v613_v48 }
 0x265   : > { %v2968_v62 = vadd.f32 %v2967_v36, %v2878_v40  ;;  %650 = vst [vmem:[#allocation3 + $0x194] sm:$0xf] %v614_v46  ;;  %v4496_v36 = vld [vmem:[#allocation3 + $0x160] sm:$0xf0] }
 0x266   : > { %v2881_v52 = vpop.f32.mrf.mxu2 }
 0x267   : > { %v3057_v38 = vadd.f32 %v3056_v55, %v2968_v62  ;;  %v2255_v62 = vld [vmem:[%s4827_s5 + $0x38] sm:$0xff] }
 0x268   : > { %v3059_v22 = vpop.f32.mrf.mxu0  ;;  %v2287_v15 = vadd.f32 %v2255_v62, %v2186_v50  ;;  %v2257_v62 = vld [vmem:[%s4827_s5 + $0x48] sm:$0xff] }
 0x269   : > { %v3161_v19 = vadd.f32 %v3057_v38, %v2285_v18  ;;  %3009 = vmatmul.bf16.gmra.mxu3 %v4157_v3  ;;  %v4173_v18 = vor.u32 %v4496_v36, %v4172_v14 }
 0x26a   : > { %v2188_v59 = vpop.f32.mrf.mxu1 }
 0x26b   : > { %3193 = vst [vmem:[%s4827_s5 + $0x28] sm:$0xff] %v3161_v19  ;;  %3098 = vmatmul.bf16.gmra.mxu0 %v4161_v42  ;;  %v2189_v54 = vadd.f32 %v2188_v59, %v5200_v29  ;;  %v580_v29 = vld [vmem:[#allocation2 + $0x1a2] sm:$0xff] }
 0x26c   : > { %v2970_v24 = vpop.f32.mrf.mxu3  ;;  %v616_v14 = vpack.c.bf16 %v580_v29, %v580_v29  ;;  %v4502_v29 = vld [vmem:[#allocation3 + $0x190] sm:$0xf0] }
 0x26d   : > { %v2971_v12 = vadd.f32 %v2970_v24, %v2881_v52  ;;  %2227 = vmatmul.bf16.gmra.mxu1 %v3837_v28  ;;  %v4427_v52 = vld [vmem:[#allocation3 + $0x160] sm:$0xf0]  ;;  %v4176_v28 = vld [vmem:[#allocation3 + $0x168] sm:$0xf] }
 0x26e   : > { %v2883_v56 = vpop.f32.mrf.mxu2  ;;  %v4177_v10 = vor.u32 %v4498_v11, %v4176_v28  ;;  %652 = vst [vmem:[#allocation3 + $0x1ac] sm:$0xf] %v616_v14  ;;  %v4188_v11 = vld [vmem:[#allocation3 + $0x180] sm:$0xf] }
 0x26f   : > { %v3060_v40 = vadd.f32 %v3059_v22, %v2971_v12  ;;  %v3849_v22 = vor.u32 %v4427_v52, %v3848_v58  ;;  %v471_v12 = vld [vmem:[#allocation2 + $0x199] sm:$0xff] }
 0x270   : > { %v3061_v27 = vpop.f32.mrf.mxu0  ;;  %v507_v46 = vpack.c.bf16 %v471_v12, %v471_v12 }
 0x271   : > { %v3162_v55 = vadd.f32 %v3060_v40, %v2286_v33  ;;  %v399_v33 = vpack.c.bf16 %v4615_v57, %v4615_v57  ;;  %v579_v40 = vld [vmem:[#allocation2 + $0x19a] sm:$0xff] }
 0x272   : > { %v2190_v35 = vpop.f32.mrf.mxu1  ;;  %v615_v50 = vpack.c.bf16 %v579_v40, %v579_v40  ;;  %543 = vst [vmem:[#allocation3 + $0x19c] sm:$0xf] %v507_v46  ;;  %v4190_v40 = vld [vmem:[#allocation3 + $0x18c] sm:$0xf0]  ;;  %v4196_v46 = vld [vmem:[#allocation3 + $0x188] sm:$0xf] }
 0x273   : > { %3194 = vst [vmem:[%s4827_s5 + $0x30] sm:$0xff] %v3162_v55  ;;  %2925 = vmatmul.bf16.gmra.mxu2 %v4165_v39  ;;  %v4497_v55 = vld [vmem:[#allocation3 + $0x16c] sm:$0xf] }
 0x274   : > { %v2972_v0 = vpop.f32.mrf.mxu3  ;;  %435 = vst [vmem:[#allocation3 + $0x198] sm:$0xf] %v399_v33  ;;  %v4181_v58 = vor.u32 %v4497_v55, %v4178_v20  ;;  %v2259_v55 = vld [vmem:[%s4827_s5 + $0x58] sm:$0xff] }
 0x275   : > { %v2973_v26 = vadd.f32 %v2972_v0, %v2883_v56  ;;  %v2288_v56 = vadd.f32 %v2256_v34, %v2189_v54  ;;  %436 = vst [vmem:[#allocation3 + $0x1a4] sm:$0xf] %v399_v33  ;;  %v2191_v0 = vadd.f32 %v2190_v35, %v5208_v17  ;;  %v4500_v33 = vld [vmem:[#allocation3 + $0x184] sm:$0xf] }
 0x276   : > { %v2886_v3 = vpop.f32.mrf.mxu2  ;;  %651 = vst [vmem:[#allocation3 + $0x1a0] sm:$0xf] %v615_v50  ;;  %v3872_v50 = vld [vmem:[#allocation3 + $0x188] sm:$0xf] }
 0x277   : > { %v3062_v16 = vadd.f32 %v3061_v27, %v2973_v26  ;;  %v508_v27 = vpack.c.bf16 %v472_v4, %v472_v4  ;;  %v4184_v26 = vld [vmem:[#allocation3 + $0x170] sm:$0xf] }
 0x278   : > { %v3064_v38 = vpop.f32.mrf.mxu0 }
 0x279   : > { %v3163_v42 = vadd.f32 %v3062_v16, %v2287_v15  ;;  %3014 = vmatmul.bf16.gmra.mxu3 %v4169_v7  ;;  %v4499_v7 = vld [vmem:[#allocation3 + $0x178] sm:$0xf0]  ;;  %544 = vst [vmem:[#allocation3 + $0x1a8] sm:$0xf] %v508_v27  ;;  %v3860_v15 = vld [vmem:[#allocation3 + $0x170] sm:$0xf]  ;;  %v4193_v27 = vor.u32 %v4500_v33, %v4190_v40 }
 0x27a   : > { %v2193_v60 = vpop.f32.mrf.mxu1  ;;  %v4430_v16 = vld [vmem:[#allocation3 + $0x178] sm:$0xf0] }
 0x27b   : > { %3195 = vst [vmem:[%s4827_s5 + $0x38] sm:$0xff] %v3163_v42  ;;  %3103 = vmatmul.bf16.gmra.mxu0 %v4173_v18  ;;  %v2289_v18 = vadd.f32 %v2257_v62, %v2191_v0  ;;  %v4185_v42 = vor.u32 %v4499_v7, %v4184_v26  ;;  %v4433_v0 = vld [vmem:[#allocation3 + $0x190] sm:$0xf0]  ;;  %v4197_v26 = vor.u32 %v4502_v29, %v4196_v46  ;;  %v2262_v29 = vld [vmem:[%s4827_s5 + $0x70] sm:$0xff] }
 0x27c   : > { %v2975_v19 = vpop.f32.mrf.mxu3 }
 0x27d   : > { %v2976_v13 = vadd.f32 %v2975_v19, %v2886_v3  ;;  %2232 = vmatmul.bf16.gmra.mxu1 %v3849_v22  ;;  %v3861_v22 = vor.u32 %v4430_v16, %v3860_v15  ;;  %v2194_v19 = vadd.f32 %v2193_v60, %v5213_v45  ;;  %v4504_v15 = vld [vmem:[#allocation3 + $0x1a0] sm:$0xf0] }
 0x27e   : > { %v2888_v24 = vpop.f32.mrf.mxu2 }
 0x27f   : > { %v3065_v39 = vadd.f32 %v3064_v38, %v2976_v13  ;;  %v4501_v13 = vld [vmem:[#allocation3 + $0x188] sm:$0xf0] }
 0x280   : > { %v3066_v48 = vpop.f32.mrf.mxu0 }
 0x281   : > { %v3164_v59 = vadd.f32 %v3065_v39, %v2288_v56  ;;  %v4189_v39 = vor.u32 %v4501_v13, %v4188_v11  ;;  %v4202_v11 = vld [vmem:[#allocation3 + $0x1a4] sm:$0xf0] }
 0x282   : > { %v2195_v44 = vpop.f32.mrf.mxu1 }
 0x283   : > { %3196 = vst [vmem:[%s4827_s5 + $0x40] sm:$0xff] %v3164_v59  ;;  %2930 = vmatmul.bf16.gmra.mxu2 %v4177_v10  ;;  %v2196_v45 = vadd.f32 %v2195_v44, %v5218_v47 }
 0x284   : > { %v2977_v36 = vpop.f32.mrf.mxu3 }
 0x285   : > { %v2978_v3 = vadd.f32 %v2977_v36, %v2888_v24  ;;  %v2258_v24 = vld [vmem:[%s4827_s5 + $0x50] sm:$0xff]  ;;  %v2291_v14 = vadd.f32 %v2259_v55, %v2196_v45 }
 0x286   : > { %v2891_v52 = vpop.f32.mrf.mxu2  ;;  %v2290_v4 = vadd.f32 %v2258_v24, %v2194_v19  ;;  %v4505_v24 = vld [vmem:[#allocation3 + $0x1a8] sm:$0xf0] }
 0x287   : > { %v3067_v38 = vadd.f32 %v3066_v48, %v2978_v3  ;;  %v3873_v3 = vor.u32 %v4433_v0, %v3872_v50 }
 0x288   : > { %v3069_v17 = vpop.f32.mrf.mxu0 }
 0x289   : > { %v3165_v35 = vadd.f32 %v3067_v38, %v2289_v18  ;;  %3019 = vmatmul.bf16.gmra.mxu3 %v4181_v58  ;;  %v2260_v18 = vld [vmem:[%s4827_s5 + $0x60] sm:$0xff] }
 0x28a   : > { %v2198_v54 = vpop.f32.mrf.mxu1 }
 0x28b   : > { %3197 = vst [vmem:[%s4827_s5 + $0x48] sm:$0xff] %v3165_v35  ;;  %3108 = vmatmul.bf16.gmra.mxu0 %v4185_v42  ;;  %v2199_v44 = vadd.f32 %v2198_v54, %v5223_v32 }
 0x28c   : > { %v2980_v28 = vpop.f32.mrf.mxu3 }
 0x28d   : > { %v2981_v34 = vadd.f32 %v2980_v28, %v2891_v52  ;;  %2237 = vmatmul.bf16.gmra.mxu1 %v3861_v22  ;;  %v4200_v52 = vld [vmem:[#allocation3 + $0x198] sm:$0xf]  ;;  %v2292_v42 = vadd.f32 %v2260_v18, %v2199_v44  ;;  %v4503_v28 = vld [vmem:[#allocation3 + $0x19c] sm:$0xf]  ;;  %v2264_v18 = vld [vmem:[%s4827_s5 + $0x80] sm:$0xff] }
 0x28e   : > { %v2893_v12 = vpop.f32.mrf.mxu2  ;;  %v4201_v35 = vor.u32 %v4504_v15, %v4200_v52 }
 0x28f   : > { %v3070_v56 = vadd.f32 %v3069_v17, %v2981_v34  ;;  %v4208_v34 = vld [vmem:[#allocation3 + $0x1a0] sm:$0xf] }
 0x290   : > { %v3071_v10 = vpop.f32.mrf.mxu0  ;;  %v4209_v33 = vor.u32 %v4505_v24, %v4208_v34 }
 0x291   : > { %v3166_v57 = vadd.f32 %v3070_v56, %v2290_v4  ;;  %v4205_v4 = vor.u32 %v4503_v28, %v4202_v11  ;;  %v2261_v56 = vld [vmem:[%s4827_s5 + $0x68] sm:$0xff] }
 0x292   : > { %v2200_v48 = vpop.f32.mrf.mxu1 }
 0x293   : > { %3198 = vst [vmem:[%s4827_s5 + $0x50] sm:$0xff] %v3166_v57  ;;  %2935 = vmatmul.bf16.gmra.mxu2 %v4189_v39  ;;  %v2201_v32 = vadd.f32 %v2200_v48, %v5228_v2 }
 0x294   : > { %v2982_v60 = vpop.f32.mrf.mxu3 }
 0x295   : > { %v2983_v59 = vadd.f32 %v2982_v60, %v2893_v12 }
 0x296   : > { %v2896_v20 = vpop.f32.mrf.mxu2 }
 0x297   : > { %v3072_v36 = vadd.f32 %v3071_v10, %v2983_v59  ;;  %v2293_v10 = vadd.f32 %v2261_v56, %v2201_v32 }
 0x298   : > { %v3074_v7 = vpop.f32.mrf.mxu0 }
 0x299   : > { %v3167_v62 = vadd.f32 %v3072_v36, %v2291_v14  ;;  %3024 = vmatmul.bf16.gmra.mxu3 %v4193_v27 }
 0x29a   : > { %v2203_v47 = vpop.f32.mrf.mxu1 }
 0x29b   : > { %3199 = vst [vmem:[%s4827_s5 + $0x58] sm:$0xff] %v3167_v62  ;;  %3113 = vmatmul.bf16.gmra.mxu0 %v4197_v26  ;;  %v2204_v2 = vadd.f32 %v2203_v47, %v5233_v23 }
 0x29c   : > { %v2985_v58 = vpop.f32.mrf.mxu3 }
 0x29d   : > { %v2986_v16 = vadd.f32 %v2985_v58, %v2896_v20  ;;  %2242 = vmatmul.bf16.gmra.mxu1 %v3873_v3  ;;  %v2294_v27 = vadd.f32 %v2262_v29, %v2204_v2  ;;  %v2267_v29 = vld [vmem:[%s4827_s5 + $0x98] sm:$0xff] }
 0x29e   : > { %v2898_v38 = vpop.f32.mrf.mxu2 }
 0x29f   : > { %v3075_v17 = vadd.f32 %v3074_v7, %v2986_v16  ;;  %v2263_v7 = vld [vmem:[%s4827_s5 + $0x78] sm:$0xff] }
 0x2a0   : > { %v3076_v22 = vpop.f32.mrf.mxu0 }
 0x2a1   : > { %v3168_v19 = vadd.f32 %v3075_v17, %v2292_v42 }
 0x2a2   : > { %v2205_v13 = vpop.f32.mrf.mxu1 }
 0x2a3   : > { %3200 = vst [vmem:[%s4827_s5 + $0x60] sm:$0xff] %v3168_v19  ;;  %2940 = vmatmul.bf16.gmra.mxu2 %v4201_v35  ;;  %v2206_v14 = vadd.f32 %v2205_v13, %v5238_v49  ;;  %v2265_v13 = vld [vmem:[%s4827_s5 + $0x88] sm:$0xff] }
 0x2a4   : > { %v2987_v54 = vpop.f32.mrf.mxu3 }
 0x2a5   : > { %v2988_v12 = vadd.f32 %v2987_v54, %v2898_v38  ;;  %v2295_v23 = vadd.f32 %v2263_v7, %v2206_v14 }
 0x2a6   : > { %v2901_v39 = vpop.f32.mrf.mxu2 }
 0x2a7   : > { %v3077_v57 = vadd.f32 %v3076_v22, %v2988_v12 }
 0x2a8   : > { %v3079_v40 = vpop.f32.mrf.mxu0 }
 0x2a9   : > { %v3169_v45 = vadd.f32 %v3077_v57, %v2293_v10  ;;  %3029 = vmatmul.bf16.gmra.mxu3 %v4205_v4  ;;  %v2266_v10 = vld [vmem:[%s4827_s5 + $0x90] sm:$0xff] }
 0x2aa   : > { %v2208_v60 = vpop.f32.mrf.mxu1 }
 0x2ab   : > { %3201 = vst [vmem:[%s4827_s5 + $0x68] sm:$0xff] %v3169_v45  ;;  %3118 = vmatmul.bf16.gmra.mxu0 %v4209_v33  ;;  %v2209_v52 = vadd.f32 %v2208_v60, %v5243_v41 }
 0x2ac   : > { %v2990_v48 = vpop.f32.mrf.mxu3 }
 0x2ad   : > { %v2991_v46 = vadd.f32 %v2990_v48, %v2901_v39  ;;  %v2296_v42 = vadd.f32 %v2264_v18, %v2209_v52 }
 0x2ae   : > { %v2903_v59 = vpop.f32.mrf.mxu2 }
 0x2af   : > { %v3080_v55 = vadd.f32 %v3079_v40, %v2991_v46 }
 0x2b0   : > { %v3081_v20 = vpop.f32.mrf.mxu0 }
 0x2b1   : > { %v3170_v50 = vadd.f32 %v3080_v55, %v2294_v27 }
 0x2b2   : > { %v2210_v0 = vpop.f32.mrf.mxu1 }
 0x2b3   : > { %3202 = vst [vmem:[%s4827_s5 + $0x70] sm:$0xff] %v3170_v50  ;;  %v2211_v19 = vadd.f32 %v2210_v0, %v5248_v30 }
 0x2b4   : > { %v2992_v36 = vpop.f32.mrf.mxu3 }
 0x2b5   : > { %v2993_v26 = vadd.f32 %v2992_v36, %v2903_v59  ;;  %v2297_v54 = vadd.f32 %v2265_v13, %v2211_v19  ;;  %v2270_v19 = vld [vmem:[%s4827_s5 + $0xb0] sm:$0xff] }
 0x2b6   : > { %v2906_v62 = vpop.f32.mrf.mxu2 }
 0x2b7   : > { %v3082_v3 = vadd.f32 %v3081_v20, %v2993_v26  ;;  %v2268_v26 = vld [vmem:[%s4827_s5 + $0xa0] sm:$0xff] }
 0x2b8   : > { %v3084_v47 = vpop.f32.mrf.mxu0 }
 0x2b9   : > { %v3171_v44 = vadd.f32 %v3082_v3, %v2295_v23 }
 0x2ba   : > { %v2213_v58 = vpop.f32.mrf.mxu1 }
 0x2bb   : > { %3203 = vst [vmem:[%s4827_s5 + $0x78] sm:$0xff] %v3171_v44  ;;  %v2214_v4 = vadd.f32 %v2213_v58, %v5253_v1 }
 0x2bc   : > { %v2995_v15 = vpop.f32.mrf.mxu3 }
 0x2bd   : > { %v2996_v16 = vadd.f32 %v2995_v15, %v2906_v62  ;;  %v2298_v33 = vadd.f32 %v2266_v10, %v2214_v4  ;;  %v2269_v15 = vld [vmem:[%s4827_s5 + $0xa8] sm:$0xff] }
 0x2be   : > { %v2908_v38 = vpop.f32.mrf.mxu2 }
 0x2bf   : > { %v3085_v49 = vadd.f32 %v3084_v47, %v2996_v16 }
 0x2c0   : > { %v3086_v17 = vpop.f32.mrf.mxu0 }
 0x2c1   : > { %v3172_v35 = vadd.f32 %v3085_v49, %v2296_v42 }
 0x2c2   : > { %v2215_v22 = vpop.f32.mrf.mxu1 }
 0x2c3   : > { %3204 = vst [vmem:[%s4827_s5 + $0x80] sm:$0xff] %v3172_v35  ;;  %v2216_v2 = vadd.f32 %v2215_v22, %v5258_v37 }
 0x2c4   : > { %v2997_v28 = vpop.f32.mrf.mxu3 }
 0x2c5   : > { %v2998_v11 = vadd.f32 %v2997_v28, %v2908_v38  ;;  %v2299_v27 = vadd.f32 %v2267_v29, %v2216_v2 }
 0x2c6   : > { %v2911_v32 = vpop.f32.mrf.mxu2 }
 0x2c7   : > { %v3087_v41 = vadd.f32 %v3086_v17, %v2998_v11 }
 0x2c8   : > { %v3089_v34 = vpop.f32.mrf.mxu0 }
 0x2c9   : > { %v3173_v24 = vadd.f32 %v3087_v41, %v2297_v54 }
 0x2ca   : > { %v2218_v12 = vpop.f32.mrf.mxu1 }
 0x2cb   : > { %3205 = vst [vmem:[%s4827_s5 + $0x88] sm:$0xff] %v3173_v24  ;;  %v2219_v0 = vadd.f32 %v2218_v12, %v5263_v21  ;;  %v2271_v12 = vld [vmem:[%s4827_s5 + $0xb8] sm:$0xff] }
 0x2cc   : > { %v3000_v56 = vpop.f32.mrf.mxu3 }
 0x2cd   : > { %v3001_v39 = vadd.f32 %v3000_v56, %v2911_v32  ;;  %v2300_v62 = vadd.f32 %v2268_v26, %v2219_v0 }
 0x2ce   : > { %v2913_v57 = vpop.f32.mrf.mxu2 }
 0x2cf   : > { %v3090_v30 = vadd.f32 %v3089_v34, %v3001_v39 }
 0x2d0   : > { %v3091_v40 = vpop.f32.mrf.mxu0 }
 0x2d1   : > { %v3174_v45 = vadd.f32 %v3090_v30, %v2298_v33 }
 0x2d2   : > { %v2220_v60 = vpop.f32.mrf.mxu1 }
 0x2d3   : > { %3206 = vst [vmem:[%s4827_s5 + $0x90] sm:$0xff] %v3174_v45  ;;  %v2221_v44 = vadd.f32 %v2220_v60, %v5268_v6 }
 0x2d4   : > { %v3002_v48 = vpop.f32.mrf.mxu3 }
 0x2d5   : > { %v3003_v46 = vadd.f32 %v3002_v48, %v2913_v57  ;;  %v2301_v21 = vadd.f32 %v2269_v15, %v2221_v44 }
 0x2d6   : > { %v2916_v59 = vpop.f32.mrf.mxu2 }
 0x2d7   : > { %v3092_v1 = vadd.f32 %v3091_v40, %v3003_v46  ;;  %v2272_v40 = vld [vmem:[%s4827_s5 + $0xc0] sm:$0xff] }
 0x2d8   : > { %v3094_v55 = vpop.f32.mrf.mxu0 }
 0x2d9   : > { %v3175_v20 = vadd.f32 %v3092_v1, %v2299_v27  ;;  %v2273_v1 = vld [vmem:[%s4827_s5 + $0xc8] sm:$0xff] }
 0x2da   : > { %v2223_v50 = vpop.f32.mrf.mxu1 }
 0x2db   : > { %3207 = vst [vmem:[%s4827_s5 + $0x98] sm:$0xff] %v3175_v20  ;;  %v2224_v17 = vadd.f32 %v2223_v50, %v5273_v8 }
 0x2dc   : > { %v3005_v14 = vpop.f32.mrf.mxu3 }
 0x2dd   : > { %v3006_v36 = vadd.f32 %v3005_v14, %v2916_v59  ;;  %v2302_v6 = vadd.f32 %v2270_v19, %v2224_v17  ;;  %v2276_v19 = vld [vmem:[%s4827_s5 + $0xe0] sm:$0xff] }
 0x2de   : > { %v2918_v7 = vpop.f32.mrf.mxu2 }
 0x2df   : > { %v3095_v37 = vadd.f32 %v3094_v55, %v3006_v36 }
 0x2e0   : > { %v3096_v23 = vpop.f32.mrf.mxu0 }
 0x2e1   : > { %v3176_v3 = vadd.f32 %v3095_v37, %v2300_v62  ;;  %v2274_v62 = vld [vmem:[%s4827_s5 + $0xd0] sm:$0xff] }
 0x2e2   : > { %v2225_v47 = vpop.f32.mrf.mxu1 }
 0x2e3   : > { %3208 = vst [vmem:[%s4827_s5 + $0xa0] sm:$0xff] %v3176_v3  ;;  %v2226_v54 = vadd.f32 %v2225_v47, %v5278_v63 }
 0x2e4   : > { %v3007_v58 = vpop.f32.mrf.mxu3 }
 0x2e5   : > { %v3008_v52 = vadd.f32 %v3007_v58, %v2918_v7  ;;  %v2303_v8 = vadd.f32 %v2271_v12, %v2226_v54 }
 0x2e6   : > { %v2921_v16 = vpop.f32.mrf.mxu2 }
 0x2e7   : > { %v3097_v18 = vadd.f32 %v3096_v23, %v3008_v52 }
 0x2e8   : > { %v3099_v38 = vpop.f32.mrf.mxu0 }
 0x2e9   : > { %v3177_v42 = vadd.f32 %v3097_v18, %v2301_v21 }
 0x2ea   : > { %v2228_v49 = vpop.f32.mrf.mxu1 }
 0x2eb   : > { %3209 = vst [vmem:[%s4827_s5 + $0xa8] sm:$0xff] %v3177_v42  ;;  %v2229_v57 = vadd.f32 %v2228_v49, %v5288_v5 }
 0x2ec   : > { %v3010_v35 = vpop.f32.mrf.mxu3 }
 0x2ed   : > { %v3011_v22 = vadd.f32 %v3010_v35, %v2921_v16  ;;  %v2304_v63 = vadd.f32 %v2272_v40, %v2229_v57  ;;  %v2275_v16 = vld [vmem:[%s4827_s5 + $0xd8] sm:$0xff] }
 0x2ee   : > { %v2923_v28 = vpop.f32.mrf.mxu2 }
 0x2ef   : > { %v3100_v11 = vadd.f32 %v3099_v38, %v3011_v22 }
 0x2f0   : > { %v3101_v13 = vpop.f32.mrf.mxu0 }
 0x2f1   : > { %v3178_v32 = vadd.f32 %v3100_v11, %v2302_v6 }
 0x2f2   : > { %v2230_v34 = vpop.f32.mrf.mxu1 }
 0x2f3   : > { %3210 = vst [vmem:[%s4827_s5 + $0xb0] sm:$0xff] %v3178_v32  ;;  %v2231_v29 = vadd.f32 %v2230_v34, %v5293_v31  ;;  %v2277_v34 = vld [vmem:[%s4827_s5 + $0xe8] sm:$0xff] }
 0x2f4   : > { %v3012_v41 = vpop.f32.mrf.mxu3 }
 0x2f5   : > { %v3013_v24 = vadd.f32 %v3012_v41, %v2923_v28  ;;  %v2305_v20 = vadd.f32 %v2273_v1, %v2231_v29 }
 0x2f6   : > { %v2926_v4 = vpop.f32.mrf.mxu2 }
 0x2f7   : > { %v3102_v56 = vadd.f32 %v3101_v13, %v3013_v24 }
 0x2f8   : > { %v3104_v39 = vpop.f32.mrf.mxu0 }
 0x2f9   : > { %v3179_v10 = vadd.f32 %v3102_v56, %v2303_v8 }
 0x2fa   : > { %v2233_v60 = vpop.f32.mrf.mxu1 }
 0x2fb   : > { %3211 = vst [vmem:[%s4827_s5 + $0xb8] sm:$0xff] %v3179_v10  ;;  %v2234_v36 = vadd.f32 %v2233_v60, %v5298_v51 }
 0x2fc   : > { %v3015_v33 = vpop.f32.mrf.mxu3 }
 0x2fd   : > { %v3016_v30 = vadd.f32 %v3015_v33, %v2926_v4  ;;  %v2306_v31 = vadd.f32 %v2274_v62, %v2234_v36  ;;  %v2278_v33 = vld [vmem:[%s4827_s5 + $0xf0] sm:$0xff] }
 0x2fe   : > { %v2928_v45 = vpop.f32.mrf.mxu2 }
 0x2ff   : > { %v3105_v2 = vadd.f32 %v3104_v39, %v3016_v30 }
 0x300   : > { %v3106_v48 = vpop.f32.mrf.mxu0 }
 0x301   : > { %v3180_v46 = vadd.f32 %v3105_v2, %v2304_v63 }
 0x302   : > { %v2235_v0 = vpop.f32.mrf.mxu1 }
 0x303   : > { %3212 = vst [vmem:[%s4827_s5 + $0xc0] sm:$0xff] %v3180_v46  ;;  %v2236_v58 = vadd.f32 %v2235_v0, %v5303_v61 }
 0x304   : > { %v3017_v59 = vpop.f32.mrf.mxu3 }
 0x305   : > { %v3018_v27 = vadd.f32 %v3017_v59, %v2928_v45  ;;  %v2307_v51 = vadd.f32 %v2275_v16, %v2236_v58 }
 0x306   : > { %v2931_v55 = vpop.f32.mrf.mxu2 }
 0x307   : > { %v3107_v5 = vadd.f32 %v3106_v48, %v3018_v27  ;;  %v2279_v48 = vld [vmem:[%s4827_s5 + $0xf8] sm:$0xff] }
 0x308   : > { %v3109_v50 = vpop.f32.mrf.mxu0 }
 0x309   : > { %v3181_v14 = vadd.f32 %v3107_v5, %v2305_v20 }
 0x30a   : > { %v2238_v44 = vpop.f32.mrf.mxu1 }
 0x30b   : > { %3213 = vst [vmem:[%s4827_s5 + $0xc8] sm:$0xff] %v3181_v14  ;;  %v2239_v49 = vadd.f32 %v2238_v44, %v5308_v25 }
 0x30c   : > { %v3020_v26 = vpop.f32.mrf.mxu3 }
 0x30d   : > { %v3021_v7 = vadd.f32 %v3020_v26, %v2931_v55  ;;  %v2308_v61 = vadd.f32 %v2276_v19, %v2239_v49 }
 0x30e   : > { %v2933_v37 = vpop.f32.mrf.mxu2 }
 0x30f   : > { %v3110_v23 = vadd.f32 %v3109_v50, %v3021_v7 }
 0x310   : > { %v3111_v3 = vpop.f32.mrf.mxu0 }
 0x311   : > { %v3182_v47 = vadd.f32 %v3110_v23, %v2306_v31 }
 0x312   : > { %v2240_v35 = vpop.f32.mrf.mxu1 }
 0x313   : > { %3214 = vst [vmem:[%s4827_s5 + $0xd0] sm:$0xff] %v3182_v47  ;;  %v2241_v32 = vadd.f32 %v2240_v35, %v5313_v43 }
 0x314   : > { %v3022_v52 = vpop.f32.mrf.mxu3 }
 0x315   : > { %v3023_v15 = vadd.f32 %v3022_v52, %v2933_v37  ;;  %v2309_v25 = vadd.f32 %v2277_v34, %v2241_v32 }
 0x316   : > { %v2936_v21 = vpop.f32.mrf.mxu2 }
 0x317   : > { %v3112_v18 = vadd.f32 %v3111_v3, %v3023_v15 }
 0x318   : > { %v3114_v38 = vpop.f32.mrf.mxu0 }
 0x319   : > { %v3183_v42 = vadd.f32 %v3112_v18, %v2307_v51 }
 0x31a   : > { %v2243_v24 = vpop.f32.mrf.mxu1 }
 0x31b   : > { %3215 = vst [vmem:[%s4827_s5 + $0xd8] sm:$0xff] %v3183_v42  ;;  %v2244_v56 = vadd.f32 %v2243_v24, %v5318_v53 }
 0x31c   : > { %v3025_v17 = vpop.f32.mrf.mxu3 }
 0x31d   : > { %v3026_v22 = vadd.f32 %v3025_v17, %v2936_v21  ;;  %v2310_v43 = vadd.f32 %v2278_v33, %v2244_v56 }
 0x31e   : > { %v2938_v28 = vpop.f32.mrf.mxu2 }
 0x31f   : > { %v3115_v6 = vadd.f32 %v3114_v38, %v3026_v22 }
 0x320   : > { %v3116_v13 = vpop.f32.mrf.mxu0 }
 0x321   : > { %v3184_v11 = vadd.f32 %v3115_v6, %v2308_v61 }
 0x322   : > { %v2245_v40 = vpop.f32.mrf.mxu1 }
 0x323   : > { %3216 = vst [vmem:[%s4827_s5 + $0xe0] sm:$0xff] %v3184_v11  ;;  %v2246_v53 = vadd.f32 %v2245_v40, %v5321_v9 }
 0x324   : > { %v3027_v54 = vpop.f32.mrf.mxu3 }
 0x325   : > { %v3028_v41 = vadd.f32 %v3027_v54, %v2938_v28  ;;  %v2311_v29 = vadd.f32 %v2279_v48, %v2246_v53 }
 0x326   : > { %v2941_v4 = vpop.f32.mrf.mxu2 }
 0x327   : > { %v3117_v12 = vadd.f32 %v3116_v13, %v3028_v41 }
 0x328   : > { %v3119_v39 = vpop.f32.mrf.mxu0 }
 0x329   : > { %v3185_v8 = vadd.f32 %v3117_v12, %v2309_v25 }
 0x32b   : > { %3217 = vst [vmem:[%s4827_s5 + $0xe8] sm:$0xff] %v3185_v8 }
 0x32c   : > { %v3030_v10 = vpop.f32.mrf.mxu3 }
 0x32d   : > { %v3031_v57 = vadd.f32 %v3030_v10, %v2941_v4 }
 0x32e   : > { %v2943_v60 = vpop.f32.mrf.mxu2 }
 0x32f   : > { %v3120_v30 = vadd.f32 %v3119_v39, %v3031_v57 }
 0x330   : > { %v3121_v46 = vpop.f32.mrf.mxu0 }
 0x331   : > { %v3186_v45 = vadd.f32 %v3120_v30, %v2310_v43 }
 0x333   : > { %3218 = vst [vmem:[%s4827_s5 + $0xf0] sm:$0xff] %v3186_v45 }
 0x334   : > { %v3032_v63 = vpop.f32.mrf.mxu3 }
 0x335   : > { %v3033_v2 = vadd.f32 %v3032_v63, %v2943_v60 }
 0x337   : > { %v3122_v59 = vadd.f32 %v3121_v46, %v3033_v2 }
 0x339   : > { %v3187_v27 = vadd.f32 %v3122_v59, %v2311_v29 }
 0x33b   : > { %3219 = vst [vmem:[%s4827_s5 + $0xf8] sm:$0xff] %v3187_v27 }
 0x33c   : > { %4643 = shalt.err (!%p4640_p3)
}
 0x33d   : > { %s4704_s26 = smov 128   ;;  %s4705_s5 = smov 8  }
 0x33e   : > { %4555 = dma.vmem_to_hbm [thread:$0]  (%p4766_p4), %s3237_s29, 4096, %s3239_s30, %s3221_s15, %s4704_s26, %s4704_s26, %s4705_s5  }
 0x33f PF: > { %p4561_p5 = scmp.ge.s32.totalorder %s4700_s17, 2  ;;  %s3253_s11 = sand.u32 1, %s4680_s12  }
 0x340   : > { %s3254_s18 = scalar_lea.sflag [#allocation6], %s3253_s11 }
 0x341   : > { %p4558_p6 = pnand %p4561_p5, %p4773_p8 }
 0x343   : > { %p4559_p7 = pneg %p4558_p6 }
 0x345   : > { %4675 = dma.done.wait (%p4559_p7), %s3254_s18, 4096  }
 0x346   : > { %4677 = vsyncadd (%p4559_p7), %s3254_s18, 4294963200  ;;  %s16_s17 = sadd.s32 1, %s4700_s17   ;;  %s5465_s12 = smov %s4684_s13 }
 0x347   : > { %p13_p9 = scmp.ge.s32.totalorder %s16_s17, 4   ;;  %s5466_s13 = smov %s4688_s14 }
 0x348   : > { %s5467_s14 = smov %s4779_s25  ;;  %s5468_s15 = smov %s4696_s16 }
 0x349   : > { %s5469_s16 = smov %s5471_s20  ;;  %15 = sbr.rel (!%p13_p9) target bundleno = 4 (0x4), region = 151 }
 0x34e   :  { %3260 = vsyncpa [#allocation6], 1 }
 0x34f   :  { %3262 = vsyncpa [#allocation6 + $0x1], 1 }
 0x350   :  { %3263 = vsyncmov [#allocation4] }
 0x353   :  { %s3264_s22 = vpop.sfrf %3263 }
 0x354   :  { %p4311_p4 = scmp.ne.s32.totalorder %s3264_s22, 0 }
 0x356   :  { %3268 = shalt.err (%p4311_p4)  }
 0x357   :  { %3270 = vsyncmov [#allocation4 + $0x1] }
 0x35a   :  { %s3271_s24 = vpop.sfrf %3270 }
 0x35b   :  { %p4312_p8 = scmp.ne.s32.totalorder %s3271_s24, 0 }
 0x35d   :  { %3275 = shalt.err (%p4312_p8)  }
 0x35e   :  { %3277 = vsyncmov [#allocation4 + $0x2] }
 0x361   :  { %s3278_s19 = vpop.sfrf %3277 }
 0x362   :  { %p4313_p10 = scmp.ne.s32.totalorder %s3278_s19, 0 }
 0x364   :  { %3282 = shalt.err (%p4313_p10)  }

</bundles_post_ra>
